<compile_context>
chip_gen: v7x
topology: tpu7x:2x2x1
jax: 0.10.0
libtpu: 0.0.40
codegen_flags: <defaults>
</compile_context>

<pallas_src>
import math
import functools

import jax
import jax.numpy as jnp
from jax.experimental import pallas as pl
from jax.experimental.pallas import tpu as pltpu


_STATIC_HEAD_UNROLL = 8   # static Python unroll up to this many heads


def _tile(dim, cap, align):
    """Largest tile <= cap that is a multiple of `align` and divides `dim`.
    Falls back to the full dimension (always a legal block size)."""
    if dim <= cap:
        return dim
    t = (cap // align) * align
    while t >= align:
        if dim % t == 0:
            return t
        t -= align
    return dim


def _roundup(n, m):
    return ((n + m - 1) // m) * m


@functools.lru_cache(maxsize=1)
def _vmem_capacity_bytes():
    """Per-core VMEM capacity (128 MiB on v5e/v6e, 64 MiB on v7x)."""
    try:
        return int(pltpu.get_tpu_info().vmem_capacity_bytes)
    except Exception:
        return 64 * 1024 * 1024   # conservative fallback (v7x-sized)


def _vmem_limit_bytes():
    # 48 MiB on v7x, 96 MiB on v5e/v6e (v5e default scoped limit is only 16 MiB,
    # so an explicit limit matters there).
    return (3 * _vmem_capacity_bytes()) // 4


def _flash_tile_budget_bytes():
    return _vmem_capacity_bytes() // 2


def _flash_vmem_bytes(tq, tk, E, head, d_k):
    """Lane/sublane-padded VMEM footprint of the flash kernel's buffers."""
    e_pad = _roundup(E, 128)
    # double-buffered bf16 q / k / v / out blocks
    blocks = 2 * 2 * (_roundup(tq, 16) * e_pad
                      + 2 * _roundup(tk, 16) * e_pad
                      + _roundup(tq, 16) * e_pad)
    # f32 scratch: m,l pad their size-1 lane dim to 128; acc pads d_k to 128
    scratch = 4 * head * _roundup(tq, 8) * (2 * 128 + _roundup(d_k, 128))
    return blocks + scratch


# ---------------------------------------------------------------------------
# Stacked / tiled linear:  y[g] = x[g] @ wt[g] + b[g]
# wt is ALREADY transposed to (G, Din, Dout) and cast to bf16 (done once in
# prepare_params).  One pallas_call handles a stack of G linears (G=3 fuses QKV).
# ---------------------------------------------------------------------------
def _stacked_linear_kernel(x_ref, wt_ref, b_ref, o_ref, acc_ref):
    k = pl.program_id(3)

    @pl.when(k == 0)
    def _():
        acc_ref[...] = jnp.zeros_like(acc_ref)

    acc_ref[...] += jnp.dot(x_ref[0], wt_ref[0],
                            preferred_element_type=jnp.float32)

    @pl.when(k == pl.num_programs(3) - 1)
    def _():
        o_ref[0] = (acc_ref[...] + b_ref[0]).astype(o_ref.dtype)


def stacked_linear(x_stack, wt_stack, b_stack, *, out_dtype,
                   tm_cap=512, tn_cap=256, tk_cap=2048):
    """x_stack: (G,N,Din); wt_stack: (G,Din,Dout) bf16; b_stack: (G,1,Dout) f32."""
    G, N, Din = x_stack.shape
    Dout = wt_stack.shape[2]

    xb = x_stack.astype(jnp.bfloat16)

    tm = _tile(N, tm_cap, 16)      # bf16 packs 16 rows per sublane group
    tn = _tile(Dout, tn_cap, 128)
    tk = _tile(Din, tk_cap, 128)   # full-E contraction (single k step) for E<=2048

    return pl.pallas_call(
        _stacked_linear_kernel,
        out_shape=jax.ShapeDtypeStruct((G, N, Dout), out_dtype),
        grid_spec=pltpu.PrefetchScalarGridSpec(
            num_scalar_prefetch=0,
            grid=(G, N // tm, Dout // tn, Din // tk),
            in_specs=[
                pl.BlockSpec((1, tm, tk), lambda g, i, j, k: (g, i, k)),
                pl.BlockSpec((1, tk, tn), lambda g, i, j, k: (g, k, j)),
                pl.BlockSpec((1, 1, tn), lambda g, i, j, k: (g, 0, j)),
            ],
            out_specs=pl.BlockSpec((1, tm, tn), lambda g, i, j, k: (g, i, j)),
            scratch_shapes=[pltpu.VMEM((tm, tn), jnp.float32)],
        ),
        compiler_params=pltpu.CompilerParams(
            dimension_semantics=("parallel", "parallel", "parallel", "arbitrary"),
            vmem_limit_bytes=_vmem_limit_bytes(),
        ),
    )(xb, wt_stack, b_stack)


# ---------------------------------------------------------------------------
# Flash-style multi-head attention, heads packed along the last (lane) axis.
#   qkv: (3, B, S, E);  Q must already carry the 1/sqrt(d_k) scale.
#   output: (B, S, E) bf16
# ---------------------------------------------------------------------------
def _flash_mha_kernel(q_ref, k_ref, v_ref, o_ref, m_sc, l_sc, acc_sc, *,
                      head, d_k):
    kv = pl.program_id(2)

    @pl.when(kv == 0)
    def _():
        m_sc[...] = jnp.full_like(m_sc, -jnp.inf)
        l_sc[...] = jnp.zeros_like(l_sc)
        acc_sc[...] = jnp.zeros_like(acc_sc)

    def head_step(h, col):
        q_h = q_ref[0, 0, :, col]                     # (tq, d_k) bf16
        k_h = k_ref[0, 0, :, col]                     # (tk, d_k) bf16
        v_h = v_ref[0, 0, :, col]                     # (tk, d_k) bf16

        # scores = q_h @ k_h^T  (softmax scale already folded into W_q / b_q)
        s = jax.lax.dot_general(q_h, k_h, (((1,), (1,)), ((), ())),
                                preferred_element_type=jnp.float32)   # (tq, tk)

        m_prev = m_sc[h]                                              # (tq, 1)
        m_new = jnp.maximum(m_prev, s.max(axis=-1, keepdims=True))
        alpha = jnp.exp(m_prev - m_new)                               # f32, tiny
        # bf16 exponentials (EUP throughput win on v6e/v7x); f32 accumulation.
        p = jnp.exp((s - m_new).astype(jnp.bfloat16))                 # (tq, tk)
        l_sc[h] = alpha * l_sc[h] + jnp.sum(p, axis=-1, keepdims=True,
                                            dtype=jnp.float32)
        acc_sc[h] = alpha * acc_sc[h] + jnp.dot(
            p, v_h, preferred_element_type=jnp.float32)
        m_sc[h] = m_new

    if head <= _STATIC_HEAD_UNROLL:
        # Small head counts: full static unroll with static lane slices.
        for h in range(head):
            head_step(h, pl.ds(h * d_k, d_k))
    else:
        # Large head counts: rolled loop bounds vreg live ranges (no spills).
        @pl.loop(0, head)
        def _(h):
            head_step(h, pl.ds(pl.multiple_of(h * d_k, d_k), d_k))

    @pl.when(kv == pl.num_programs(2) - 1)
    def _():
        # NOTE: approx reciprocal (EUP) deviates ~1e-3 relative from exact divide.
        if head <= _STATIC_HEAD_UNROLL:
            outs = []
            for h in range(head):
                inv_l = pl.reciprocal(l_sc[h], approx=True)
                outs.append(acc_sc[h] * inv_l)                        # (tq, d_k)
            # single lane-dense store of all heads: (tq, E)
            o_ref[0] = jnp.concatenate(outs, axis=-1).astype(o_ref.dtype)
        else:
            @pl.loop(0, head)
            def _(h):
                col = pl.ds(pl.multiple_of(h * d_k, d_k), d_k)
                inv_l = pl.reciprocal(l_sc[h], approx=True)
                o_ref[0, :, col] = (acc_sc[h] * inv_l).astype(o_ref.dtype)


def flash_mha(qkv, head, *, tq_cap=512, tk_cap=256):
    _, B, S, E = qkv.shape
    assert E % head == 0, "embedding_dim must be divisible by head"
    d_k = E // head

    tk = _tile(S, tk_cap, 16)
    tq = _tile(S, tq_cap, 16)

    # Shrink tq until the lane-padded VMEM footprint fits this generation's
    # budget (v7x: 64 MiB/core; v5e/v6e: 128 MiB).
    budget = _flash_tile_budget_bytes()
    while tq > 16 and _flash_vmem_bytes(tq, tk, E, head, d_k) > budget:
        smaller = _tile(S, tq // 2, 16)
        if smaller >= tq:
            break
        tq = smaller

    # Dual-TensorCore chips (v7x): make sure parallel axes expose >= 2 tiles.
    if B * (S // tq) < 2:
        smaller = _tile(S, max(tq // 2, 16), 16)
        if smaller < tq and (S // smaller) >= 2:
            tq = smaller

    kern = functools.partial(_flash_mha_kernel, head=head, d_k=d_k)
    return pl.pallas_call(
        kern,
        out_shape=jax.ShapeDtypeStruct((B, S, E), jnp.bfloat16),
        grid_spec=pltpu.PrefetchScalarGridSpec(
            num_scalar_prefetch=0,
            grid=(B, S // tq, S // tk),
            in_specs=[
                pl.BlockSpec((1, 1, tq, E), lambda b, qi, ki: (0, b, qi, 0)),
                pl.BlockSpec((1, 1, tk, E), lambda b, qi, ki: (1, b, ki, 0)),
                pl.BlockSpec((1, 1, tk, E), lambda b, qi, ki: (2, b, ki, 0)),
            ],
            out_specs=pl.BlockSpec((1, tq, E), lambda b, qi, ki: (b, qi, 0)),
            scratch_shapes=[
                pltpu.VMEM((head, tq, 1), jnp.float32),     # running max m
                pltpu.VMEM((head, tq, 1), jnp.float32),     # running sum l
                pltpu.VMEM((head, tq, d_k), jnp.float32),   # output accumulator
            ],
        ),
        compiler_params=pltpu.CompilerParams(
            dimension_semantics=("parallel", "parallel", "arbitrary"),
            vmem_limit_bytes=_vmem_limit_bytes(),
        ),
    )(qkv, qkv, qkv)


# ---------------------------------------------------------------------------
# One-time parameter preparation (hoisted out of the jitted per-call path):
#   * fold the 1/sqrt(d_k) softmax scale into W_q / b_q
#   * pre-stack, pre-transpose (nn.Linear stores W as (out,in)) and cast to bf16
# ---------------------------------------------------------------------------
def prepare_params(params, head):
    (wq, bq), (wk, bk), (wv, bv), (wo, bo) = params
    E = wq.shape[1]
    assert E % head == 0, "embedding_dim must be divisible by head"
    scale = 1.0 / math.sqrt(E // head)

    wq = wq * scale
    bq = bq * scale

    wt_qkv = jnp.swapaxes(jnp.stack([wq, wk, wv]), 1, 2).astype(jnp.bfloat16)
    b_qkv = jnp.stack([bq, bk, bv]).reshape(3, 1, E).astype(jnp.float32)
    wt_o = wo.T.astype(jnp.bfloat16)[None]          # (1, E, E)
    b_o = bo.reshape(1, 1, E).astype(jnp.float32)
    return (wt_qkv, b_qkv, wt_o, b_o)


# ---------------------------------------------------------------------------
# MultiHeadeAttention forward (eval mode, mask=None)
# ---------------------------------------------------------------------------
@functools.partial(jax.jit, static_argnums=(4,))
def multi_head_attention(prepared, query, key, value, head):
    wt_qkv, b_qkv, wt_o, b_o = prepared
    B, S, E = query.shape

    # Fused Q/K/V projections in one tiled pallas_call; bf16 outputs feed the
    # attention MXU matmuls directly (heads stay packed along the E axis).
    x_stack = jnp.stack([query, key, value]).reshape(3, B * S, E)
    qkv = stacked_linear(x_stack, wt_qkv, b_qkv,
                         out_dtype=jnp.bfloat16).reshape(3, B, S, E)

    attn = flash_mha(qkv, head)                              # (B, S, E) bf16

    out = stacked_linear(attn.reshape(1, B * S, E), wt_o, b_o,
                         out_dtype=jnp.float32)
    return out[0].reshape(B, S, E)


# ---------------------------------------------------------------------------
# Pure-JAX references
# ---------------------------------------------------------------------------
def reference_mha(params, query, key, value, head):
    """Mirrors the PyTorch forward (f32 softmax, bf16 matmul inputs)."""
    B, S, E = query.shape
    d_k = E // head
    (wq, bq), (wk, bk), (wv, bv), (wo, bo) = params

    def lin(x, w, b):
        return jnp.dot(x.astype(jnp.bfloat16), w.T.astype(jnp.bfloat16),
                       preferred_element_type=jnp.float32) + b

    def proj(x, w, b):
        y = lin(x.reshape(B * S, E), w, b).astype(jnp.bfloat16)
        return y.reshape(B, S, head, d_k).transpose(0, 2, 1, 3)   # (B,H,S,dk)

    q, kk, v = proj(query, wq, bq), proj(key, wk, bk), proj(value, wv, bv)
    scores = jnp.einsum("bhqd,bhkd->bhqk", q, kk,
                        preferred_element_type=jnp.float32) / math.sqrt(d_k)
    p = jax.nn.softmax(scores, axis=-1)
    x = jnp.einsum("bhqk,bhkd->bhqd", p.astype(jnp.bfloat16), v,
                   preferred_element_type=jnp.float32)
    x = x.transpose(0, 2, 1, 3).reshape(B * S, E)
    return lin(x, wo, bo).reshape(B, S, E)


def reference_attention_noscale(qkv, head):
    """Plain softmax attention on pre-scaled q (matches flash_mha's contract)."""
    _, B, S, E = qkv.shape
    d_k = E // head
    q, k, v = (qkv[i].reshape(B, S, head, d_k).transpose(0, 2, 1, 3)
               for i in range(3))
    s = jnp.einsum("bhqd,bhkd->bhqk", q, k, preferred_element_type=jnp.float32)
    p = jax.nn.softmax(s, axis=-1)
    o = jnp.einsum("bhqk,bhkd->bhqd", p.astype(jnp.bfloat16), v,
                   preferred_element_type=jnp.float32)
    return o.transpose(0, 2, 1, 3).reshape(B, S, E)


if __name__ == "__main__":
    root = jax.random.PRNGKey(0)

    # ---- Unit test: flash kernel with a multi-tile (b, q, kv) grid ---------
    B, S, E, H = 2, 128, 128, 4
    k1, _ = jax.random.split(root)
    qkv = (0.3 * jax.random.normal(k1, (3, B, S, E), jnp.float32)
           ).astype(jnp.bfloat16)
    attn_out = jax.block_until_ready(flash_mha(qkv, H, tq_cap=64, tk_cap=64))
    attn_ref = reference_attention_noscale(qkv, H)
    a_err = float(jnp.max(jnp.abs(attn_out.astype(jnp.float32) - attn_ref)))
    assert jnp.allclose(attn_out.astype(jnp.float32), attn_ref,
                        atol=2e-2, rtol=2e-2), (
        f"flash_mha mismatch vs reference (max abs err {a_err})")

    # ---- End-to-end test: full MultiHeadeAttention forward -----------------
    B, S, E, H = 2, 8, 32, 4
    keys = jax.random.split(root, 12)

    # 4 linears: W (E, E) torch-style (out, in), b (E,)
    params = []
    for i in range(4):
        w = jax.random.normal(keys[i], (E, E), jnp.float32) * 0.1
        b = jax.random.normal(keys[4 + i], (E,), jnp.float32) * 0.1
        params.append((w, b))

    query = jax.random.normal(keys[8], (B, S, E), jnp.float32)
    key_t = jax.random.normal(keys[9], (B, S, E), jnp.float32)
    value = jax.random.normal(keys[10], (B, S, E), jnp.float32)

    prepared = prepare_params(params, H)     # one-time weight prep (hoisted)
    out = multi_head_attention(prepared, query, key_t, value, H)
    out = jax.block_until_ready(out)

    ref = reference_mha(params, query, key_t, value, H)
    assert out.shape == (B, S, E)
    max_err = float(jnp.max(jnp.abs(out - ref)))
    assert jnp.allclose(out, ref, atol=3e-2, rtol=3e-2), (
        f"mismatch vs reference (max abs err {max_err})")

    print("KERNEL_OK")
</pallas_src>

<mosaic_0001>
module attributes {stable_mosaic.version = 11 : i64} {
  func.func @_flash_mha_kernel(%arg0: i32, %arg1: i32, %arg2: i32, %arg3: memref<1x1x64x128xbf16, #tpu.memory_space<vmem>>, %arg4: memref<1x1x64x128xbf16, #tpu.memory_space<vmem>>, %arg5: memref<1x1x64x128xbf16, #tpu.memory_space<vmem>>, %arg6: memref<1x64x128xbf16, #tpu.memory_space<vmem>>, %arg7: memref<4x64x1xf32, #tpu.memory_space<vmem>>, %arg8: memref<4x64x1xf32, #tpu.memory_space<vmem>>, %arg9: memref<4x64x32xf32, #tpu.memory_space<vmem>>) attributes {dimension_semantics = [#tpu.dimension_semantics<parallel>, #tpu.dimension_semantics<parallel>, #tpu.dimension_semantics<arbitrary>], iteration_bounds = array<i64: 2, 2, 2>, scalar_prefetch = 0 : i64, scratch_operands = 3 : i64, tpu.core_type = #tpu.core_type<tc>, window_params = [{transform_indices = @transform_0, window_bounds = array<i64: 1, 1, 64, 128>}, {transform_indices = @transform_1, window_bounds = array<i64: 1, 1, 64, 128>}, {transform_indices = @transform_2, window_bounds = array<i64: 1, 1, 64, 128>}, {transform_indices = @transform_3, window_bounds = array<i64: 1, 64, 128>}]} {
    %c0_i32 = arith.constant 0 : i32
    %0 = arith.cmpi eq, %arg2, %c0_i32 : i32
    %1 = arith.extui %0 : i1 to i32
    %c0_i32_0 = arith.constant 0 : i32
    %2 = arith.cmpi ne, %1, %c0_i32_0 : i32
    scf.if %2 {
      %cst_130 = arith.constant 0xFF800000 : f32
      %166 = vector.broadcast %cst_130 : f32 to vector<4x64x1xf32>
      %c0_131 = arith.constant 0 : index
      %c0_132 = arith.constant 0 : index
      %c0_133 = arith.constant 0 : index
      %167 = vector.load %arg7[%c0_131, %c0_132, %c0_133] : memref<4x64x1xf32, #tpu.memory_space<vmem>>, vector<4x64x1xf32>
      tpu.vector_store %arg7[%c0_131, %c0_132, %c0_133], %166 {strides = array<i32>} : memref<4x64x1xf32, #tpu.memory_space<vmem>>, vector<4x64x1xf32>,
      %cst_134 = arith.constant 0.000000e+00 : f32
      %168 = vector.broadcast %cst_134 : f32 to vector<4x64x1xf32>
      %c0_135 = arith.constant 0 : index
      %c0_136 = arith.constant 0 : index
      %c0_137 = arith.constant 0 : index
      %169 = vector.load %arg8[%c0_135, %c0_136, %c0_137] : memref<4x64x1xf32, #tpu.memory_space<vmem>>, vector<4x64x1xf32>
      tpu.vector_store %arg8[%c0_135, %c0_136, %c0_137], %168 {strides = array<i32>} : memref<4x64x1xf32, #tpu.memory_space<vmem>>, vector<4x64x1xf32>,
      %cst_138 = arith.constant 0.000000e+00 : f32
      %170 = vector.broadcast %cst_138 : f32 to vector<4x64x32xf32>
      %c0_139 = arith.constant 0 : index
      %c0_140 = arith.constant 0 : index
      %c0_141 = arith.constant 0 : index
      %171 = vector.load %arg9[%c0_139, %c0_140, %c0_141] : memref<4x64x32xf32, #tpu.memory_space<vmem>>, vector<4x64x32xf32>
      tpu.vector_store %arg9[%c0_139, %c0_140, %c0_141], %170 {strides = array<i32>} : memref<4x64x32xf32, #tpu.memory_space<vmem>>, vector<4x64x32xf32>,
    } else {
    }
    %c0 = arith.constant 0 : index
    %c0_1 = arith.constant 0 : index
    %c0_2 = arith.constant 0 : index
    %c0_3 = arith.constant 0 : index
    %3 = vector.load %arg3[%c0, %c0_1, %c0_2, %c0_3] : memref<1x1x64x128xbf16, #tpu.memory_space<vmem>>, vector<1x1x64x32xbf16>
    %4 = vector.shape_cast %3 : vector<1x1x64x32xbf16> to vector<64x32xbf16>
    %c0_4 = arith.constant 0 : index
    %c0_5 = arith.constant 0 : index
    %c0_6 = arith.constant 0 : index
    %c0_7 = arith.constant 0 : index
    %5 = vector.load %arg4[%c0_4, %c0_5, %c0_6, %c0_7] : memref<1x1x64x128xbf16, #tpu.memory_space<vmem>>, vector<1x1x64x32xbf16>
    %6 = vector.shape_cast %5 : vector<1x1x64x32xbf16> to vector<64x32xbf16>
    %c0_8 = arith.constant 0 : index
    %c0_9 = arith.constant 0 : index
    %c0_10 = arith.constant 0 : index
    %c0_11 = arith.constant 0 : index
    %7 = vector.load %arg5[%c0_8, %c0_9, %c0_10, %c0_11] : memref<1x1x64x128xbf16, #tpu.memory_space<vmem>>, vector<1x1x64x32xbf16>
    %8 = vector.shape_cast %7 : vector<1x1x64x32xbf16> to vector<64x32xbf16>
    %cst = arith.constant dense<0.000000e+00> : vector<64x64xf32>
    %9 = tpu.matmul %4, %6, %cst {dimension_numbers = #tpu.dot_dimension_numbers<[1], [1], [0], [0], [0, 0, 1, 0], [], []>} : vector<64x32xbf16>, vector<64x32xbf16>, vector<64x64xf32> -> vector<64x64xf32>
    %c0_12 = arith.constant 0 : index
    %c0_13 = arith.constant 0 : index
    %c0_14 = arith.constant 0 : index
    %10 = vector.load %arg7[%c0_12, %c0_13, %c0_14] : memref<4x64x1xf32, #tpu.memory_space<vmem>>, vector<1x64x1xf32>
    %11 = vector.shape_cast %10 : vector<1x64x1xf32> to vector<64x1xf32>
    %cst_15 = arith.constant dense<0xFF800000> : vector<64xf32>
    %12 = vector.multi_reduction <maximumf>, %9, %cst_15 [1] : vector<64x64xf32> to vector<64xf32>
    %13 = vector.shape_cast %12 : vector<64xf32> to vector<64x1xf32>
    %14 = arith.maximumf %11, %13 : vector<64x1xf32>
    %15 = arith.subf %11, %14 : vector<64x1xf32>
    %16 = math.exp %15 : vector<64x1xf32>
    %17 = vector.broadcast %14 : vector<64x1xf32> to vector<64x64xf32>
    %18 = arith.subf %9, %17 : vector<64x64xf32>
    %19 = arith.truncf %18 : vector<64x64xf32> to vector<64x64xbf16>
    %20 = math.exp %19 : vector<64x64xbf16>
    %c0_16 = arith.constant 0 : index
    %c0_17 = arith.constant 0 : index
    %c0_18 = arith.constant 0 : index
    %21 = vector.load %arg8[%c0_16, %c0_17, %c0_18] : memref<4x64x1xf32, #tpu.memory_space<vmem>>, vector<1x64x1xf32>
    %22 = vector.shape_cast %21 : vector<1x64x1xf32> to vector<64x1xf32>
    %23 = arith.mulf %16, %22 : vector<64x1xf32>
    %24 = arith.extf %20 : vector<64x64xbf16> to vector<64x64xf32>
    %cst_19 = arith.constant dense<0.000000e+00> : vector<64xf32>
    %25 = vector.multi_reduction <add>, %24, %cst_19 [1] : vector<64x64xf32> to vector<64xf32>
    %26 = vector.shape_cast %25 : vector<64xf32> to vector<64x1xf32>
    %27 = arith.addf %23, %26 : vector<64x1xf32>
    %c0_20 = arith.constant 0 : index
    %c0_21 = arith.constant 0 : index
    %c0_22 = arith.constant 0 : index
    %28 = vector.load %arg8[%c0_20, %c0_21, %c0_22] : memref<4x64x1xf32, #tpu.memory_space<vmem>>, vector<1x64x1xf32>
    %29 = vector.shape_cast %28 : vector<1x64x1xf32> to vector<64x1xf32>
    %30 = vector.shape_cast %27 : vector<64x1xf32> to vector<1x64x1xf32>
    tpu.vector_store %arg8[%c0_20, %c0_21, %c0_22], %30 {strides = array<i32>} : memref<4x64x1xf32, #tpu.memory_space<vmem>>, vector<1x64x1xf32>,
    %c0_23 = arith.constant 0 : index
    %c0_24 = arith.constant 0 : index
    %c0_25 = arith.constant 0 : index
    %31 = vector.load %arg9[%c0_23, %c0_24, %c0_25] : memref<4x64x32xf32, #tpu.memory_space<vmem>>, vector<1x64x32xf32>
    %32 = vector.shape_cast %31 : vector<1x64x32xf32> to vector<64x32xf32>
    %33 = vector.broadcast %16 : vector<64x1xf32> to vector<64x32xf32>
    %34 = arith.mulf %33, %32 : vector<64x32xf32>
    %cst_26 = arith.constant dense<0.000000e+00> : vector<64x32xf32>
    %35 = tpu.matmul %20, %8, %cst_26 {dimension_numbers = #tpu.dot_dimension_numbers<[1], [0], [0], [1], [0, 0, 1, 1], [], []>} : vector<64x64xbf16>, vector<64x32xbf16>, vector<64x32xf32> -> vector<64x32xf32>
    %36 = arith.addf %34, %35 : vector<64x32xf32>
    %c0_27 = arith.constant 0 : index
    %c0_28 = arith.constant 0 : index
    %c0_29 = arith.constant 0 : index
    %37 = vector.load %arg9[%c0_27, %c0_28, %c0_29] : memref<4x64x32xf32, #tpu.memory_space<vmem>>, vector<1x64x32xf32>
    %38 = vector.shape_cast %37 : vector<1x64x32xf32> to vector<64x32xf32>
    %39 = vector.shape_cast %36 : vector<64x32xf32> to vector<1x64x32xf32>
    tpu.vector_store %arg9[%c0_27, %c0_28, %c0_29], %39 {strides = array<i32>} : memref<4x64x32xf32, #tpu.memory_space<vmem>>, vector<1x64x32xf32>,
    %c0_30 = arith.constant 0 : index
    %c0_31 = arith.constant 0 : index
    %c0_32 = arith.constant 0 : index
    %40 = vector.load %arg7[%c0_30, %c0_31, %c0_32] : memref<4x64x1xf32, #tpu.memory_space<vmem>>, vector<1x64x1xf32>
    %41 = vector.shape_cast %40 : vector<1x64x1xf32> to vector<64x1xf32>
    %42 = vector.shape_cast %14 : vector<64x1xf32> to vector<1x64x1xf32>
    tpu.vector_store %arg7[%c0_30, %c0_31, %c0_32], %42 {strides = array<i32>} : memref<4x64x1xf32, #tpu.memory_space<vmem>>, vector<1x64x1xf32>,
    %c0_33 = arith.constant 0 : index
    %c0_34 = arith.constant 0 : index
    %c0_35 = arith.constant 0 : index
    %c32 = arith.constant 32 : index
    %43 = vector.load %arg3[%c0_33, %c0_34, %c0_35, %c32] : memref<1x1x64x128xbf16, #tpu.memory_space<vmem>>, vector<1x1x64x32xbf16>
    %44 = vector.shape_cast %43 : vector<1x1x64x32xbf16> to vector<64x32xbf16>
    %c0_36 = arith.constant 0 : index
    %c0_37 = arith.constant 0 : index
    %c0_38 = arith.constant 0 : index
    %c32_39 = arith.constant 32 : index
    %45 = vector.load %arg4[%c0_36, %c0_37, %c0_38, %c32_39] : memref<1x1x64x128xbf16, #tpu.memory_space<vmem>>, vector<1x1x64x32xbf16>
    %46 = vector.shape_cast %45 : vector<1x1x64x32xbf16> to vector<64x32xbf16>
    %c0_40 = arith.constant 0 : index
    %c0_41 = arith.constant 0 : index
    %c0_42 = arith.constant 0 : index
    %c32_43 = arith.constant 32 : index
    %47 = vector.load %arg5[%c0_40, %c0_41, %c0_42, %c32_43] : memref<1x1x64x128xbf16, #tpu.memory_space<vmem>>, vector<1x1x64x32xbf16>
    %48 = vector.shape_cast %47 : vector<1x1x64x32xbf16> to vector<64x32xbf16>
    %cst_44 = arith.constant dense<0.000000e+00> : vector<64x64xf32>
    %49 = tpu.matmul %44, %46, %cst_44 {dimension_numbers = #tpu.dot_dimension_numbers<[1], [1], [0], [0], [0, 0, 1, 0], [], []>} : vector<64x32xbf16>, vector<64x32xbf16>, vector<64x64xf32> -> vector<64x64xf32>
    %c1 = arith.constant 1 : index
    %c0_45 = arith.constant 0 : index
    %c0_46 = arith.constant 0 : index
    %50 = vector.load %arg7[%c1, %c0_45, %c0_46] : memref<4x64x1xf32, #tpu.memory_space<vmem>>, vector<1x64x1xf32>
    %51 = vector.shape_cast %50 : vector<1x64x1xf32> to vector<64x1xf32>
    %cst_47 = arith.constant dense<0xFF800000> : vector<64xf32>
    %52 = vector.multi_reduction <maximumf>, %49, %cst_47 [1] : vector<64x64xf32> to vector<64xf32>
    %53 = vector.shape_cast %52 : vector<64xf32> to vector<64x1xf32>
    %54 = arith.maximumf %51, %53 : vector<64x1xf32>
    %55 = arith.subf %51, %54 : vector<64x1xf32>
    %56 = math.exp %55 : vector<64x1xf32>
    %57 = vector.broadcast %54 : vector<64x1xf32> to vector<64x64xf32>
    %58 = arith.subf %49, %57 : vector<64x64xf32>
    %59 = arith.truncf %58 : vector<64x64xf32> to vector<64x64xbf16>
    %60 = math.exp %59 : vector<64x64xbf16>
    %c1_48 = arith.constant 1 : index
    %c0_49 = arith.constant 0 : index
    %c0_50 = arith.constant 0 : index
    %61 = vector.load %arg8[%c1_48, %c0_49, %c0_50] : memref<4x64x1xf32, #tpu.memory_space<vmem>>, vector<1x64x1xf32>
    %62 = vector.shape_cast %61 : vector<1x64x1xf32> to vector<64x1xf32>
    %63 = arith.mulf %56, %62 : vector<64x1xf32>
    %64 = arith.extf %60 : vector<64x64xbf16> to vector<64x64xf32>
    %cst_51 = arith.constant dense<0.000000e+00> : vector<64xf32>
    %65 = vector.multi_reduction <add>, %64, %cst_51 [1] : vector<64x64xf32> to vector<64xf32>
    %66 = vector.shape_cast %65 : vector<64xf32> to vector<64x1xf32>
    %67 = arith.addf %63, %66 : vector<64x1xf32>
    %c1_52 = arith.constant 1 : index
    %c0_53 = arith.constant 0 : index
    %c0_54 = arith.constant 0 : index
    %68 = vector.load %arg8[%c1_52, %c0_53, %c0_54] : memref<4x64x1xf32, #tpu.memory_space<vmem>>, vector<1x64x1xf32>
    %69 = vector.shape_cast %68 : vector<1x64x1xf32> to vector<64x1xf32>
    %70 = vector.shape_cast %67 : vector<64x1xf32> to vector<1x64x1xf32>
    tpu.vector_store %arg8[%c1_52, %c0_53, %c0_54], %70 {strides = array<i32>} : memref<4x64x1xf32, #tpu.memory_space<vmem>>, vector<1x64x1xf32>,
    %c1_55 = arith.constant 1 : index
    %c0_56 = arith.constant 0 : index
    %c0_57 = arith.constant 0 : index
    %71 = vector.load %arg9[%c1_55, %c0_56, %c0_57] : memref<4x64x32xf32, #tpu.memory_space<vmem>>, vector<1x64x32xf32>
    %72 = vector.shape_cast %71 : vector<1x64x32xf32> to vector<64x32xf32>
    %73 = vector.broadcast %56 : vector<64x1xf32> to vector<64x32xf32>
    %74 = arith.mulf %73, %72 : vector<64x32xf32>
    %cst_58 = arith.constant dense<0.000000e+00> : vector<64x32xf32>
    %75 = tpu.matmul %60, %48, %cst_58 {dimension_numbers = #tpu.dot_dimension_numbers<[1], [0], [0], [1], [0, 0, 1, 1], [], []>} : vector<64x64xbf16>, vector<64x32xbf16>, vector<64x32xf32> -> vector<64x32xf32>
    %76 = arith.addf %74, %75 : vector<64x32xf32>
    %c1_59 = arith.constant 1 : index
    %c0_60 = arith.constant 0 : index
    %c0_61 = arith.constant 0 : index
    %77 = vector.load %arg9[%c1_59, %c0_60, %c0_61] : memref<4x64x32xf32, #tpu.memory_space<vmem>>, vector<1x64x32xf32>
    %78 = vector.shape_cast %77 : vector<1x64x32xf32> to vector<64x32xf32>
    %79 = vector.shape_cast %76 : vector<64x32xf32> to vector<1x64x32xf32>
    tpu.vector_store %arg9[%c1_59, %c0_60, %c0_61], %79 {strides = array<i32>} : memref<4x64x32xf32, #tpu.memory_space<vmem>>, vector<1x64x32xf32>,
    %c1_62 = arith.constant 1 : index
    %c0_63 = arith.constant 0 : index
    %c0_64 = arith.constant 0 : index
    %80 = vector.load %arg7[%c1_62, %c0_63, %c0_64] : memref<4x64x1xf32, #tpu.memory_space<vmem>>, vector<1x64x1xf32>
    %81 = vector.shape_cast %80 : vector<1x64x1xf32> to vector<64x1xf32>
    %82 = vector.shape_cast %54 : vector<64x1xf32> to vector<1x64x1xf32>
    tpu.vector_store %arg7[%c1_62, %c0_63, %c0_64], %82 {strides = array<i32>} : memref<4x64x1xf32, #tpu.memory_space<vmem>>, vector<1x64x1xf32>,
    %c0_65 = arith.constant 0 : index
    %c0_66 = arith.constant 0 : index
    %c0_67 = arith.constant 0 : index
    %c64 = arith.constant 64 : index
    %83 = vector.load %arg3[%c0_65, %c0_66, %c0_67, %c64] : memref<1x1x64x128xbf16, #tpu.memory_space<vmem>>, vector<1x1x64x32xbf16>
    %84 = vector.shape_cast %83 : vector<1x1x64x32xbf16> to vector<64x32xbf16>
    %c0_68 = arith.constant 0 : index
    %c0_69 = arith.constant 0 : index
    %c0_70 = arith.constant 0 : index
    %c64_71 = arith.constant 64 : index
    %85 = vector.load %arg4[%c0_68, %c0_69, %c0_70, %c64_71] : memref<1x1x64x128xbf16, #tpu.memory_space<vmem>>, vector<1x1x64x32xbf16>
    %86 = vector.shape_cast %85 : vector<1x1x64x32xbf16> to vector<64x32xbf16>
    %c0_72 = arith.constant 0 : index
    %c0_73 = arith.constant 0 : index
    %c0_74 = arith.constant 0 : index
    %c64_75 = arith.constant 64 : index
    %87 = vector.load %arg5[%c0_72, %c0_73, %c0_74, %c64_75] : memref<1x1x64x128xbf16, #tpu.memory_space<vmem>>, vector<1x1x64x32xbf16>
    %88 = vector.shape_cast %87 : vector<1x1x64x32xbf16> to vector<64x32xbf16>
    %cst_76 = arith.constant dense<0.000000e+00> : vector<64x64xf32>
    %89 = tpu.matmul %84, %86, %cst_76 {dimension_numbers = #tpu.dot_dimension_numbers<[1], [1], [0], [0], [0, 0, 1, 0], [], []>} : vector<64x32xbf16>, vector<64x32xbf16>, vector<64x64xf32> -> vector<64x64xf32>
    %c2 = arith.constant 2 : index
    %c0_77 = arith.constant 0 : index
    %c0_78 = arith.constant 0 : index
    %90 = vector.load %arg7[%c2, %c0_77, %c0_78] : memref<4x64x1xf32, #tpu.memory_space<vmem>>, vector<1x64x1xf32>
    %91 = vector.shape_cast %90 : vector<1x64x1xf32> to vector<64x1xf32>
    %cst_79 = arith.constant dense<0xFF800000> : vector<64xf32>
    %92 = vector.multi_reduction <maximumf>, %89, %cst_79 [1] : vector<64x64xf32> to vector<64xf32>
    %93 = vector.shape_cast %92 : vector<64xf32> to vector<64x1xf32>
    %94 = arith.maximumf %91, %93 : vector<64x1xf32>
    %95 = arith.subf %91, %94 : vector<64x1xf32>
    %96 = math.exp %95 : vector<64x1xf32>
    %97 = vector.broadcast %94 : vector<64x1xf32> to vector<64x64xf32>
    %98 = arith.subf %89, %97 : vector<64x64xf32>
    %99 = arith.truncf %98 : vector<64x64xf32> to vector<64x64xbf16>
    %100 = math.exp %99 : vector<64x64xbf16>
    %c2_80 = arith.constant 2 : index
    %c0_81 = arith.constant 0 : index
    %c0_82 = arith.constant 0 : index
    %101 = vector.load %arg8[%c2_80, %c0_81, %c0_82] : memref<4x64x1xf32, #tpu.memory_space<vmem>>, vector<1x64x1xf32>
    %102 = vector.shape_cast %101 : vector<1x64x1xf32> to vector<64x1xf32>
    %103 = arith.mulf %96, %102 : vector<64x1xf32>
    %104 = arith.extf %100 : vector<64x64xbf16> to vector<64x64xf32>
    %cst_83 = arith.constant dense<0.000000e+00> : vector<64xf32>
    %105 = vector.multi_reduction <add>, %104, %cst_83 [1] : vector<64x64xf32> to vector<64xf32>
    %106 = vector.shape_cast %105 : vector<64xf32> to vector<64x1xf32>
    %107 = arith.addf %103, %106 : vector<64x1xf32>
    %c2_84 = arith.constant 2 : index
    %c0_85 = arith.constant 0 : index
    %c0_86 = arith.constant 0 : index
    %108 = vector.load %arg8[%c2_84, %c0_85, %c0_86] : memref<4x64x1xf32, #tpu.memory_space<vmem>>, vector<1x64x1xf32>
    %109 = vector.shape_cast %108 : vector<1x64x1xf32> to vector<64x1xf32>
    %110 = vector.shape_cast %107 : vector<64x1xf32> to vector<1x64x1xf32>
    tpu.vector_store %arg8[%c2_84, %c0_85, %c0_86], %110 {strides = array<i32>} : memref<4x64x1xf32, #tpu.memory_space<vmem>>, vector<1x64x1xf32>,
    %c2_87 = arith.constant 2 : index
    %c0_88 = arith.constant 0 : index
    %c0_89 = arith.constant 0 : index
    %111 = vector.load %arg9[%c2_87, %c0_88, %c0_89] : memref<4x64x32xf32, #tpu.memory_space<vmem>>, vector<1x64x32xf32>
    %112 = vector.shape_cast %111 : vector<1x64x32xf32> to vector<64x32xf32>
    %113 = vector.broadcast %96 : vector<64x1xf32> to vector<64x32xf32>
    %114 = arith.mulf %113, %112 : vector<64x32xf32>
    %cst_90 = arith.constant dense<0.000000e+00> : vector<64x32xf32>
    %115 = tpu.matmul %100, %88, %cst_90 {dimension_numbers = #tpu.dot_dimension_numbers<[1], [0], [0], [1], [0, 0, 1, 1], [], []>} : vector<64x64xbf16>, vector<64x32xbf16>, vector<64x32xf32> -> vector<64x32xf32>
    %116 = arith.addf %114, %115 : vector<64x32xf32>
    %c2_91 = arith.constant 2 : index
    %c0_92 = arith.constant 0 : index
    %c0_93 = arith.constant 0 : index
    %117 = vector.load %arg9[%c2_91, %c0_92, %c0_93] : memref<4x64x32xf32, #tpu.memory_space<vmem>>, vector<1x64x32xf32>
    %118 = vector.shape_cast %117 : vector<1x64x32xf32> to vector<64x32xf32>
    %119 = vector.shape_cast %116 : vector<64x32xf32> to vector<1x64x32xf32>
    tpu.vector_store %arg9[%c2_91, %c0_92, %c0_93], %119 {strides = array<i32>} : memref<4x64x32xf32, #tpu.memory_space<vmem>>, vector<1x64x32xf32>,
    %c2_94 = arith.constant 2 : index
    %c0_95 = arith.constant 0 : index
    %c0_96 = arith.constant 0 : index
    %120 = vector.load %arg7[%c2_94, %c0_95, %c0_96] : memref<4x64x1xf32, #tpu.memory_space<vmem>>, vector<1x64x1xf32>
    %121 = vector.shape_cast %120 : vector<1x64x1xf32> to vector<64x1xf32>
    %122 = vector.shape_cast %94 : vector<64x1xf32> to vector<1x64x1xf32>
    tpu.vector_store %arg7[%c2_94, %c0_95, %c0_96], %122 {strides = array<i32>} : memref<4x64x1xf32, #tpu.memory_space<vmem>>, vector<1x64x1xf32>,
    %c0_97 = arith.constant 0 : index
    %c0_98 = arith.constant 0 : index
    %c0_99 = arith.constant 0 : index
    %c96 = arith.constant 96 : index
    %123 = vector.load %arg3[%c0_97, %c0_98, %c0_99, %c96] : memref<1x1x64x128xbf16, #tpu.memory_space<vmem>>, vector<1x1x64x32xbf16>
    %124 = vector.shape_cast %123 : vector<1x1x64x32xbf16> to vector<64x32xbf16>
    %c0_100 = arith.constant 0 : index
    %c0_101 = arith.constant 0 : index
    %c0_102 = arith.constant 0 : index
    %c96_103 = arith.constant 96 : index
    %125 = vector.load %arg4[%c0_100, %c0_101, %c0_102, %c96_103] : memref<1x1x64x128xbf16, #tpu.memory_space<vmem>>, vector<1x1x64x32xbf16>
    %126 = vector.shape_cast %125 : vector<1x1x64x32xbf16> to vector<64x32xbf16>
    %c0_104 = arith.constant 0 : index
    %c0_105 = arith.constant 0 : index
    %c0_106 = arith.constant 0 : index
    %c96_107 = arith.constant 96 : index
    %127 = vector.load %arg5[%c0_104, %c0_105, %c0_106, %c96_107] : memref<1x1x64x128xbf16, #tpu.memory_space<vmem>>, vector<1x1x64x32xbf16>
    %128 = vector.shape_cast %127 : vector<1x1x64x32xbf16> to vector<64x32xbf16>
    %cst_108 = arith.constant dense<0.000000e+00> : vector<64x64xf32>
    %129 = tpu.matmul %124, %126, %cst_108 {dimension_numbers = #tpu.dot_dimension_numbers<[1], [1], [0], [0], [0, 0, 1, 0], [], []>} : vector<64x32xbf16>, vector<64x32xbf16>, vector<64x64xf32> -> vector<64x64xf32>
    %c3 = arith.constant 3 : index
    %c0_109 = arith.constant 0 : index
    %c0_110 = arith.constant 0 : index
    %130 = vector.load %arg7[%c3, %c0_109, %c0_110] : memref<4x64x1xf32, #tpu.memory_space<vmem>>, vector<1x64x1xf32>
    %131 = vector.shape_cast %130 : vector<1x64x1xf32> to vector<64x1xf32>
    %cst_111 = arith.constant dense<0xFF800000> : vector<64xf32>
    %132 = vector.multi_reduction <maximumf>, %129, %cst_111 [1] : vector<64x64xf32> to vector<64xf32>
    %133 = vector.shape_cast %132 : vector<64xf32> to vector<64x1xf32>
    %134 = arith.maximumf %131, %133 : vector<64x1xf32>
    %135 = arith.subf %131, %134 : vector<64x1xf32>
    %136 = math.exp %135 : vector<64x1xf32>
    %137 = vector.broadcast %134 : vector<64x1xf32> to vector<64x64xf32>
    %138 = arith.subf %129, %137 : vector<64x64xf32>
    %139 = arith.truncf %138 : vector<64x64xf32> to vector<64x64xbf16>
    %140 = math.exp %139 : vector<64x64xbf16>
    %c3_112 = arith.constant 3 : index
    %c0_113 = arith.constant 0 : index
    %c0_114 = arith.constant 0 : index
    %141 = vector.load %arg8[%c3_112, %c0_113, %c0_114] : memref<4x64x1xf32, #tpu.memory_space<vmem>>, vector<1x64x1xf32>
    %142 = vector.shape_cast %141 : vector<1x64x1xf32> to vector<64x1xf32>
    %143 = arith.mulf %136, %142 : vector<64x1xf32>
    %144 = arith.extf %140 : vector<64x64xbf16> to vector<64x64xf32>
    %cst_115 = arith.constant dense<0.000000e+00> : vector<64xf32>
    %145 = vector.multi_reduction <add>, %144, %cst_115 [1] : vector<64x64xf32> to vector<64xf32>
    %146 = vector.shape_cast %145 : vector<64xf32> to vector<64x1xf32>
    %147 = arith.addf %143, %146 : vector<64x1xf32>
    %c3_116 = arith.constant 3 : index
    %c0_117 = arith.constant 0 : index
    %c0_118 = arith.constant 0 : index
    %148 = vector.load %arg8[%c3_116, %c0_117, %c0_118] : memref<4x64x1xf32, #tpu.memory_space<vmem>>, vector<1x64x1xf32>
    %149 = vector.shape_cast %148 : vector<1x64x1xf32> to vector<64x1xf32>
    %150 = vector.shape_cast %147 : vector<64x1xf32> to vector<1x64x1xf32>
    tpu.vector_store %arg8[%c3_116, %c0_117, %c0_118], %150 {strides = array<i32>} : memref<4x64x1xf32, #tpu.memory_space<vmem>>, vector<1x64x1xf32>,
    %c3_119 = arith.constant 3 : index
    %c0_120 = arith.constant 0 : index
    %c0_121 = arith.constant 0 : index
    %151 = vector.load %arg9[%c3_119, %c0_120, %c0_121] : memref<4x64x32xf32, #tpu.memory_space<vmem>>, vector<1x64x32xf32>
    %152 = vector.shape_cast %151 : vector<1x64x32xf32> to vector<64x32xf32>
    %153 = vector.broadcast %136 : vector<64x1xf32> to vector<64x32xf32>
    %154 = arith.mulf %153, %152 : vector<64x32xf32>
    %cst_122 = arith.constant dense<0.000000e+00> : vector<64x32xf32>
    %155 = tpu.matmul %140, %128, %cst_122 {dimension_numbers = #tpu.dot_dimension_numbers<[1], [0], [0], [1], [0, 0, 1, 1], [], []>} : vector<64x64xbf16>, vector<64x32xbf16>, vector<64x32xf32> -> vector<64x32xf32>
    %156 = arith.addf %154, %155 : vector<64x32xf32>
    %c3_123 = arith.constant 3 : index
    %c0_124 = arith.constant 0 : index
    %c0_125 = arith.constant 0 : index
    %157 = vector.load %arg9[%c3_123, %c0_124, %c0_125] : memref<4x64x32xf32, #tpu.memory_space<vmem>>, vector<1x64x32xf32>
    %158 = vector.shape_cast %157 : vector<1x64x32xf32> to vector<64x32xf32>
    %159 = vector.shape_cast %156 : vector<64x32xf32> to vector<1x64x32xf32>
    tpu.vector_store %arg9[%c3_123, %c0_124, %c0_125], %159 {strides = array<i32>} : memref<4x64x32xf32, #tpu.memory_space<vmem>>, vector<1x64x32xf32>,
    %c3_126 = arith.constant 3 : index
    %c0_127 = arith.constant 0 : index
    %c0_128 = arith.constant 0 : index
    %160 = vector.load %arg7[%c3_126, %c0_127, %c0_128] : memref<4x64x1xf32, #tpu.memory_space<vmem>>, vector<1x64x1xf32>
    %161 = vector.shape_cast %160 : vector<1x64x1xf32> to vector<64x1xf32>
    %162 = vector.shape_cast %134 : vector<64x1xf32> to vector<1x64x1xf32>
    tpu.vector_store %arg7[%c3_126, %c0_127, %c0_128], %162 {strides = array<i32>} : memref<4x64x1xf32, #tpu.memory_space<vmem>>, vector<1x64x1xf32>,
    %c1_i32 = arith.constant 1 : i32
    %163 = arith.cmpi eq, %arg2, %c1_i32 : i32
    %164 = arith.extui %163 : i1 to i32
    %c0_i32_129 = arith.constant 0 : i32
    %165 = arith.cmpi ne, %164, %c0_i32_129 : i32
    scf.if %165 {
      %c0_130 = arith.constant 0 : index
      %c0_131 = arith.constant 0 : index
      %c0_132 = arith.constant 0 : index
      %166 = vector.load %arg8[%c0_130, %c0_131, %c0_132] : memref<4x64x1xf32, #tpu.memory_space<vmem>>, vector<1x64x1xf32>
      %167 = vector.shape_cast %166 : vector<1x64x1xf32> to vector<64x1xf32>
      %168 = tpu.reciprocal %167 {approx = true} : vector<64x1xf32> -> vector<64x1xf32>
      %c0_133 = arith.constant 0 : index
      %c0_134 = arith.constant 0 : index
      %c0_135 = arith.constant 0 : index
      %169 = vector.load %arg9[%c0_133, %c0_134, %c0_135] : memref<4x64x32xf32, #tpu.memory_space<vmem>>, vector<1x64x32xf32>
      %170 = vector.shape_cast %169 : vector<1x64x32xf32> to vector<64x32xf32>
      %171 = vector.broadcast %168 : vector<64x1xf32> to vector<64x32xf32>
      %172 = arith.mulf %170, %171 : vector<64x32xf32>
      %c1_136 = arith.constant 1 : index
      %c0_137 = arith.constant 0 : index
      %c0_138 = arith.constant 0 : index
      %173 = vector.load %arg8[%c1_136, %c0_137, %c0_138] : memref<4x64x1xf32, #tpu.memory_space<vmem>>, vector<1x64x1xf32>
      %174 = vector.shape_cast %173 : vector<1x64x1xf32> to vector<64x1xf32>
      %175 = tpu.reciprocal %174 {approx = true} : vector<64x1xf32> -> vector<64x1xf32>
      %c1_139 = arith.constant 1 : index
      %c0_140 = arith.constant 0 : index
      %c0_141 = arith.constant 0 : index
      %176 = vector.load %arg9[%c1_139, %c0_140, %c0_141] : memref<4x64x32xf32, #tpu.memory_space<vmem>>, vector<1x64x32xf32>
      %177 = vector.shape_cast %176 : vector<1x64x32xf32> to vector<64x32xf32>
      %178 = vector.broadcast %175 : vector<64x1xf32> to vector<64x32xf32>
      %179 = arith.mulf %177, %178 : vector<64x32xf32>
      %c2_142 = arith.constant 2 : index
      %c0_143 = arith.constant 0 : index
      %c0_144 = arith.constant 0 : index
      %180 = vector.load %arg8[%c2_142, %c0_143, %c0_144] : memref<4x64x1xf32, #tpu.memory_space<vmem>>, vector<1x64x1xf32>
      %181 = vector.shape_cast %180 : vector<1x64x1xf32> to vector<64x1xf32>
      %182 = tpu.reciprocal %181 {approx = true} : vector<64x1xf32> -> vector<64x1xf32>
      %c2_145 = arith.constant 2 : index
      %c0_146 = arith.constant 0 : index
      %c0_147 = arith.constant 0 : index
      %183 = vector.load %arg9[%c2_145, %c0_146, %c0_147] : memref<4x64x32xf32, #tpu.memory_space<vmem>>, vector<1x64x32xf32>
      %184 = vector.shape_cast %183 : vector<1x64x32xf32> to vector<64x32xf32>
      %185 = vector.broadcast %182 : vector<64x1xf32> to vector<64x32xf32>
      %186 = arith.mulf %184, %185 : vector<64x32xf32>
      %c3_148 = arith.constant 3 : index
      %c0_149 = arith.constant 0 : index
      %c0_150 = arith.constant 0 : index
      %187 = vector.load %arg8[%c3_148, %c0_149, %c0_150] : memref<4x64x1xf32, #tpu.memory_space<vmem>>, vector<1x64x1xf32>
      %188 = vector.shape_cast %187 : vector<1x64x1xf32> to vector<64x1xf32>
      %189 = tpu.reciprocal %188 {approx = true} : vector<64x1xf32> -> vector<64x1xf32>
      %c3_151 = arith.constant 3 : index
      %c0_152 = arith.constant 0 : index
      %c0_153 = arith.constant 0 : index
      %190 = vector.load %arg9[%c3_151, %c0_152, %c0_153] : memref<4x64x32xf32, #tpu.memory_space<vmem>>, vector<1x64x32xf32>
      %191 = vector.shape_cast %190 : vector<1x64x32xf32> to vector<64x32xf32>
      %192 = vector.broadcast %189 : vector<64x1xf32> to vector<64x32xf32>
      %193 = arith.mulf %191, %192 : vector<64x32xf32>
      %194 = tpu.concatenate %172, %179, %186, %193 in 1 : vector<64x32xf32>, vector<64x32xf32>, vector<64x32xf32>, vector<64x32xf32> -> vector<64x128xf32>
      %195 = arith.truncf %194 : vector<64x128xf32> to vector<64x128xbf16>
      %c0_154 = arith.constant 0 : index
      %c0_155 = arith.constant 0 : index
      %c0_156 = arith.constant 0 : index
      %196 = vector.load %arg6[%c0_154, %c0_155, %c0_156] : memref<1x64x128xbf16, #tpu.memory_space<vmem>>, vector<1x64x128xbf16>
      %197 = vector.shape_cast %196 : vector<1x64x128xbf16> to vector<64x128xbf16>
      %198 = vector.shape_cast %195 : vector<64x128xbf16> to vector<1x64x128xbf16>
      tpu.vector_store %arg6[%c0_154, %c0_155, %c0_156], %198 {strides = array<i32>} : memref<1x64x128xbf16, #tpu.memory_space<vmem>>, vector<1x64x128xbf16>,
    } else {
    }
    return
  }
  func.func @transform_0(%arg0: i32, %arg1: i32, %arg2: i32) -> (i32, i32, i32, i32) {
    %c0_i32 = arith.constant 0 : i32
    %c0_i32_0 = arith.constant 0 : i32
    %c0_i32_1 = arith.constant 0 : i32
    return %c0_i32, %arg0, %arg1, %c0_i32_0 : i32, i32, i32, i32
  }
  func.func @transform_1(%arg0: i32, %arg1: i32, %arg2: i32) -> (i32, i32, i32, i32) {
    %c1_i32 = arith.constant 1 : i32
    %c0_i32 = arith.constant 0 : i32
    %c0_i32_0 = arith.constant 0 : i32
    return %c1_i32, %arg0, %arg2, %c0_i32 : i32, i32, i32, i32
  }
  func.func @transform_2(%arg0: i32, %arg1: i32, %arg2: i32) -> (i32, i32, i32, i32) {
    %c2_i32 = arith.constant 2 : i32
    %c0_i32 = arith.constant 0 : i32
    %c0_i32_0 = arith.constant 0 : i32
    return %c2_i32, %arg0, %arg2, %c0_i32 : i32, i32, i32, i32
  }
  func.func @transform_3(%arg0: i32, %arg1: i32, %arg2: i32) -> (i32, i32, i32) {
    %c0_i32 = arith.constant 0 : i32
    %c0_i32_0 = arith.constant 0 : i32
    return %arg0, %arg1, %c0_i32 : i32, i32, i32
  }
}

</mosaic_0001>

<bundles_post_ra>
// kernel: tpu_custom_call.1
= control target key start
LH: loop header
LB: loop body
LE: loop exit
PB: predicated region body
PF: predicated region fallthrough
CT: control target
= control target key end

     0   :  { %s5921_s0 = inlined_call_operand.hbm [shape: bf16[3,2,128,128], index: 0, kind: input, shape index: {}]   ;;  %s5922_s1 = inlined_call_operand.hbm [shape: bf16[3,2,128,128], index: 1, kind: input, shape index: {}]   ;;  %s5923_s2 = inlined_call_operand.hbm [shape: bf16[3,2,128,128], index: 2, kind: input, shape index: {}]   ;;  %s5924_s3 = inlined_call_operand.hbm [shape: bf16[2,128,128], index: 3, kind: output, shape index: {}]  }
   0x1   :  { %5968 = sst [smem:[#allocation60_spill]] %s5922_s1 }
   0x2   :  { %5969 = sst [smem:[#allocation61_spill]] %s5924_s3 }
   0x3   :  { %8 = vsyncpa [#allocation6], 0 }
   0x4   :  { %10 = vsyncpa [#allocation6 + $0x1], 0 }
   0x5   :  { %11 = vsyncpa [#allocation9], 0 }
   0x6   :  { %13 = vsyncpa [#allocation9 + $0x1], 0 }
   0x7   :  { %14 = vsyncpa [#allocation7], 0 }
   0x8   :  { %16 = vsyncpa [#allocation7 + $0x1], 0  ;;  %s4254_s12 = smov 0   ;;  %s4256_s13 = smov 0  }
   0x9   :  { %s4258_s14 = smov 0   ;;  %s4260_s15 = smov 0  }
   0xa   :  { %s4262_s16 = smov 0   ;;  %s4264_s17 = smov 0  }
   0xb   :  { %s4266_s18 = smov 0   ;;  %s4268_s19 = smov 0  }
   0xc   :  { %s4270_s20 = smov 0   ;;  %s4272_s21 = smov 0  }
   0xd   :  { %s4274_s22 = smov 0   ;;  %s4276_s23 = smov 0  }
   0xe   :  { %s4278_s24 = smov 0  }
   0xf LB: > { %5970 = sst [smem:[#allocation15_spill]] %s4171_s13  ;;  %s4318_s25 = sadd.s32 4294967295, %s4215_s24   ;;  %s4215_s24 = sphi %s4278_s24, %s22_s24   ;;  %s4211_s23 = sphi %s4276_s23, %s6125_s23   ;;  %s4207_s22 = sphi %s4274_s22, %s6114_s22   ;;  %s4203_s21 = sphi %s4272_s21, %s6124_s21   ;;  %s4199_s20 = sphi %s4270_s20, %s6123_s20   ;;  %s4195_s19 = sphi %s4268_s19, %s6113_s19   ;;  %s4191_s18 = sphi %s4266_s18, %s6122_s18   ;;  %s4187_s17 = sphi %s4264_s17, %s6121_s17   ;;  %s4183_s16 = sphi %s4262_s16, %s6120_s16   ;;  %s4179_s15 = sphi %s4260_s15, %s6119_s15   ;;  %s4175_s14 = sphi %s4258_s14, %s6118_s14   ;;  %s4171_s13 = sphi %s4256_s13, %s6117_s13   ;;  %s4167_s12 = sphi %s4254_s12, %s6111_s12  }
  0x10   : > { %5971 = sst [smem:[#allocation16_spill]] %s4179_s15  ;;  %s34_s26 = sadd.s32 1, %s4203_s21 }
  0x11   : > { %5972 = sst [smem:[#allocation17_spill]] %s4183_s16  ;;  %p4321_p0 = scmp.ge.s32.totalorder %s34_s26, 2 }
  0x12   : > { %5973 = sst [smem:[#allocation18_spill]] %s4191_s18  ;;  %p5931_p1 = scmp.eq.s32.totalorder %s4215_s24, 0 }
  0x13   : > { %5974 = sst [smem:[#allocation19_spill]] %s4195_s19  ;;  %p5932_p2 = scmp.eq.s32.totalorder %s4318_s25, 0 }
  0x14   : > { %5975 = sst [smem:[#allocation20_spill]] %s4199_s20  ;;  %s6127_s26 = smov (%p4321_p0, %s34_s26), 0 }
  0x15   : > { %5976 = sst [smem:[#allocation21_spill]] %s4207_s22  ;;  %p85_p3 = scmp.ne.s32.totalorder %s4175_s14, %s4171_s13 }
  0x16   : > { %5977 = sst [smem:[#allocation22_spill]] %s4318_s25  ;;  %p91_p4 = scmp.ne.s32.totalorder %s4171_s13, %s4167_s12 }
  0x17   : > { %p4338_p5 = por %p85_p3, %p5931_p1  ;;  %p5930_p7 = scmp.lt.s32.totalorder %s4215_s24, 8 }
  0x18   : > { %p4344_p6 = por %p91_p4, %p5932_p2  ;;  %s5926_s5 = sshll.u32 %s4211_s23, 4 }
  0x19   : > { %s194_s6 = sand.u32 1, %s4215_s24   ;;  %s196_s7 = sand.u32 1, %s4175_s14  }
  0x1a   : > { %s5980_s4 = scalar_select %p4344_p6, 1, 0 }
  0x1b   : > { %s4352_s8 = sshll.u32 %s196_s7, 5  ;;  %s3221_s9 = sshll.u32 %s4203_s21, 3 }
  0x1c   : > { %5981 = sst [smem:[#allocation23_spill]] %s5980_s4  ;;  %s3108_s10 = sadd.s32 %s3221_s9, %s5926_s5 }
  0x1d   : > { %s3223_s11 = sshll.u32 %s3108_s10, 6  ;;  %s198_s12 = scalar_lea.vmem [#allocation8], %s4352_s8 }
  0x1e   : > { %s208_s29 = sshll.u32 %s198_s12, 4  ;;  %s5982_s1 = sld [smem:[#allocation60_spill]]  ;;  %s4361_s29 = int_to_ptr.vmem [resolvable:$true] %s208_s29 }
  0x1f   : > { %p4369_p8 = pnand %p5930_p7, %p4338_p5  ;;  %s4378_s3 = scalar_lea.hbm %s5923_s2, %s3223_s11 }
  0x20   : > { %s4380_s28 = scalar_lea.sflag [#allocation9], %s194_s6 }
  0x21   : > { %5984 = sst [smem:[#allocation24_spill]] %s4380_s28  ;;  %p3983_p10 = pneg %p4369_p8 }
  0x24   : > { %s3110_s20 = scalar_lea.hbm %s5982_s1, %s3223_s11  ;;  %s3986_s4 = scalar_lea.hbm %s5982_s1, 6144 }
  0x25   : > { %s4363_s19 = scalar_lea.hbm %s3110_s20, 2048  ;;  %s4011_s5 = scalar_lea.hbm %s3110_s20, 2560 }
  0x26   : > { %p3982_p9 = scmp.ne.s32.totalorder %s4363_s19, %s4011_s5  ;;  %p3987_p13 = scmp.lt.u32.totalorder %s4363_s19, %s5982_s1 }
  0x27   : > { %p3988_p3 = scmp.lt.u32.totalorder %s3986_s4, %s4011_s5  ;;  %p3990_p5 = scmp.lt.u32.totalorder %s4011_s5, %s4363_s19 }
  0x28   : > { %p3984_p11 = pnand %p3983_p10, %p3982_p9 }
  0x29   : > { %p3989_p4 = por %p3988_p3, %p3987_p13 }
  0x2a   : > { %p3985_p12 = pneg %p3984_p11 }
  0x2b   : > { %p3991_p7 = por %p3990_p5, %p3989_p4 }
  0x2d   : > { %p3992_p1 = pnand %p3991_p7, %p3985_p12 }
  0x2f   : > { %3995 = shalt.err (!%p3992_p1)
}
  0x30   : > { %s3996_s20 = scalar_lea.vmem %s4361_s29, 512  ;;  %s4217_s18 = smov [#allocation8]  }
  0x31   : > { %p3997_p9 = scmp.ne.s32.totalorder %s4361_s29, %s3996_s20  ;;  %s4001_s6 = sshll.u32 %s4217_s18, 4  ;;  %s4002_s6 = int_to_ptr.vmem [resolvable:$false] %s4001_s6 }
  0x32   : > { %s4003_s13 = scalar_lea.vmem %s4002_s6, 1024  ;;  %p4004_p6 = scmp.lt.s32.totalorder %s4361_s29, %s4002_s6 }
  0x33   : > { %p3999_p11 = pnand %p3997_p9, %p3983_p10  ;;  %p4005_p13 = scmp.lt.s32.totalorder %s4003_s13, %s3996_s20 }
  0x35   : > { %p4000_p2 = pneg %p3999_p11  ;;  %p4006_p3 = por %p4005_p13, %p4004_p6 }
  0x37   : > { %p4007_p4 = pnand %p4006_p3, %p4000_p2 }
  0x39   : > { %4010 = shalt.err (!%p4007_p4)
}
  0x3a   : > { %s5934_s4 = smov 64   ;;  %s5936_s5 = smov 4  }
  0x3b   : > { %3582 = dma.hbm_to_vmem [thread:$0]  (!%p4369_p8), %s4363_s19, 512, %s4361_s29, %s4380_s28, %s5934_s4, %s5934_s4, %s5936_s5  }
  0x3c   : > { %s4411_s11 = scalar_lea.hbm %s4378_s3, 4096  ;;  %p3228_p1 = scmp.ge.s32.totalorder %s4215_s24, 1 }
  0x3d   : > { %s222_s9 = scalar_lea.vmem [#allocation10], %s4352_s8  ;;  %p240_p2 = scmp.lt.s32.totalorder %s4215_s24, 9 }
  0x3e   : > { %s232_s10 = sshll.u32 %s222_s9, 4  ;;  %s3213_s19 = sadd.s32 4294967294, %s4215_s24   ;;  %s4420_s10 = int_to_ptr.vmem [resolvable:$true] %s232_s10 }
  0x3f   : > { %p4416_p6 = pnand %p3228_p1, %p240_p2  ;;  %s37_s29 = sadd.s32 1, %s4207_s22 }
  0x40   : > { %s6129_s29 = smov (!%p4321_p0, %s37_s29), %s4207_s22  ;;  %p57_p7 = scmp.ne.s32.totalorder %s4187_s17, %s4183_s16 }
  0x41   : > { %s5985_s12 = scalar_select %p4416_p6, 1, 0 }
  0x42   : > { %p63_p12 = scmp.ne.s32.totalorder %s4183_s16, %s4179_s15  ;;  %p39_p5 = scmp.ge.s32.totalorder %s6129_s29, 2 }
  0x43   : > { %5986 = sst [smem:[#allocation25_spill]] %s5985_s12  ;;  %p145_p9 = scmp.eq.s32.totalorder %s4318_s25, 7 }
  0x44   : > { %s50_s8 = sadd.s32 1, %s4187_s17  ;;  %p5987_p11 = scmp.eq.s32.totalorder %s4318_s25, 0 }
  0x45   : > { %s6131_s29 = smov (%p39_p5, %s6129_s29), 0  ;;  %s5991_s27 = sadd.s32 1, %s4211_s23 }
  0x46   : > { %p4438_p13 = por %p5987_p11, %p63_p12  ;;  %5990 = sst [smem:[#allocation27_spill]] %s6131_s29 }
  0x47   : > { %s6133_s27 = smov (!%p39_p5, %s5991_s27), %s4211_s23  ;;  %p5992_p0 = scmp.eq.s32.totalorder %s4215_s24, 0 }
  0x48   : > { %s5988_s30 = scalar_select %p4438_p13, 1, 0 }
  0x49   : > { %p4449_p3 = por %p5992_p0, %p57_p7  ;;  %p4453_p4 = por %p145_p9, %p57_p7 }
  0x4a   : > { %5989 = sst [smem:[#allocation26_spill]] %s5988_s30  ;;  %p43_p1 = scmp.ge.s32.totalorder %s6133_s27, 2 }
  0x4b   : > { %s5994_s18 = scalar_select %p4453_p4, 1, 0 }
  0x4c   : > { %p151_p2 = scmp.eq.s32.totalorder %s3213_s19, 7  ;;  %s46_s6 = ssub.s32 %s4207_s22, %s6131_s29 }
  0x4d   : > { %5995 = sst [smem:[#allocation28_spill]] %s5994_s18  ;;  %s5951_s13 = sand.u32 1, %s4187_s17  }
  0x4e   : > { %s6135_s27 = smov (%p43_p1, %s6133_s27), 0  ;;  %p4465_p5 = por %p151_p2, %p63_p12 }
  0x4f   : > { %5996 = sst [smem:[#allocation29_spill]] %s6135_s27  ;;  %s3217_s4 = sshll.u32 %s4207_s22, 3 }
  0x50   : > { %s5997_s9 = scalar_select %p4465_p5, 1, 0 }
  0x51   : > { %s45_s5 = ssub.s32 %s4211_s23, %s6135_s27  ;;  %s3216_s1 = sshll.u32 %s5951_s13, 5 }
  0x52   : > { %5998 = sst [smem:[#allocation30_spill]] %s5997_s9  ;;  %s47_s19 = sor.u32 %s46_s6, %s45_s5 }
  0x53   : > { %s5999_s29 = ssub.s32 %s4203_s21, %s6127_s26  ;;  %p48_p7 = scmp.eq.s32.totalorder %s47_s19, 0 }
  0x54   : > { %s75_s18 = sor.u32 %s5999_s29, %s45_s5  ;;  %s6000_s15 = sshll.u32 %s4211_s23, 4 }
  0x55   : > { %p76_p9 = scmp.eq.s32.totalorder %s75_s18, 0  ;;  %s181_s25 = sadd.s32 %s6000_s15, %s3217_s4 }
  0x56   : > { %s4480_s30 = scalar_select %p48_p7, %s4187_s17, %s50_s8  }
  0x57   : > { %s6001_s9 = sadd.s32 1, %s4175_s14  ;;  %s3219_s22 = sshll.u32 %s181_s25, 6 }
  0x58   : > { %s4485_s16 = scalar_select %p76_p9, %s4175_s14, %s6001_s9  }
  0x59   : > { %s175_s27 = scalar_lea.vmem [#allocation5], %s3216_s1  ;;  %s4490_s6 = scalar_lea.hbm %s5921_s0, %s3219_s22 }
  0x5a   : > { %s184_s12 = sshll.u32 %s175_s27, 4  ;;  %p6002_p12 = scmp.lt.s32.totalorder %s4215_s24, 8  ;;  %s4492_s12 = int_to_ptr.vmem [resolvable:$true] %s184_s12 }
  0x5b   : > { %s4042_s4 = scalar_lea.hbm %s4378_s3, 4608  ;;  %s4017_s28 = scalar_lea.hbm %s5923_s2, 6144 }
  0x5c   : > { %p4498_p11 = pnand %p6002_p12, %p4449_p3  ;;  %p4013_p0 = scmp.ne.s32.totalorder %s4411_s11, %s4042_s4 }
  0x5d   : > { %p4018_p7 = scmp.lt.u32.totalorder %s4411_s11, %s5923_s2  ;;  %p4019_p9 = scmp.lt.u32.totalorder %s4017_s28, %s4042_s4 }
  0x5e   : > { %p4015_p1 = pnand %p4013_p0, %p3983_p10  ;;  %p4021_p3 = scmp.lt.u32.totalorder %s4042_s4, %s4411_s11 }
  0x5f   : > { %p4020_p5 = por %p4019_p9, %p4018_p7 }
  0x60   : > { %p4016_p2 = pneg %p4015_p1 }
  0x61   : > { %p4022_p12 = por %p4021_p3, %p4020_p5 }
  0x63   : > { %p4023_p4 = pnand %p4022_p12, %p4016_p2 }
  0x65   : > { %4026 = shalt.err (!%p4023_p4)
}
  0x66   : > { %s4027_s3 = scalar_lea.vmem %s4420_s10, 512  ;;  %s4220_s29 = smov [#allocation10]  }
  0x67   : > { %p4028_p0 = scmp.ne.s32.totalorder %s4420_s10, %s4027_s3  ;;  %s4032_s8 = sshll.u32 %s4220_s29, 4  ;;  %s4033_s8 = int_to_ptr.vmem [resolvable:$false] %s4032_s8 }
  0x68   : > { %s4034_s27 = scalar_lea.vmem %s4033_s8, 1024  ;;  %p4035_p6 = scmp.lt.s32.totalorder %s4420_s10, %s4033_s8 }
  0x69   : > { %p4030_p1 = pnand %p4028_p0, %p3983_p10  ;;  %p4036_p7 = scmp.lt.s32.totalorder %s4034_s27, %s4027_s3 }
  0x6b   : > { %p4031_p13 = pneg %p4030_p1  ;;  %p4037_p9 = por %p4036_p7, %p4035_p6 }
  0x6d   : > { %p4038_p5 = pnand %p4037_p9, %p4031_p13 }
  0x6f   : > { %4041 = shalt.err (!%p4038_p5)
}
  0x70   : > { %s6004_s20 = smov 4   ;;  %s6005_s18 = smov 64  }
  0x71   : > { %s6006_s13 = sld [smem:[#allocation24_spill]]  ;;  %s6007_s9 = sand.u32 1, %s4187_s17  }
  0x72   : > { %s4531_s19 = scalar_lea.sflag [#allocation6], %s6007_s9  ;;  %s4043_s4 = scalar_lea.hbm %s4490_s6, 512 }
  0x73   : > { %p4044_p10 = scmp.ne.s32.totalorder %s4490_s6, %s4043_s4  ;;  %p4045_p6 = pneg %p4498_p11 }
  0x74   : > { %s4048_s25 = scalar_lea.hbm %s5921_s0, 6144  ;;  %p4049_p2 = scmp.lt.u32.totalorder %s4490_s6, %s5921_s0 }
  0x75   : > { %p4046_p13 = pnand %p4045_p6, %p4044_p10  ;;  %p4052_p12 = scmp.lt.u32.totalorder %s4043_s4, %s4490_s6 }
  0x77   : > { %3585 = dma.hbm_to_vmem [thread:$0]  (!%p4369_p8), %s4411_s11, 512, %s4420_s10, %s6006_s13, %s6005_s18, %s6005_s18, %s6004_s20  }
  0x78   : > { %p4047_p4 = pneg %p4046_p13  ;;  %p4050_p8 = scmp.lt.u32.totalorder %s4048_s25, %s4043_s4 }
  0x7a   : > { %p4051_p3 = por %p4050_p8, %p4049_p2 }
  0x7c   : > { %p4053_p0 = por %p4052_p12, %p4051_p3 }
  0x7e   : > { %p4054_p1 = pnand %p4053_p0, %p4047_p4 }
  0x80   : > { %4057 = shalt.err (!%p4054_p1)
}
  0x81   : > { %s4058_s11 = scalar_lea.vmem %s4492_s12, 512  ;;  %s4221_s10 = smov [#allocation5]  }
  0x82   : > { %p4059_p7 = scmp.ne.s32.totalorder %s4492_s12, %s4058_s11  ;;  %s4063_s5 = sshll.u32 %s4221_s10, 4  ;;  %s4064_s5 = int_to_ptr.vmem [resolvable:$false] %s4063_s5 }
  0x83   : > { %s4065_s3 = scalar_lea.vmem %s4064_s5, 1024  ;;  %p4066_p10 = scmp.lt.s32.totalorder %s4492_s12, %s4064_s5 }
  0x84   : > { %p4061_p9 = pnand %p4059_p7, %p4045_p6  ;;  %p4067_p13 = scmp.lt.s32.totalorder %s4065_s3, %s4058_s11 }
  0x86   : > { %p4062_p5 = pneg %p4061_p9  ;;  %p4068_p2 = por %p4067_p13, %p4066_p10 }
  0x88   : > { %p4069_p8 = pnand %p4068_p2, %p4062_p5 }
  0x8a   : > { %4072 = shalt.err (!%p4069_p8)
}
  0x8b   : > { %3579 = dma.hbm_to_vmem [thread:$0]  (!%p4498_p11), %s4490_s6, 512, %s4492_s12, %s4531_s19, %s6005_s18, %s6005_s18, %s6004_s20  }
  0x8c   : > { %s6008_s29 = sld [smem:[#allocation25_spill]] }
  0x92   : > { %p6009_p6 = scmp.ne.s32.totalorder %s6008_s29, 0 }
  0x94   : > { %244 = sbr.rel (%p6009_p6) target bundleno = 2981 (0xba5), region = 32 }
  0x9b   : > { %s6010_s8 = sld [smem:[#allocation17_spill]]  ;;  %s6011_s27 = sld [smem:[#allocation26_spill]] }
  0xa1   : > { %s4565_s13 = sand.u32 1, %s6010_s8   ;;  %p6012_p4 = scmp.ne.s32.totalorder %s6011_s27, 0 }
  0xa2   : > { %s3229_s9 = sshll.u32 %s4565_s13, 5  ;;  %s247_s4 = scalar_lea.sflag [#allocation6], %s4565_s13 }
  0xa3   : > { %s4569_s7 = scalar_lea.vmem [#allocation5], %s3229_s9 }
  0xa4   : > { %4154 = dma.done.wait (%p6012_p4), %s247_s4, 512  }
  0xa5   : > { %4156 = vsyncadd (%p6012_p4), %s247_s4, 4294966784  ;;  %s6013_s15 = sld [smem:[#allocation22_spill]]  ;;  %s6014_s12 = sld [smem:[#allocation15_spill]] }
  0xa6   : > { %s6015_s6 = sld [smem:[#allocation23_spill]] }
  0xab   : > { %s255_s20 = sand.u32 1, %s6013_s15   ;;  %s257_s18 = sand.u32 1, %s6014_s12  }
  0xac   : > { %s3230_s19 = sshll.u32 %s257_s18, 5  ;;  %s256_s1 = scalar_lea.sflag [#allocation9], %s255_s20 }
  0xad   : > { %s4577_s25 = scalar_lea.vmem [#allocation8], %s3230_s19  ;;  %p6016_p11 = scmp.ne.s32.totalorder %s6015_s6, 0 }
  0xaf   : > { %4158 = dma.done.wait (%p6016_p11), %s256_s1, 1024  }
  0xb0   : > { %4160 = vsyncadd (%p6016_p11), %s256_s1, 4294966272  ;;  %s4583_s28 = scalar_lea.vmem [#allocation10], %s3230_s19  ;;  %s4585_s22 = scalar_lea.vmem [#allocation11], %s3229_s9 }
  0xb1   : > { %s6017_s11 = sld [smem:[#allocation18_spill]] }
  0xb7   : > { %p3233_p3 = scmp.ne.s32.totalorder %s6017_s11, 0 }
  0xb8   : > { %vm310_vm0 = vcmask (!%p3233_p3), 7168   ;;  %vm375_vm1 = vcmask (!%p3233_p3), 261120   ;;  %v4222_v0 = vmov (!%p3233_p3), -inf   ;;  %v4223_v1 = vmov (!%p3233_p3), 0.0  }
  0xb9   : > { %309 = sbr.rel (%p3233_p3) target bundleno = 233 (0xe9), region = 48  ;;  %311 = vst.msk [vmem:[#allocation2] sm:$0xff] (!%p3233_p3), %vm310_vm0, %v4222_v0  ;;  %312 = vst.msk [vmem:[#allocation2 + $0x8] sm:$0xff] (!%p3233_p3), %vm310_vm0, %v4222_v0 }
  0xba   : > { %313 = vst.msk [vmem:[#allocation2 + $0x10] sm:$0xff] (!%p3233_p3), %vm310_vm0, %v4222_v0  ;;  %314 = vst.msk [vmem:[#allocation2 + $0x18] sm:$0xff] (!%p3233_p3), %vm310_vm0, %v4222_v0 }
  0xbb   : > { %315 = vst.msk [vmem:[#allocation2 + $0x20] sm:$0xff] (!%p3233_p3), %vm310_vm0, %v4222_v0  ;;  %316 = vst.msk [vmem:[#allocation2 + $0x28] sm:$0xff] (!%p3233_p3), %vm310_vm0, %v4222_v0 }
  0xbc   : > { %317 = vst.msk [vmem:[#allocation2 + $0x30] sm:$0xff] (!%p3233_p3), %vm310_vm0, %v4222_v0  ;;  %318 = vst.msk [vmem:[#allocation2 + $0x38] sm:$0xff] (!%p3233_p3), %vm310_vm0, %v4222_v0 }
  0xbd   : > { %319 = vst.msk [vmem:[#allocation2 + $0x40] sm:$0xff] (!%p3233_p3), %vm310_vm0, %v4222_v0  ;;  %320 = vst.msk [vmem:[#allocation2 + $0x48] sm:$0xff] (!%p3233_p3), %vm310_vm0, %v4222_v0 }
  0xbe   : > { %321 = vst.msk [vmem:[#allocation2 + $0x50] sm:$0xff] (!%p3233_p3), %vm310_vm0, %v4222_v0  ;;  %322 = vst.msk [vmem:[#allocation2 + $0x58] sm:$0xff] (!%p3233_p3), %vm310_vm0, %v4222_v0 }
  0xbf   : > { %323 = vst.msk [vmem:[#allocation2 + $0x60] sm:$0xff] (!%p3233_p3), %vm310_vm0, %v4222_v0  ;;  %324 = vst.msk [vmem:[#allocation2 + $0x68] sm:$0xff] (!%p3233_p3), %vm310_vm0, %v4222_v0 }
  0xc0   : > { %325 = vst.msk [vmem:[#allocation2 + $0x70] sm:$0xff] %vm310_vm0, %v4222_v0  ;;  %326 = vst.msk [vmem:[#allocation2 + $0x78] sm:$0xff] %vm310_vm0, %v4222_v0 }
  0xc1   : > { %327 = vst.msk [vmem:[#allocation2 + $0x80] sm:$0xff] %vm310_vm0, %v4222_v0  ;;  %328 = vst.msk [vmem:[#allocation2 + $0x88] sm:$0xff] %vm310_vm0, %v4222_v0 }
  0xc2   : > { %329 = vst.msk [vmem:[#allocation2 + $0x90] sm:$0xff] %vm310_vm0, %v4222_v0  ;;  %330 = vst.msk [vmem:[#allocation2 + $0x98] sm:$0xff] %vm310_vm0, %v4222_v0 }
  0xc3   : > { %331 = vst.msk [vmem:[#allocation2 + $0xa0] sm:$0xff] %vm310_vm0, %v4222_v0  ;;  %332 = vst.msk [vmem:[#allocation2 + $0xa8] sm:$0xff] %vm310_vm0, %v4222_v0 }
  0xc4   : > { %333 = vst.msk [vmem:[#allocation2 + $0xb0] sm:$0xff] %vm310_vm0, %v4222_v0  ;;  %334 = vst.msk [vmem:[#allocation2 + $0xb8] sm:$0xff] %vm310_vm0, %v4222_v0 }
  0xc5   : > { %335 = vst.msk [vmem:[#allocation2 + $0xc0] sm:$0xff] %vm310_vm0, %v4222_v0  ;;  %336 = vst.msk [vmem:[#allocation2 + $0xc8] sm:$0xff] %vm310_vm0, %v4222_v0 }
  0xc6   : > { %337 = vst.msk [vmem:[#allocation2 + $0xd0] sm:$0xff] %vm310_vm0, %v4222_v0  ;;  %338 = vst.msk [vmem:[#allocation2 + $0xd8] sm:$0xff] %vm310_vm0, %v4222_v0 }
  0xc7   : > { %339 = vst.msk [vmem:[#allocation2 + $0xe0] sm:$0xff] %vm310_vm0, %v4222_v0  ;;  %340 = vst.msk [vmem:[#allocation2 + $0xe8] sm:$0xff] %vm310_vm0, %v4222_v0 }
  0xc8   : > { %341 = vst.msk [vmem:[#allocation2 + $0xf0] sm:$0xff] %vm310_vm0, %v4222_v0  ;;  %342 = vst.msk [vmem:[#allocation2 + $0xf8] sm:$0xff] %vm310_vm0, %v4222_v0 }
  0xc9   : > { %343 = vst.msk [vmem:[#allocation3] sm:$0xff] %vm310_vm0, %v4223_v1  ;;  %344 = vst.msk [vmem:[#allocation3 + $0x8] sm:$0xff] %vm310_vm0, %v4223_v1 }
  0xca   : > { %345 = vst.msk [vmem:[#allocation3 + $0x10] sm:$0xff] %vm310_vm0, %v4223_v1  ;;  %346 = vst.msk [vmem:[#allocation3 + $0x18] sm:$0xff] %vm310_vm0, %v4223_v1 }
  0xcb   : > { %347 = vst.msk [vmem:[#allocation3 + $0x20] sm:$0xff] %vm310_vm0, %v4223_v1  ;;  %348 = vst.msk [vmem:[#allocation3 + $0x28] sm:$0xff] %vm310_vm0, %v4223_v1 }
  0xcc   : > { %349 = vst.msk [vmem:[#allocation3 + $0x30] sm:$0xff] %vm310_vm0, %v4223_v1  ;;  %350 = vst.msk [vmem:[#allocation3 + $0x38] sm:$0xff] %vm310_vm0, %v4223_v1 }
  0xcd   : > { %351 = vst.msk [vmem:[#allocation3 + $0x40] sm:$0xff] %vm310_vm0, %v4223_v1  ;;  %352 = vst.msk [vmem:[#allocation3 + $0x48] sm:$0xff] %vm310_vm0, %v4223_v1 }
  0xce   : > { %353 = vst.msk [vmem:[#allocation3 + $0x50] sm:$0xff] %vm310_vm0, %v4223_v1  ;;  %354 = vst.msk [vmem:[#allocation3 + $0x58] sm:$0xff] %vm310_vm0, %v4223_v1 }
  0xcf   : > { %355 = vst.msk [vmem:[#allocation3 + $0x60] sm:$0xff] %vm310_vm0, %v4223_v1  ;;  %356 = vst.msk [vmem:[#allocation3 + $0x68] sm:$0xff] %vm310_vm0, %v4223_v1 }
  0xd0   : > { %357 = vst.msk [vmem:[#allocation3 + $0x70] sm:$0xff] %vm310_vm0, %v4223_v1  ;;  %358 = vst.msk [vmem:[#allocation3 + $0x78] sm:$0xff] %vm310_vm0, %v4223_v1 }
  0xd1   : > { %359 = vst.msk [vmem:[#allocation3 + $0x80] sm:$0xff] %vm310_vm0, %v4223_v1  ;;  %360 = vst.msk [vmem:[#allocation3 + $0x88] sm:$0xff] %vm310_vm0, %v4223_v1 }
  0xd2   : > { %361 = vst.msk [vmem:[#allocation3 + $0x90] sm:$0xff] %vm310_vm0, %v4223_v1  ;;  %362 = vst.msk [vmem:[#allocation3 + $0x98] sm:$0xff] %vm310_vm0, %v4223_v1 }
  0xd3   : > { %363 = vst.msk [vmem:[#allocation3 + $0xa0] sm:$0xff] %vm310_vm0, %v4223_v1  ;;  %364 = vst.msk [vmem:[#allocation3 + $0xa8] sm:$0xff] %vm310_vm0, %v4223_v1 }
  0xd4   : > { %365 = vst.msk [vmem:[#allocation3 + $0xb0] sm:$0xff] %vm310_vm0, %v4223_v1  ;;  %366 = vst.msk [vmem:[#allocation3 + $0xb8] sm:$0xff] %vm310_vm0, %v4223_v1 }
  0xd5   : > { %367 = vst.msk [vmem:[#allocation3 + $0xc0] sm:$0xff] %vm310_vm0, %v4223_v1  ;;  %368 = vst.msk [vmem:[#allocation3 + $0xc8] sm:$0xff] %vm310_vm0, %v4223_v1 }
  0xd6   : > { %369 = vst.msk [vmem:[#allocation3 + $0xd0] sm:$0xff] %vm310_vm0, %v4223_v1  ;;  %370 = vst.msk [vmem:[#allocation3 + $0xd8] sm:$0xff] %vm310_vm0, %v4223_v1 }
  0xd7   : > { %371 = vst.msk [vmem:[#allocation3 + $0xe0] sm:$0xff] %vm310_vm0, %v4223_v1  ;;  %372 = vst.msk [vmem:[#allocation3 + $0xe8] sm:$0xff] %vm310_vm0, %v4223_v1 }
  0xd8   : > { %373 = vst.msk [vmem:[#allocation3 + $0xf0] sm:$0xff] %vm310_vm0, %v4223_v1  ;;  %374 = vst.msk [vmem:[#allocation3 + $0xf8] sm:$0xff] %vm310_vm0, %v4223_v1 }
  0xd9   : > { %376 = vst.msk [vmem:[#allocation4] sm:$0xff] %vm375_vm1, %v4223_v1  ;;  %377 = vst.msk [vmem:[#allocation4 + $0x8] sm:$0xff] %vm375_vm1, %v4223_v1 }
  0xda   : > { %378 = vst.msk [vmem:[#allocation4 + $0x10] sm:$0xff] %vm375_vm1, %v4223_v1  ;;  %379 = vst.msk [vmem:[#allocation4 + $0x18] sm:$0xff] %vm375_vm1, %v4223_v1 }
  0xdb   : > { %380 = vst.msk [vmem:[#allocation4 + $0x20] sm:$0xff] %vm375_vm1, %v4223_v1  ;;  %381 = vst.msk [vmem:[#allocation4 + $0x28] sm:$0xff] %vm375_vm1, %v4223_v1 }
  0xdc   : > { %382 = vst.msk [vmem:[#allocation4 + $0x30] sm:$0xff] %vm375_vm1, %v4223_v1  ;;  %383 = vst.msk [vmem:[#allocation4 + $0x38] sm:$0xff] %vm375_vm1, %v4223_v1 }
  0xdd   : > { %384 = vst.msk [vmem:[#allocation4 + $0x40] sm:$0xff] %vm375_vm1, %v4223_v1  ;;  %385 = vst.msk [vmem:[#allocation4 + $0x48] sm:$0xff] %vm375_vm1, %v4223_v1 }
  0xde   : > { %386 = vst.msk [vmem:[#allocation4 + $0x50] sm:$0xff] %vm375_vm1, %v4223_v1  ;;  %387 = vst.msk [vmem:[#allocation4 + $0x58] sm:$0xff] %vm375_vm1, %v4223_v1 }
  0xdf   : > { %388 = vst.msk [vmem:[#allocation4 + $0x60] sm:$0xff] %vm375_vm1, %v4223_v1  ;;  %389 = vst.msk [vmem:[#allocation4 + $0x68] sm:$0xff] %vm375_vm1, %v4223_v1 }
  0xe0   : > { %390 = vst.msk [vmem:[#allocation4 + $0x70] sm:$0xff] %vm375_vm1, %v4223_v1  ;;  %391 = vst.msk [vmem:[#allocation4 + $0x78] sm:$0xff] %vm375_vm1, %v4223_v1 }
  0xe1   : > { %392 = vst.msk [vmem:[#allocation4 + $0x80] sm:$0xff] %vm375_vm1, %v4223_v1  ;;  %393 = vst.msk [vmem:[#allocation4 + $0x88] sm:$0xff] %vm375_vm1, %v4223_v1 }
  0xe2   : > { %394 = vst.msk [vmem:[#allocation4 + $0x90] sm:$0xff] %vm375_vm1, %v4223_v1  ;;  %395 = vst.msk [vmem:[#allocation4 + $0x98] sm:$0xff] %vm375_vm1, %v4223_v1 }
  0xe3   : > { %396 = vst.msk [vmem:[#allocation4 + $0xa0] sm:$0xff] %vm375_vm1, %v4223_v1  ;;  %397 = vst.msk [vmem:[#allocation4 + $0xa8] sm:$0xff] %vm375_vm1, %v4223_v1 }
  0xe4   : > { %398 = vst.msk [vmem:[#allocation4 + $0xb0] sm:$0xff] %vm375_vm1, %v4223_v1  ;;  %399 = vst.msk [vmem:[#allocation4 + $0xb8] sm:$0xff] %vm375_vm1, %v4223_v1 }
  0xe5   : > { %400 = vst.msk [vmem:[#allocation4 + $0xc0] sm:$0xff] %vm375_vm1, %v4223_v1  ;;  %401 = vst.msk [vmem:[#allocation4 + $0xc8] sm:$0xff] %vm375_vm1, %v4223_v1 }
  0xe6   : > { %402 = vst.msk [vmem:[#allocation4 + $0xd0] sm:$0xff] %vm375_vm1, %v4223_v1  ;;  %403 = vst.msk [vmem:[#allocation4 + $0xd8] sm:$0xff] %vm375_vm1, %v4223_v1 }
  0xe7   : > { %404 = vst.msk [vmem:[#allocation4 + $0xe0] sm:$0xff] %vm375_vm1, %v4223_v1  ;;  %405 = vst.msk [vmem:[#allocation4 + $0xe8] sm:$0xff] %vm375_vm1, %v4223_v1 }
  0xe8   : > { %406 = vst.msk [vmem:[#allocation4 + $0xf0] sm:$0xff] %vm375_vm1, %v4223_v1  ;;  %407 = vst.msk [vmem:[#allocation4 + $0xf8] sm:$0xff] %vm375_vm1, %v4223_v1 }
  0xe9 PF: > { %v3711_v2 = vld [vmem:[%s4577_s25] sm:$0xff]   ;;  %vm472_vm2 = vcmask 261120   ;;  %v3712_v3 = vld [vmem:[%s4577_s25 + $0x8] sm:$0xff]   ;;  %v3713_v5 = vld [vmem:[%s4577_s25 + $0x10] sm:$0xff]   ;;  %vm570_vm3 = vcmask 523264   ;;  %v4224_v30 = vmov 0  }
  0xea   : > { %3552 = vmatprep.subr.msk.bf16.mxu0 %vm472_vm2, %v3711_v2  ;;  %v486_v4 = vsel %vm472_vm2, %v3711_v2, 0  ;;  %v3714_v6 = vld [vmem:[%s4577_s25 + $0x18] sm:$0xff]   ;;  %v3715_v7 = vld [vmem:[%s4569_s7] sm:$0xff]   ;;  %v489_v8 = vsel %vm472_vm2, %v3712_v3, 0  ;;  %v492_v9 = vsel %vm472_vm2, %v3713_v5, 0  ;;  %v3716_v11 = vld [vmem:[%s4569_s7 + $0x8] sm:$0xff]   ;;  %3709 = vset.pattern.permute.xlu0 %v4224_v30 }
  0xeb   : > { %3425 = vmatpush3.bf16.xpose.msra.mxu0 %v486_v4  ;;  %3432 = vmatprep.mubr.msk.bf16.mxu0 %vm472_vm2, %v3715_v7  ;;  %v495_v10 = vsel %vm472_vm2, %v3714_v6, 0  ;;  %v3717_v12 = vld [vmem:[%s4569_s7 + $0x10] sm:$0xff]   ;;  %v3718_v13 = vld [vmem:[%s4569_s7 + $0x18] sm:$0xff]   ;;  %v4802_v32 = vld [vmem:[#allocation2] sm:$0xff]  ;;  %vm747_vm4 = vcmask 7168   ;;  %s4225_s10 = smov 96  }
  0xec   : > { %3553 = vmatprep.subr.msk.bf16.mxu0 %vm472_vm2, %v3712_v3  ;;  %3710 = vset.pattern.permute.xlu1 %v4224_v30  ;;  %v4800_v31 = vld [vmem:[#allocation2 + $0x10] sm:$0xff]  ;;  %v4810_v37 = vld [vmem:[#allocation2 + $0x18] sm:$0xff]  ;;  %v4817_v39 = vld [vmem:[#allocation2 + $0x8] sm:$0xff]  ;;  %s4226_s5 = smov 64   ;;  %s4227_s3 = smov 32  }
  0xed   : > { %v3720_v42 = vld [vmem:[%s4577_s25 + $0x8] sm:$0xff]   ;;  %v4835_v47 = vld [vmem:[#allocation2 + $0x20] sm:$0xff]  ;;  %v3722_v49 = vld [vmem:[%s4577_s25 + $0x18] sm:$0xff]   ;;  %s6101_s29 = sld [smem:[#allocation18_spill]] }
  0xee   : > { %v4844_v51 = vld [vmem:[#allocation2 + $0x28] sm:$0xff]  ;;  %v3727_v52 = vld [vmem:[%s4583_s28] sm:$0xff]   ;;  %v4850_v55 = vld [vmem:[#allocation2 + $0x30] sm:$0xff] }
  0xef   : > { %3440 = vmatprep.subr.bf16.mxu1 %v3727_v52  ;;  %v3724_v58 = vld [vmem:[%s4569_s7 + $0x8] sm:$0xff]   ;;  %v4862_v60 = vld [vmem:[#allocation2 + $0x38] sm:$0xff]  ;;  %v3729_v4 = vld [vmem:[%s4583_s28 + $0x10] sm:$0xff]  }
  0xf0   : > { %3441 = vmatpush3.bf16.msra.mxu1 %v3727_v52  ;;  %v3728_v61 = vld [vmem:[%s4583_s28 + $0x8] sm:$0xff]   ;;  %v3726_v3 = vld [vmem:[%s4569_s7 + $0x18] sm:$0xff]   ;;  %v3719_v7 = vld [vmem:[%s4577_s25] sm:$0xff]  }
  0xf1   : > { %3442 = vmatprep.subr.bf16.mxu1 %v3728_v61  ;;  %v3739_v62 = vld [vmem:[%s4569_s7] sm:$0xff]  }
  0xf3   : > { %3427 = vmatpush3.bf16.xpose.msra.mxu0 %v489_v8  ;;  %v3721_v8 = vld [vmem:[%s4577_s25 + $0x10] sm:$0xff]   ;;  %p3314_p12 = scmp.ne.s32.totalorder %s6101_s29, 1 }
  0xf4   : > { %3554 = vmatprep.subr.msk.bf16.mxu0 %vm472_vm2, %v3713_v5  ;;  %3443 = vmatpush3.bf16.msra.mxu1 %v3728_v61  ;;  %v3734_v5 = vld [vmem:[%s4583_s28 + $0x10] sm:$0xff]   ;;  %s4229_s8 = smov (!%p3314_p12), 32   ;;  %s4230_s27 = smov (!%p3314_p12), 64   ;;  %vm3000_vm5 = vcmask (!%p3314_p12), 785408  }
  0xf5   : > { %3444 = vmatprep.subr.bf16.mxu1 %v3729_v4  ;;  %s4231_s9 = smov (!%p3314_p12), 96  }
  0xf8   : > { %3445 = vmatpush3.bf16.msra.mxu1 %v3729_v4 }
  0xfb   : > { %3429 = vmatpush3.bf16.xpose.msra.mxu0 %v492_v9  ;;  %v3723_v9 = vld [vmem:[%s4569_s7] sm:$0xff]  }
  0xfc   : > { %3555 = vmatprep.subr.msk.bf16.mxu0 %vm472_vm2, %v3714_v6  ;;  %v3730_v6 = vld [vmem:[%s4583_s28 + $0x18] sm:$0xff]  }
  0xfd   : > { %3446 = vmatprep.subr.bf16.mxu1 %v3730_v6 }
  0xfe   : > { %3447 = vmatpush3.bf16.msra.mxu1 %v3730_v6 }
 0x103   : > { %3431 = vmatpush3.bf16.xpose.msra.mxu0 %v495_v10  ;;  %v3725_v10 = vld [vmem:[%s4569_s7 + $0x10] sm:$0xff]  }
 0x10a   : > { %3433 = vmatmul.mubr.msk.bf16.vlgmr.msra.gmra.mrb[0].mxu0 %vm472_vm2, %v3716_v11 }
 0x10b   : > { %3436 = vmatprep.mubr.msk.bf16.mxu0 %vm472_vm2, %v3717_v12 }
 0x112   : > { %3437 = vmatmul.mubr.msk.bf16.gmra.mrb[4].mxu0 %vm472_vm2, %v3718_v13 }
 0x1dd   : > { %v4768_v14 = vpop.f32.mrb[0].mxu0 }
 0x1de   : > { %v4770_v15 = vpop.f32.mrb[1].mxu0  ;;  %v577_v16 = vsel %vm570_vm3, %v4768_v14, -inf }
 0x1df   : > { %578 = vmax.xlane.f32.xlu1 %v577_v16  ;;  %v4774_v17 = vpop.f32.mrb[2].mxu0  ;;  %v571_v18 = vsel %vm570_vm3, %v4770_v15, -inf }
 0x1e0   : > { %572 = vmax.xlane.f32.xlu0 %v571_v18  ;;  %v4778_v19 = vpop.f32.mrb[3].mxu0  ;;  %v580_v20 = vsel %vm570_vm3, %v4774_v17, -inf }
 0x1e1   : > { %v574_v21 = vsel %vm570_vm3, %v4778_v19, -inf }
 0x1e3   : > { %581 = vmax.xlane.f32.xlu1 %v580_v20 }
 0x1e4   : > { %575 = vmax.xlane.f32.xlu0 %v574_v21 }
 0x1e5   : > { %v4784_v22 = vpop.f32.mrb[4].mxu0 }
 0x1e6   : > { %v4786_v23 = vpop.f32.mrb[5].mxu0  ;;  %v589_v28 = vsel %vm570_vm3, %v4784_v22, -inf }
 0x1e7   : > { %v4788_v24 = vpop.f32.mrb[6].mxu0  ;;  %v583_v25 = vsel %vm570_vm3, %v4786_v23, -inf }
 0x1e8   : > { %584 = vmax.xlane.f32.xlu0 %v583_v25  ;;  %v4792_v26 = vpop.f32.mrb[7].mxu0  ;;  %v592_v29 = vsel %vm570_vm3, %v4788_v24, -inf }
 0x1e9   : > { %v586_v27 = vsel %vm570_vm3, %v4792_v26, -inf }
 0x1ea   : > { %587 = vmax.xlane.f32.xlu1 %v586_v27 }
 0x1ec   : > { %590 = vmax.xlane.f32.xlu0 %v589_v28 }
 0x1ee   : > { %593 = vmax.xlane.f32.xlu1 %v592_v29 }
 0x26c   : > { %v579_v33 = vpop.xlane.xlu1 %578 }
 0x26d   : > { %v4805_v34 = vmax.f32 %v4800_v31, %v579_v33  ;;  %v573_v35 = vpop.xlane.xlu0 %572 }
 0x26e   : > { %v4808_v36 = vmax.f32 %v4802_v32, %v573_v35 }
 0x26f   : > { %931 = vst.msk [vmem:[#allocation2 + $0x10] sm:$0xff] %vm747_vm4, %v4805_v34  ;;  %639 = vperm.xlu1 %3710, %v4805_v34  }
 0x270   : > { %929 = vst.msk [vmem:[#allocation2] sm:$0xff] %vm747_vm4, %v4808_v36  ;;  %v582_v41 = vpop.xlane.xlu1 %581  ;;  %629 = vperm.xlu0 %3709, %v4808_v36  }
 0x271   : > { %v4826_v43 = vmax.f32 %v4810_v37, %v582_v41  ;;  %v576_v44 = vpop.xlane.xlu0 %575 }
 0x272   : > { %v4829_v45 = vmax.f32 %v4817_v39, %v576_v44 }
 0x273   : > { %932 = vst.msk [vmem:[#allocation2 + $0x18] sm:$0xff] %vm747_vm4, %v4826_v43 }
 0x274   : > { %930 = vst.msk [vmem:[#allocation2 + $0x8] sm:$0xff] %vm747_vm4, %v4829_v45  ;;  %634 = vperm.xlu1 %3710, %v4829_v45   ;;  %1011 = vrot.lane.b32.xlu0 %v3720_v42, %s4225_s10 }
 0x275   : > { %v585_v50 = vpop.xlane.xlu0 %584 }
 0x276   : > { %v4848_v53 = vmax.f32 %v4835_v47, %v585_v50 }
 0x277   : > { %v588_v54 = vpop.xlane.xlu1 %587 }
 0x278   : > { %933 = vst.msk [vmem:[#allocation2 + $0x20] sm:$0xff] %vm747_vm4, %v4848_v53  ;;  %v4857_v57 = vmax.f32 %v4844_v51, %v588_v54  ;;  %644 = vperm.xlu1 %3710, %v4826_v43   ;;  %1015 = vrot.lane.b32.xlu0 %v3722_v49, %s4225_s10 }
 0x279   : > { %v591_v59 = vpop.xlane.xlu0 %590 }
 0x27a   : > { %934 = vst.msk [vmem:[#allocation2 + $0x28] sm:$0xff] %vm747_vm4, %v4857_v57  ;;  %v4870_v63 = vmax.f32 %v4850_v55, %v591_v59 }
 0x27b   : > { %v594_v0 = vpop.xlane.xlu1 %593 }
 0x27c   : > { %935 = vst.msk [vmem:[#allocation2 + $0x30] sm:$0xff] %vm747_vm4, %v4870_v63  ;;  %v4877_v2 = vmax.f32 %v4862_v60, %v594_v0  ;;  %659 = vperm.xlu1 %3710, %v4870_v63   ;;  %983 = vrot.lane.b32.xlu0 %v3724_v58, %s4225_s10 }
 0x27e   : > { %936 = vst.msk [vmem:[#allocation2 + $0x38] sm:$0xff] %vm747_vm4, %v4877_v2 }
 0x280   : > { %649 = vperm.xlu1 %3710, %v4848_v53   ;;  %987 = vrot.lane.b32.xlu0 %v3726_v3, %s4225_s10 }
 0x284   : > { %664 = vperm.xlu1 %3710, %v4877_v2  }
 0x288   : > { %654 = vperm.xlu1 %3710, %v4857_v57  }
 0x28c   : > { %1009 = vrot.lane.b32.xlu1 %v3719_v7, %s4225_s10 }
 0x290   : > { %1013 = vrot.lane.b32.xlu1 %v3721_v8, %s4225_s10 }
 0x294   : > { %981 = vrot.lane.b32.xlu1 %v3723_v9, %s4225_s10 }
 0x298   : > { %985 = vrot.lane.b32.xlu1 %v3725_v10, %s4225_s10 }
 0x2ee   : > { %v640_v11 = vpop.permute.xlu1 %639 }
 0x2ef   : > { %v630_v12 = vpop.permute.xlu0 %629  ;;  %v669_v25 = vsub.f32 %v4768_v14, %v640_v11 }
 0x2f0   : > { %v667_v16 = vsub.f32 %v4770_v15, %v630_v12 }
 0x2f3   : > { %v635_v13 = vpop.permute.xlu1 %634 }
 0x2f4   : > { %v668_v18 = vsub.f32 %v4778_v19, %v635_v13 }
 0x2f6   : > { %v675_v20 = vpack.c.bf16 %v668_v18, %v667_v16 }
 0x2f7   : > { %v645_v21 = vpop.permute.xlu1 %644 }
 0x2f8   : > { %v680_v27 = vmul.bf16 1069105081, %v675_v20  ;;  %v670_v28 = vsub.f32 %v4774_v17, %v645_v21 }
 0x2fa   : > { %3759 = vpow.bf16 %v680_v27  ;;  %v676_v29 = vpack.c.bf16 %v670_v28, %v669_v25 }
 0x2fb   : > { %v660_v30 = vpop.permute.xlu1 %659 }
 0x2fc   : > { %v683_v33 = vmul.bf16 1069105081, %v676_v29  ;;  %v673_v42 = vsub.f32 %v4784_v22, %v660_v30 }
 0x2fe   : > { %3761 = vpow.bf16 %v683_v33 }
 0x2ff   : > { %v650_v35 = vpop.permute.xlu1 %649 }
 0x300   : > { %v671_v17 = vsub.f32 %v4786_v23, %v650_v35 }
 0x303   : > { %v665_v41 = vpop.permute.xlu1 %664 }
 0x304   : > { %v674_v15 = vsub.f32 %v4788_v24, %v665_v41  ;;  %v1012_v24 = vpop.permute.xlu0 %1011 }
 0x305   : > { %v4906_v44 = vpop.eup %3759  ;;  %v1033_v23 = vsel %vm472_vm2, %v1012_v24, 0 }
 0x306   : > { %v678_v19 = vpack.c.bf16 %v674_v15, %v673_v42  ;;  %3448 = vmatprep.mubr.msk.bf16.mxu1 %vm570_vm3, %v4906_v44 }
 0x307   : > { %v655_v14 = vpop.permute.xlu1 %654 }
 0x308   : > { %v672_v49 = vsub.f32 %v4792_v26, %v655_v14  ;;  %v689_v22 = vmul.bf16 1069105081, %v678_v19  ;;  %v1016_v6 = vpop.permute.xlu0 %1015 }
 0x309   : > { %v4912_v50 = vpop.eup %3761  ;;  %v1039_v7 = vsel %vm472_vm2, %v1016_v6, 0 }
 0x30a   : > { %v677_v52 = vpack.c.bf16 %v672_v49, %v671_v17  ;;  %3449 = vmatmul.mubr.msk.bf16.vlgmr.msra.gmra.mrb[0].mxu1 %vm570_vm3, %v4912_v50 }
 0x30b   : > { %v1010_v54 = vpop.permute.xlu1 %1009 }
 0x30c   : > { %v686_v58 = vmul.bf16 1069105081, %v677_v52  ;;  %3556 = vmatprep.subr.msk.bf16.mxu1 %vm472_vm2, %v1010_v54  ;;  %v1030_v59 = vsel %vm472_vm2, %v1010_v54, 0  ;;  %v984_v8 = vpop.permute.xlu0 %983 }
 0x30d   : > { %3457 = vmatpush3.bf16.xpose.msra.mxu1 %v1030_v59  ;;  %v4986_v59 = vld [vmem:[#allocation2 + $0x48] sm:$0xff] }
 0x30e   : > { %3763 = vpow.bf16 %v686_v58  ;;  %3557 = vmatprep.subr.msk.bf16.mxu1 %vm472_vm2, %v1012_v24  ;;  %v4984_v24 = vld [vmem:[#allocation2 + $0x40] sm:$0xff]  ;;  %6026 = vst [vmem:[#allocation39_spill] sm:$0xff] %v4986_v59 }
 0x30f   : > { %3765 = vpow.bf16 %v689_v22  ;;  %v1014_v26 = vpop.permute.xlu1 %1013 }
 0x310   : > { %v1036_v4 = vsel %vm472_vm2, %v1014_v26, 0  ;;  %v988_v10 = vpop.permute.xlu0 %987 }
 0x313   : > { %v982_v0 = vpop.permute.xlu1 %981 }
 0x315   : > { %3459 = vmatpush3.bf16.xpose.msra.mxu1 %v1033_v23 }
 0x316   : > { %3558 = vmatprep.subr.msk.bf16.mxu1 %vm472_vm2, %v1014_v26 }
 0x317   : > { %v986_v9 = vpop.permute.xlu1 %985 }
 0x319   : > { %v4921_v61 = vpop.eup %3763 }
 0x31a   : > { %v4923_v3 = vpop.eup %3765  ;;  %3452 = vmatprep.mubr.msk.bf16.mxu1 %vm570_vm3, %v4921_v61 }
 0x31b   : > { %3453 = vmatmul.mubr.msk.bf16.gmra.mrb[4].mxu1 %vm570_vm3, %v4923_v3 }
 0x31c   : > { %3464 = vmatprep.mubr.msk.bf16.mxu1 %vm472_vm2, %v982_v0  ;;  %v4991_v0 = vld [vmem:[#allocation2 + $0x58] sm:$0xff] }
 0x31d   : > { %3461 = vmatpush3.bf16.xpose.msra.mxu1 %v1036_v4 }
 0x31e   : > { %3559 = vmatprep.subr.msk.bf16.mxu1 %vm472_vm2, %v1016_v6 }
 0x325   : > { %3463 = vmatpush3.bf16.xpose.msra.mxu1 %v1039_v7 }
 0x32c   : > { %3465 = vmatmul.mubr.msk.bf16.vlgmr.msra.gmra.mrb[8].mxu1 %vm472_vm2, %v984_v8  ;;  %v5001_v8 = vld [vmem:[#allocation2 + $0x50] sm:$0xff] }
 0x32d   : > { %3468 = vmatprep.mubr.msk.bf16.mxu1 %vm472_vm2, %v986_v9  ;;  %v5036_v9 = vld [vmem:[#allocation2 + $0x78] sm:$0xff] }
 0x334   : > { %3469 = vmatmul.mubr.msk.bf16.gmra.mrb[12].mxu1 %vm472_vm2, %v988_v10 }
 0x3dd   : > { %v4936_v11 = vpop.f32.mrb[0].mxu1 }
 0x3de   : > { %6018 = vst [vmem:[#allocation31_spill] sm:$0xff] %v4936_v11  ;;  %v4938_v12 = vpop.f32.mrb[1].mxu1 }
 0x3df   : > { %6019 = vst [vmem:[#allocation32_spill] sm:$0xff] %v4938_v12  ;;  %v4940_v13 = vpop.f32.mrb[2].mxu1 }
 0x3e0   : > { %6020 = vst [vmem:[#allocation33_spill] sm:$0xff] %v4940_v13  ;;  %v4942_v16 = vpop.f32.mrb[3].mxu1 }
 0x3e1   : > { %6021 = vst [vmem:[#allocation34_spill] sm:$0xff] %v4942_v16 }
 0x3ee   : > { %v4944_v18 = vpop.f32.mrb[4].mxu1 }
 0x3ef   : > { %6022 = vst [vmem:[#allocation35_spill] sm:$0xff] %v4944_v18  ;;  %v4946_v20 = vpop.f32.mrb[5].mxu1  ;;  %v5207_v18 = vld [vmem:[#allocation2 + $0xa8] sm:$0xff] }
 0x3f0   : > { %6023 = vst [vmem:[#allocation36_spill] sm:$0xff] %v4946_v20  ;;  %v4948_v21 = vpop.f32.mrb[6].mxu1  ;;  %v5209_v20 = vld [vmem:[#allocation2 + $0xa0] sm:$0xff] }
 0x3f1   : > { %6024 = vst [vmem:[#allocation37_spill] sm:$0xff] %v4948_v21  ;;  %v4950_v25 = vpop.f32.mrb[7].mxu1  ;;  %6043 = vst [vmem:[#allocation56_spill] sm:$0xff] %v5209_v20  ;;  %v712_v21 = vunpack.c.h.bf16 %v4921_v61 }
 0x3f2   : > { %6025 = vst [vmem:[#allocation38_spill] sm:$0xff] %v4950_v25 }
 0x3ff   : > { %v4952_v27 = vpop.f32.mrb[8].mxu1 }
 0x400   : > { %v4954_v28 = vpop.f32.mrb[9].mxu1  ;;  %v1121_v42 = vsel %vm570_vm3, %v4952_v27, -inf }
 0x401   : > { %v4956_v29 = vpop.f32.mrb[10].mxu1  ;;  %v1115_v30 = vsel %vm570_vm3, %v4954_v28, -inf }
 0x402   : > { %1116 = vmax.xlane.f32.xlu1 %v1115_v30  ;;  %v4960_v33 = vpop.f32.mrb[11].mxu1  ;;  %v1124_v41 = vsel %vm570_vm3, %v4956_v29, -inf }
 0x403   : > { %v1118_v35 = vsel %vm570_vm3, %v4960_v33, -inf }
 0x404   : > { %1119 = vmax.xlane.f32.xlu0 %v1118_v35  ;;  %v5038_v35 = vld [vmem:[#allocation2 + $0x70] sm:$0xff] }
 0x405   : > { %6030 = vst [vmem:[#allocation43_spill] sm:$0xff] %v5038_v35 }
 0x406   : > { %1125 = vmax.xlane.f32.xlu1 %v1124_v41 }
 0x407   : > { %v4968_v15 = vpop.f32.mrb[12].mxu1 }
 0x408   : > { %1122 = vmax.xlane.f32.xlu0 %v1121_v42  ;;  %v4970_v19 = vpop.f32.mrb[13].mxu1  ;;  %v1133_v54 = vsel %vm570_vm3, %v4968_v15, -inf  ;;  %v3731_v42 = vld [vmem:[%s4583_s28 + $0x8] sm:$0xff]  }
 0x409   : > { %v4972_v14 = vpop.f32.mrb[14].mxu1  ;;  %v1127_v17 = vsel %vm570_vm3, %v4970_v19, -inf }
 0x40a   : > { %v4976_v49 = vpop.f32.mrb[15].mxu1  ;;  %v1136_v22 = vsel %vm570_vm3, %v4972_v14, -inf }
 0x40b   : > { %v1130_v52 = vsel %vm570_vm3, %v4976_v49, -inf }
 0x40c   : > { %1131 = vmax.xlane.f32.xlu1 %v1130_v52  ;;  %1128 = vmax.xlane.f32.xlu0 %v1127_v17  ;;  %v5019_v17 = vld [vmem:[#allocation2 + $0x68] sm:$0xff]  ;;  %v5021_v52 = vld [vmem:[#allocation2 + $0x60] sm:$0xff] }
 0x40d   : > { %6028 = vst [vmem:[#allocation41_spill] sm:$0xff] %v5021_v52 }
 0x410   : > { %1137 = vmax.xlane.f32.xlu1 %v1136_v22  ;;  %1134 = vmax.xlane.f32.xlu0 %v1133_v54 }
 0x48f   : > { %v1117_v58 = vpop.xlane.xlu1 %1116 }
 0x490   : > { %v4989_v23 = vmax.f32 %v4984_v24, %v1117_v58 }
 0x491   : > { %v1120_v26 = vpop.xlane.xlu0 %1119 }
 0x492   : > { %1482 = vst.msk [vmem:[#allocation2 + $0x40] sm:$0xff] %vm747_vm4, %v4989_v23  ;;  %v4998_v6 = vmax.f32 %v4986_v59, %v1120_v26  ;;  %1173 = vperm.xlu0 %3709, %v4989_v23   ;;  %v3732_v26 = vld [vmem:[%s4583_s28 + $0x18] sm:$0xff]  }
 0x493   : > { %v1126_v7 = vpop.xlane.xlu1 %1125 }
 0x494   : > { %6027 = vst [vmem:[#allocation40_spill] sm:$0xff] %v4998_v6  ;;  %1483 = vst.msk [vmem:[#allocation2 + $0x48] sm:$0xff] %vm747_vm4, %v4998_v6  ;;  %v5008_v10 = vmax.f32 %v4991_v0, %v1126_v7 }
 0x495   : > { %v1123_v30 = vpop.xlane.xlu0 %1122 }
 0x496   : > { %1485 = vst.msk [vmem:[#allocation2 + $0x58] sm:$0xff] %vm747_vm4, %v5008_v10  ;;  %v5015_v41 = vmax.f32 %v5001_v8, %v1123_v30  ;;  %1188 = vperm.xlu0 %3709, %v5008_v10  }
 0x498   : > { %1484 = vst.msk [vmem:[#allocation2 + $0x50] sm:$0xff] %vm747_vm4, %v5015_v41  ;;  %1183 = vperm.xlu1 %3710, %v5015_v41  }
 0x499   : > { %v1132_v54 = vpop.xlane.xlu1 %1131  ;;  %v1129_v58 = vpop.xlane.xlu0 %1128 }
 0x49a   : > { %1379 = vrot.lane.b32.xlu0 %v3731_v42, %s4225_s10  ;;  %v5031_v7 = vmax.f32 %v5019_v17, %v1132_v54  ;;  %v5034_v30 = vmax.f32 %v5021_v52, %v1129_v58  ;;  %v3733_v42 = vld [vmem:[%s4583_s28] sm:$0xff]   ;;  %v3742_v54 = vld [vmem:[%s4569_s7 + $0x18] sm:$0xff]  }
 0x49c   : > { %6029 = vst [vmem:[#allocation42_spill] sm:$0xff] %v5034_v30  ;;  %1178 = vperm.xlu1 %3710, %v4998_v6   ;;  %1487 = vst.msk [vmem:[#allocation2 + $0x68] sm:$0xff] %vm747_vm4, %v5031_v7 }
 0x49d   : > { %1486 = vst.msk [vmem:[#allocation2 + $0x60] sm:$0xff] %vm747_vm4, %v5034_v30  ;;  %v1138_v58 = vpop.xlane.xlu1 %1137  ;;  %v1135_v4 = vpop.xlane.xlu0 %1134 }
 0x49e   : > { %1383 = vrot.lane.b32.xlu0 %v3732_v26, %s4225_s10  ;;  %v5052_v1 = vmax.f32 %v5036_v9, %v1138_v58  ;;  %v5055_v22 = vmax.f32 %v5038_v35, %v1135_v4  ;;  %v3736_v4 = vld [vmem:[%s4577_s25 + $0x8] sm:$0xff]   ;;  %v3735_v58 = vld [vmem:[%s4577_s25] sm:$0xff]  }
 0x49f   : > { %v3740_v26 = vld [vmem:[%s4569_s7 + $0x8] sm:$0xff]  }
 0x4a0   : > { %6031 = vst [vmem:[#allocation44_spill] sm:$0xff] %v5055_v22  ;;  %1377 = vrot.lane.b32.xlu1 %v3733_v42, %s4225_s10  ;;  %1489 = vst.msk [vmem:[#allocation2 + $0x78] sm:$0xff] %vm747_vm4, %v5052_v1  ;;  %v3738_v42 = vld [vmem:[%s4577_s25 + $0x18] sm:$0xff]  }
 0x4a1   : > { %1488 = vst.msk [vmem:[#allocation2 + $0x70] sm:$0xff] %vm747_vm4, %v5055_v22 }
 0x4a2   : > { %1198 = vperm.xlu0 %3709, %v5031_v7  }
 0x4a4   : > { %1381 = vrot.lane.b32.xlu1 %v3734_v5, %s4225_s10  ;;  %v3737_v5 = vld [vmem:[%s4577_s25 + $0x10] sm:$0xff]  }
 0x4a6   : > { %1208 = vperm.xlu0 %3709, %v5052_v1  }
 0x4a8   : > { %1203 = vperm.xlu1 %3710, %v5055_v22  }
 0x4aa   : > { %1564 = vrot.lane.b32.xlu0 %v3736_v4, %s4226_s5  ;;  %v3741_v4 = vld [vmem:[%s4569_s7 + $0x10] sm:$0xff]  }
 0x4ac   : > { %1193 = vperm.xlu1 %3710, %v5034_v30  }
 0x4ae   : > { %1568 = vrot.lane.b32.xlu0 %v3738_v42, %s4226_s5 }
 0x4b0   : > { %1562 = vrot.lane.b32.xlu1 %v3735_v58, %s4226_s5 }
 0x4b2   : > { %1536 = vrot.lane.b32.xlu0 %v3740_v26, %s4226_s5 }
 0x4b4   : > { %1566 = vrot.lane.b32.xlu1 %v3737_v5, %s4226_s5 }
 0x4b6   : > { %1540 = vrot.lane.b32.xlu0 %v3742_v54, %s4226_s5 }
 0x4b8   : > { %1534 = vrot.lane.b32.xlu1 %v3739_v62, %s4226_s5 }
 0x4bc   : > { %1538 = vrot.lane.b32.xlu1 %v3741_v4, %s4226_s5 }
 0x511   : > { %v1174_v46 = vpop.permute.xlu0 %1173 }
 0x512   : > { %v1211_v5 = vsub.f32 %v4954_v28, %v1174_v46 }
 0x515   : > { %v1189_v40 = vpop.permute.xlu0 %1188 }
 0x516   : > { %v1214_v56 = vsub.f32 %v4956_v29, %v1189_v40 }
 0x517   : > { %v1184_v42 = vpop.permute.xlu1 %1183 }
 0x518   : > { %v1213_v58 = vsub.f32 %v4952_v27, %v1184_v42 }
 0x519   : > { %v1380_v38 = vpop.permute.xlu0 %1379 }
 0x51a   : > { %v1220_v26 = vpack.c.bf16 %v1214_v56, %v1213_v58 }
 0x51b   : > { %v1179_v48 = vpop.permute.xlu1 %1178 }
 0x51c   : > { %v1212_v30 = vsub.f32 %v4960_v33, %v1179_v48  ;;  %v1227_v6 = vmul.bf16 1069105081, %v1220_v26 }
 0x51d   : > { %v1384_v54 = vpop.permute.xlu0 %1383 }
 0x51e   : > { %v1219_v52 = vpack.c.bf16 %v1212_v30, %v1211_v5 }
 0x51f   : > { %v1378_v62 = vpop.permute.xlu1 %1377 }
 0x520   : > { %v1224_v59 = vmul.bf16 1069105081, %v1219_v52  ;;  %3472 = vmatprep.subr.bf16.mxu0 %v1378_v62 }
 0x521   : > { %v1199_v4 = vpop.permute.xlu0 %1198  ;;  %3473 = vmatpush3.bf16.msra.mxu0 %v1378_v62 }
 0x522   : > { %3767 = vpow.bf16 %v1224_v59  ;;  %3474 = vmatprep.subr.bf16.mxu0 %v1380_v38  ;;  %v1216_v33 = vsub.f32 %v4976_v49, %v1199_v4 }
 0x523   : > { %v1382_v40 = vpop.permute.xlu1 %1381  ;;  %3769 = vpow.bf16 %v1227_v6 }
 0x525   : > { %v1209_v27 = vpop.permute.xlu0 %1208  ;;  %3475 = vmatpush3.bf16.msra.mxu0 %v1380_v38 }
 0x526   : > { %3476 = vmatprep.subr.bf16.mxu0 %v1382_v40  ;;  %v1218_v46 = vsub.f32 %v4972_v14, %v1209_v27 }
 0x527   : > { %v1204_v56 = vpop.permute.xlu1 %1203 }
 0x528   : > { %v1217_v48 = vsub.f32 %v4968_v15, %v1204_v56 }
 0x529   : > { %3477 = vmatpush3.bf16.msra.mxu0 %v1382_v40  ;;  %v1565_v49 = vpop.permute.xlu0 %1564 }
 0x52a   : > { %v1222_v28 = vpack.c.bf16 %v1218_v46, %v1217_v48  ;;  %3478 = vmatprep.subr.bf16.mxu0 %v1384_v54  ;;  %v1586_v58 = vsel %vm472_vm2, %v1565_v49, 0 }
 0x52b   : > { %v1194_v29 = vpop.permute.xlu1 %1193 }
 0x52c   : > { %v1215_v52 = vsub.f32 %v4970_v19, %v1194_v29  ;;  %v1233_v14 = vmul.bf16 1069105081, %v1222_v28 }
 0x52d   : > { %v5096_v59 = vpop.eup %3767  ;;  %3479 = vmatpush3.bf16.msra.mxu0 %v1384_v54  ;;  %v1569_v4 = vpop.permute.xlu0 %1568 }
 0x52e   : > { %v1221_v6 = vpack.c.bf16 %v1216_v33, %v1215_v52  ;;  %3480 = vmatprep.mubr.msk.bf16.mxu0 %vm570_vm3, %v5096_v59  ;;  %v5100_v38 = vpop.eup %3769  ;;  %v1592_v40 = vsel %vm472_vm2, %v1569_v4, 0 }
 0x52f   : > { %v1563_v30 = vpop.permute.xlu1 %1562 }
 0x530   : > { %v1230_v15 = vmul.bf16 1069105081, %v1221_v6  ;;  %3481 = vmatmul.mubr.msk.bf16.vlgmr.msra.gmra.mrb[8].mxu0 %vm570_vm3, %v5100_v38  ;;  %3560 = vmatprep.subr.msk.bf16.mxu0 %vm472_vm2, %v1563_v30  ;;  %v1583_v19 = vsel %vm472_vm2, %v1563_v30, 0 }
 0x531   : > { %v1537_v27 = vpop.permute.xlu0 %1536 }
 0x532   : > { %3771 = vpow.bf16 %v1230_v15 }
 0x533   : > { %3773 = vpow.bf16 %v1233_v14  ;;  %v1567_v42 = vpop.permute.xlu1 %1566 }
 0x534   : > { %v1589_v62 = vsel %vm472_vm2, %v1567_v42, 0 }
 0x535   : > { %v1541_v46 = vpop.permute.xlu0 %1540 }
 0x536   : > { %3489 = vmatpush3.bf16.xpose.msra.mxu0 %v1583_v19 }
 0x537   : > { %3561 = vmatprep.subr.msk.bf16.mxu0 %vm472_vm2, %v1565_v49  ;;  %v1535_v5 = vpop.permute.xlu1 %1534 }
 0x53b   : > { %v1539_v56 = vpop.permute.xlu1 %1538 }
 0x53d   : > { %v5108_v26 = vpop.eup %3771 }
 0x53e   : > { %6032 = vst [vmem:[#allocation45_spill] sm:$0xff] %v5108_v26  ;;  %v5110_v54 = vpop.eup %3773  ;;  %3484 = vmatprep.mubr.msk.bf16.mxu0 %vm570_vm3, %v5108_v26  ;;  %3491 = vmatpush3.bf16.xpose.msra.mxu0 %v1586_v58 }
 0x53f   : > { %3485 = vmatmul.mubr.msk.bf16.gmra.mrb[12].mxu0 %vm570_vm3, %v5110_v54  ;;  %3562 = vmatprep.subr.msk.bf16.mxu0 %vm472_vm2, %v1567_v42 }
 0x540   : > { %3496 = vmatprep.mubr.msk.bf16.mxu0 %vm472_vm2, %v1535_v5 }
 0x546   : > { %3493 = vmatpush3.bf16.xpose.msra.mxu0 %v1589_v62 }
 0x547   : > { %3563 = vmatprep.subr.msk.bf16.mxu0 %vm472_vm2, %v1569_v4 }
 0x54e   : > { %3495 = vmatpush3.bf16.xpose.msra.mxu0 %v1592_v40 }
 0x555   : > { %3497 = vmatmul.mubr.msk.bf16.vlgmr.msra.gmra.mrb[16].mxu0 %vm472_vm2, %v1537_v27 }
 0x556   : > { %3500 = vmatprep.mubr.msk.bf16.mxu0 %vm472_vm2, %v1539_v56 }
 0x55d   : > { %3501 = vmatmul.mubr.msk.bf16.gmra.mrb[20].mxu0 %vm472_vm2, %v1541_v46 }
 0x603   : > { %v5124_v48 = vpop.f32.mrb[8].mxu0 }
 0x604   : > { %6033 = vst [vmem:[#allocation46_spill] sm:$0xff] %v5124_v48  ;;  %v5126_v28 = vpop.f32.mrb[9].mxu0 }
 0x605   : > { %6034 = vst [vmem:[#allocation47_spill] sm:$0xff] %v5126_v28  ;;  %v5128_v29 = vpop.f32.mrb[10].mxu0 }
 0x606   : > { %6035 = vst [vmem:[#allocation48_spill] sm:$0xff] %v5128_v29  ;;  %v5130_v33 = vpop.f32.mrb[11].mxu0  ;;  %v5189_v29 = vld [vmem:[#allocation2 + $0x90] sm:$0xff] }
 0x607   : > { %6036 = vst [vmem:[#allocation49_spill] sm:$0xff] %v5130_v33  ;;  %v5174_v33 = vld [vmem:[#allocation2 + $0x88] sm:$0xff] }
 0x608   : > { %6041 = vst [vmem:[#allocation54_spill] sm:$0xff] %v5174_v33 }
 0x612   : > { %v5132_v52 = vpop.f32.mrb[12].mxu0 }
 0x613   : > { %6037 = vst [vmem:[#allocation50_spill] sm:$0xff] %v5132_v52  ;;  %v5134_v6 = vpop.f32.mrb[13].mxu0  ;;  %v5172_v52 = vld [vmem:[#allocation2 + $0x80] sm:$0xff] }
 0x614   : > { %6038 = vst [vmem:[#allocation51_spill] sm:$0xff] %v5134_v6  ;;  %v5136_v14 = vpop.f32.mrb[14].mxu0 }
 0x615   : > { %6039 = vst [vmem:[#allocation52_spill] sm:$0xff] %v5136_v14  ;;  %v5138_v30 = vpop.f32.mrb[15].mxu0 }
 0x616   : > { %6040 = vst [vmem:[#allocation53_spill] sm:$0xff] %v5138_v30 }
 0x628   : > { %v5140_v15 = vpop.f32.mrb[16].mxu0 }
 0x629   : > { %v5142_v19 = vpop.f32.mrb[17].mxu0  ;;  %v1674_v4 = vsel %vm570_vm3, %v5140_v15, -inf }
 0x62a   : > { %v5144_v49 = vpop.f32.mrb[18].mxu0  ;;  %v1668_v42 = vsel %vm570_vm3, %v5142_v19, -inf }
 0x62b   : > { %1669 = vmax.xlane.f32.xlu1 %v1668_v42  ;;  %v5148_v58 = vpop.f32.mrb[19].mxu0  ;;  %v1677_v62 = vsel %vm570_vm3, %v5144_v49, -inf }
 0x62c   : > { %v1671_v5 = vsel %vm570_vm3, %v5148_v58, -inf }
 0x62d   : > { %1672 = vmax.xlane.f32.xlu0 %v1671_v5 }
 0x62f   : > { %1678 = vmax.xlane.f32.xlu1 %v1677_v62 }
 0x630   : > { %v5156_v40 = vpop.f32.mrb[20].mxu0 }
 0x631   : > { %1675 = vmax.xlane.f32.xlu0 %v1674_v4  ;;  %v5158_v27 = vpop.f32.mrb[21].mxu0  ;;  %v1686_v4 = vsel %vm570_vm3, %v5156_v40, -inf }
 0x632   : > { %v5160_v56 = vpop.f32.mrb[22].mxu0  ;;  %v1680_v46 = vsel %vm570_vm3, %v5158_v27, -inf }
 0x633   : > { %v5164_v42 = vpop.f32.mrb[23].mxu0  ;;  %v1689_v62 = vsel %vm570_vm3, %v5160_v56, -inf }
 0x634   : > { %v1683_v5 = vsel %vm570_vm3, %v5164_v42, -inf }
 0x635   : > { %1684 = vmax.xlane.f32.xlu1 %v1683_v5  ;;  %1681 = vmax.xlane.f32.xlu0 %v1680_v46  ;;  %v5179_v5 = vld [vmem:[#allocation2 + $0x98] sm:$0xff] }
 0x639   : > { %1690 = vmax.xlane.f32.xlu1 %v1689_v62  ;;  %1687 = vmax.xlane.f32.xlu0 %v1686_v4 }
 0x6b8   : > { %v1670_v6 = vpop.xlane.xlu1 %1669 }
 0x6b9   : > { %v5177_v14 = vmax.f32 %v5172_v52, %v1670_v6  ;;  %v3743_v6 = vld [vmem:[%s4583_s28 + $0x8] sm:$0xff]  }
 0x6ba   : > { %v1673_v30 = vpop.xlane.xlu0 %1672 }
 0x6bb   : > { %2035 = vst.msk [vmem:[#allocation2 + $0x80] sm:$0xff] %vm747_vm4, %v5177_v14  ;;  %v5186_v62 = vmax.f32 %v5174_v33, %v1673_v30  ;;  %1726 = vperm.xlu0 %3709, %v5177_v14   ;;  %v5224_v33 = vld [vmem:[#allocation2 + $0xb8] sm:$0xff] }
 0x6bc   : > { %v1679_v4 = vpop.xlane.xlu1 %1678 }
 0x6bd   : > { %6042 = vst [vmem:[#allocation55_spill] sm:$0xff] %v5186_v62  ;;  %2036 = vst.msk [vmem:[#allocation2 + $0x88] sm:$0xff] %vm747_vm4, %v5186_v62  ;;  %v5196_v46 = vmax.f32 %v5179_v5, %v1679_v4  ;;  %v5226_v4 = vld [vmem:[#allocation2 + $0xb0] sm:$0xff] }
 0x6be   : > { %v1676_v48 = vpop.xlane.xlu0 %1675  ;;  %6045 = vst [vmem:[#allocation58_spill] sm:$0xff] %v5226_v4 }
 0x6bf   : > { %2038 = vst.msk [vmem:[#allocation2 + $0x98] sm:$0xff] %vm747_vm4, %v5196_v46  ;;  %v5203_v28 = vmax.f32 %v5189_v29, %v1676_v48  ;;  %1741 = vperm.xlu0 %3709, %v5196_v46   ;;  %v3744_v48 = vld [vmem:[%s4583_s28 + $0x18] sm:$0xff]  }
 0x6c1   : > { %2037 = vst.msk [vmem:[#allocation2 + $0x90] sm:$0xff] %vm747_vm4, %v5203_v28  ;;  %1736 = vperm.xlu1 %3710, %v5203_v28  }
 0x6c2   : > { %v1685_v30 = vpop.xlane.xlu1 %1684  ;;  %v1682_v11 = vpop.xlane.xlu0 %1681 }
 0x6c3   : > { %1932 = vrot.lane.b32.xlu0 %v3743_v6, %s4226_s5  ;;  %v5219_v16 = vmax.f32 %v5207_v18, %v1685_v30  ;;  %v5222_v26 = vmax.f32 %v5209_v20, %v1682_v11  ;;  %v3745_v6 = vld [vmem:[%s4583_s28] sm:$0xff]   ;;  %v3746_v20 = vld [vmem:[%s4583_s28 + $0x10] sm:$0xff]   ;;  %v3752_v30 = vld [vmem:[%s4569_s7 + $0x18] sm:$0xff]  }
 0x6c5   : > { %6044 = vst [vmem:[#allocation57_spill] sm:$0xff] %v5222_v26  ;;  %1731 = vperm.xlu1 %3710, %v5186_v62   ;;  %2040 = vst.msk [vmem:[#allocation2 + $0xa8] sm:$0xff] %vm747_vm4, %v5219_v16 }
 0x6c6   : > { %2039 = vst.msk [vmem:[#allocation2 + $0xa0] sm:$0xff] %vm747_vm4, %v5222_v26  ;;  %v1691_v11 = vpop.xlane.xlu1 %1690  ;;  %v1688_v35 = vpop.xlane.xlu0 %1687 }
 0x6c7   : > { %1936 = vrot.lane.b32.xlu0 %v3744_v48, %s4226_s5  ;;  %v5240_v62 = vmax.f32 %v5224_v33, %v1691_v11  ;;  %v5243_v22 = vmax.f32 %v5226_v4, %v1688_v35  ;;  %v3747_v35 = vld [vmem:[%s4577_s25 + $0x8] sm:$0xff]   ;;  %v3749_v11 = vld [vmem:[%s4577_s25] sm:$0xff]   ;;  %v708_v4 = vunpack.c.h.bf16 %v4906_v44 }
 0x6c8   : > { %v3750_v48 = vld [vmem:[%s4569_s7 + $0x8] sm:$0xff]  }
 0x6c9   : > { %6046 = vst [vmem:[#allocation59_spill] sm:$0xff] %v5243_v22  ;;  %1930 = vrot.lane.b32.xlu1 %v3745_v6, %s4226_s5  ;;  %2042 = vst.msk [vmem:[#allocation2 + $0xb8] sm:$0xff] %vm747_vm4, %v5240_v62  ;;  %v3748_v6 = vld [vmem:[%s4577_s25 + $0x18] sm:$0xff]  }
 0x6ca   : > { %2041 = vst.msk [vmem:[#allocation2 + $0xb0] sm:$0xff] %vm747_vm4, %v5243_v22 }
 0x6cb   : > { %1751 = vperm.xlu0 %3709, %v5219_v16  }
 0x6cd   : > { %1934 = vrot.lane.b32.xlu1 %v3746_v20, %s4226_s5  ;;  %v3751_v20 = vld [vmem:[%s4577_s25 + $0x10] sm:$0xff]  }
 0x6cf   : > { %1761 = vperm.xlu0 %3709, %v5240_v62  }
 0x6d1   : > { %1756 = vperm.xlu1 %3710, %v5243_v22   ;;  %v3753_v22 = vld [vmem:[%s4569_s7] sm:$0xff]  }
 0x6d3   : > { %2117 = vrot.lane.b32.xlu0 %v3747_v35, %s4227_s3  ;;  %v3754_v35 = vld [vmem:[%s4569_s7 + $0x10] sm:$0xff]  }
 0x6d5   : > { %1746 = vperm.xlu1 %3710, %v5222_v26   ;;  %v711_v26 = vunpack.c.l.bf16 %v4921_v61 }
 0x6d7   : > { %2121 = vrot.lane.b32.xlu0 %v3748_v6, %s4227_s3  ;;  %v718_v6 = vsel %vm570_vm3, %v708_v4, 0.0 }
 0x6d9   : > { %2115 = vrot.lane.b32.xlu1 %v3749_v11, %s4227_s3  ;;  %v709_v11 = vunpack.c.l.bf16 %v4912_v50 }
 0x6db   : > { %2089 = vrot.lane.b32.xlu0 %v3750_v48, %s4227_s3  ;;  %v721_v48 = vsel %vm570_vm3, %v709_v11, 0.0 }
 0x6dd   : > { %2119 = vrot.lane.b32.xlu1 %v3751_v20, %s4227_s3  ;;  %v707_v20 = vunpack.c.l.bf16 %v4906_v44 }
 0x6df   : > { %2093 = vrot.lane.b32.xlu0 %v3752_v30, %s4227_s3  ;;  %v727_v30 = vsel %vm570_vm3, %v711_v26, 0.0 }
 0x6e1   : > { %2087 = vrot.lane.b32.xlu1 %v3753_v22, %s4227_s3  ;;  %v715_v22 = vsel %vm570_vm3, %v707_v20, 0.0 }
 0x6e5   : > { %2091 = vrot.lane.b32.xlu1 %v3754_v35, %s4227_s3  ;;  %v710_v35 = vunpack.c.h.bf16 %v4912_v50 }
 0x6e7   : > { %v724_v4 = vsel %vm570_vm3, %v710_v35, 0.0 }
 0x6fe   : > { %719 = vadd.xlane.f32.xlu0 %v718_v6  ;;  %v730_v6 = vsel %vm570_vm3, %v712_v21, 0.0 }
 0x702   : > { %722 = vadd.xlane.f32.xlu0 %v721_v48 }
 0x706   : > { %728 = vadd.xlane.f32.xlu0 %v727_v30 }
 0x709   : > { %716 = vadd.xlane.f32.xlu1 %v715_v22 }
 0x70d   : > { %725 = vadd.xlane.f32.xlu1 %v724_v4 }
 0x711   : > { %731 = vadd.xlane.f32.xlu1 %v730_v6 }
 0x73a   : > { %v1727_v11 = vpop.permute.xlu0 %1726 }
 0x73b   : > { %v1764_v50 = vsub.f32 %v5142_v19, %v1727_v11 }
 0x73e   : > { %v1742_v48 = vpop.permute.xlu0 %1741 }
 0x73f   : > { %v1767_v44 = vsub.f32 %v5144_v49, %v1742_v48 }
 0x740   : > { %v1737_v25 = vpop.permute.xlu1 %1736 }
 0x741   : > { %v1766_v26 = vsub.f32 %v5140_v15, %v1737_v25 }
 0x742   : > { %v1933_v30 = vpop.permute.xlu0 %1932 }
 0x743   : > { %v1773_v20 = vpack.c.bf16 %v1767_v44, %v1766_v26 }
 0x744   : > { %v1732_v13 = vpop.permute.xlu1 %1731 }
 0x745   : > { %v1765_v22 = vsub.f32 %v5148_v58, %v1732_v13  ;;  %v1780_v12 = vmul.bf16 1069105081, %v1773_v20 }
 0x746   : > { %v1937_v35 = vpop.permute.xlu0 %1936 }
 0x747   : > { %v1772_v61 = vpack.c.bf16 %v1765_v22, %v1764_v50 }
 0x748   : > { %v1931_v4 = vpop.permute.xlu1 %1930 }
 0x749   : > { %v1777_v21 = vmul.bf16 1069105081, %v1772_v61  ;;  %3504 = vmatprep.subr.bf16.mxu1 %v1931_v4 }
 0x74a   : > { %v1752_v6 = vpop.permute.xlu0 %1751  ;;  %3505 = vmatpush3.bf16.msra.mxu1 %v1931_v4 }
 0x74b   : > { %3775 = vpow.bf16 %v1777_v21  ;;  %3506 = vmatprep.subr.bf16.mxu1 %v1933_v30  ;;  %v1769_v48 = vsub.f32 %v5164_v42, %v1752_v6 }
 0x74c   : > { %v1935_v49 = vpop.permute.xlu1 %1934  ;;  %3777 = vpow.bf16 %v1780_v12 }
 0x74e   : > { %v1762_v25 = vpop.permute.xlu0 %1761  ;;  %3507 = vmatpush3.bf16.msra.mxu1 %v1933_v30 }
 0x74f   : > { %3508 = vmatprep.subr.bf16.mxu1 %v1935_v49  ;;  %v1771_v19 = vsub.f32 %v5160_v56, %v1762_v25  ;;  %v6047_v25 = vsub.f32 %v4817_v39, %v4829_v45  ;;  %v6050_v39 = vsub.f32 %v4802_v32, %v4808_v36  ;;  %v6052_v32 = vsub.f32 %v4844_v51, %v4857_v57 }
 0x750   : > { %v1757_v15 = vpop.permute.xlu1 %1756 }
 0x751   : > { %v1770_v13 = vsub.f32 %v5156_v40, %v1757_v15  ;;  %v613_v15 = vmul.f32 1.442695, %v6047_v25  ;;  %v611_v45 = vmul.f32 1.442695, %v6050_v39  ;;  %v621_v36 = vmul.f32 1.442695, %v6052_v32 }
 0x752   : > { %3509 = vmatpush3.bf16.msra.mxu1 %v1935_v49  ;;  %v2118_v42 = vpop.permute.xlu0 %2117 }
 0x753   : > { %v1775_v58 = vpack.c.bf16 %v1771_v19, %v1770_v13  ;;  %3510 = vmatprep.subr.bf16.mxu1 %v1937_v35  ;;  %v2139_v22 = vsel %vm472_vm2, %v2118_v42, 0 }
 0x754   : > { %v1747_v11 = vpop.permute.xlu1 %1746 }
 0x755   : > { %v1768_v44 = vsub.f32 %v5158_v27, %v1747_v11  ;;  %v1786_v56 = vmul.bf16 1069105081, %v1775_v58  ;;  %v6048_v58 = vsub.f32 %v4800_v31, %v4805_v34  ;;  %v692_v34 = vld [vmem:[#allocation3 + $0x8] sm:$0xff] }
 0x756   : > { %v5296_v26 = vpop.eup %3775  ;;  %3511 = vmatpush3.bf16.msra.mxu1 %v1937_v35  ;;  %v2122_v6 = vpop.permute.xlu0 %2121 }
 0x757   : > { %v1774_v12 = vpack.c.bf16 %v1769_v48, %v1768_v44  ;;  %3512 = vmatprep.mubr.msk.bf16.mxu1 %vm570_vm3, %v5296_v26  ;;  %v5300_v30 = vpop.eup %3777  ;;  %v2145_v49 = vsel %vm472_vm2, %v2122_v6, 0  ;;  %v615_v11 = vmul.f32 1.442695, %v6048_v58  ;;  %v6049_v48 = vsub.f32 %v4835_v47, %v4848_v53 }
 0x758   : > { %v2116_v20 = vpop.permute.xlu1 %2115 }
 0x759   : > { %v1783_v40 = vmul.bf16 1069105081, %v1774_v12  ;;  %3513 = vmatmul.mubr.msk.bf16.vlgmr.msra.gmra.mrb[16].mxu1 %vm570_vm3, %v5300_v30  ;;  %3564 = vmatprep.subr.msk.bf16.mxu1 %vm472_vm2, %v2116_v20  ;;  %v2136_v27 = vsel %vm472_vm2, %v2116_v20, 0  ;;  %v619_v44 = vmul.f32 1.442695, %v6049_v48 }
 0x75a   : > { %v2090_v19 = vpop.permute.xlu0 %2089 }
 0x75b   : > { %3779 = vpow.bf16 %v1783_v40 }
 0x75c   : > { %3781 = vpow.bf16 %v1786_v56  ;;  %v2120_v50 = vpop.permute.xlu1 %2119  ;;  %v6051_v56 = vsub.f32 %v4810_v37, %v4826_v43  ;;  %v695_v43 = vld [vmem:[#allocation3 + $0x20] sm:$0xff] }
 0x75d   : > { %v2142_v21 = vsel %vm472_vm2, %v2120_v50, 0  ;;  %3783 = vpow2.f32 %v613_v15 }
 0x75e   : > { %3785 = vpow2.f32 %v615_v11  ;;  %v2094_v12 = vpop.permute.xlu0 %2093  ;;  %v617_v20 = vmul.f32 1.442695, %v6051_v56 }
 0x75f   : > { %3521 = vmatpush3.bf16.xpose.msra.mxu1 %v2136_v27  ;;  %3787 = vpow2.f32 %v619_v44  ;;  %v693_v27 = vld [vmem:[#allocation3 + $0x10] sm:$0xff] }
 0x760   : > { %3565 = vmatprep.subr.msk.bf16.mxu1 %vm472_vm2, %v2118_v42  ;;  %v2088_v61 = vpop.permute.xlu1 %2087  ;;  %3789 = vpow2.f32 %v611_v45 }
 0x761   : > { %3791 = vpow2.f32 %v617_v20 }
 0x762   : > { %3793 = vpow2.f32 %v621_v36 }
 0x764   : > { %v2092_v13 = vpop.permute.xlu1 %2091 }
 0x766   : > { %v5308_v35 = vpop.eup %3779 }
 0x767   : > { %v5310_v4 = vpop.eup %3781  ;;  %3516 = vmatprep.mubr.msk.bf16.mxu1 %vm570_vm3, %v5308_v35  ;;  %3523 = vmatpush3.bf16.xpose.msra.mxu1 %v2139_v22 }
 0x768   : > { %3517 = vmatmul.mubr.msk.bf16.gmra.mrb[20].mxu1 %vm570_vm3, %v5310_v4  ;;  %3566 = vmatprep.subr.msk.bf16.mxu1 %vm472_vm2, %v2120_v50  ;;  %v5336_v31 = vpop.eup %3783 }
 0x769   : > { %3528 = vmatprep.mubr.msk.bf16.mxu1 %vm472_vm2, %v2088_v61  ;;  %v700_v40 = vmul.f32 %v5336_v31, %v692_v34  ;;  %v5342_v47 = vpop.eup %3785 }
 0x76a   : > { %v701_v50 = vmul.f32 %v5342_v47, %v693_v27  ;;  %v5349_v22 = vpop.eup %3787 }
 0x76f   : > { %3525 = vmatpush3.bf16.xpose.msra.mxu1 %v2142_v21  ;;  %v5351_v21 = vpop.eup %3789 }
 0x770   : > { %3567 = vmatprep.subr.msk.bf16.mxu1 %vm472_vm2, %v2122_v6  ;;  %v703_v6 = vmul.f32 %v5349_v22, %v695_v43  ;;  %v3792_v15 = vpop.eup %3791 }
 0x771   : > { %v3794_v48 = vpop.eup %3793 }
 0x777   : > { %3527 = vmatpush3.bf16.xpose.msra.mxu1 %v2145_v49  ;;  %v691_v49 = vld [vmem:[#allocation3] sm:$0xff] }
 0x778   : > { %v699_v25 = vmul.f32 %v5351_v21, %v691_v49 }
 0x77e   : > { %3529 = vmatmul.mubr.msk.bf16.vlgmr.msra.gmra.mrb[24].mxu1 %vm472_vm2, %v2090_v19 }
 0x77f   : > { %3532 = vmatprep.mubr.msk.bf16.mxu1 %vm472_vm2, %v2092_v13  ;;  %v694_v13 = vld [vmem:[#allocation3 + $0x18] sm:$0xff] }
 0x780   : > { %v702_v11 = vmul.f32 %v3792_v15, %v694_v13 }
 0x786   : > { %3533 = vmatmul.mubr.msk.bf16.gmra.mrb[28].mxu1 %vm472_vm2, %v2094_v12  ;;  %v696_v12 = vld [vmem:[#allocation3 + $0x28] sm:$0xff] }
 0x787   : > { %v704_v45 = vmul.f32 %v3794_v48, %v696_v12 }
 0x78b   : > { %v720_v53 = vpop.xlane.xlu0 %719 }
 0x78c   : > { %v740_v42 = vadd.f32 %v720_v53, %v700_v40 }
 0x78e   : > { %749 = vst.msk [vmem:[#allocation3 + $0x8] sm:$0xff] %vm747_vm4, %v740_v42 }
 0x78f   : > { %v723_v37 = vpop.xlane.xlu0 %722 }
 0x790   : > { %v741_v61 = vadd.f32 %v723_v37, %v701_v50 }
 0x792   : > { %750 = vst.msk [vmem:[#allocation3 + $0x10] sm:$0xff] %vm747_vm4, %v741_v61 }
 0x793   : > { %v729_v51 = vpop.xlane.xlu0 %728 }
 0x794   : > { %v743_v57 = vadd.f32 %v729_v51, %v703_v6 }
 0x796   : > { %752 = vst.msk [vmem:[#allocation3 + $0x20] sm:$0xff] %vm747_vm4, %v743_v57  ;;  %v717_v19 = vpop.xlane.xlu1 %716 }
 0x797   : > { %v739_v58 = vadd.f32 %v717_v19, %v699_v25 }
 0x799   : > { %748 = vst.msk [vmem:[#allocation3] sm:$0xff] %vm747_vm4, %v739_v58 }
 0x79a   : > { %v726_v44 = vpop.xlane.xlu1 %725 }
 0x79b   : > { %v742_v39 = vadd.f32 %v726_v44, %v702_v11 }
 0x79d   : > { %751 = vst.msk [vmem:[#allocation3 + $0x18] sm:$0xff] %vm747_vm4, %v742_v39 }
 0x79e   : > { %v732_v34 = vpop.xlane.xlu1 %731 }
 0x79f   : > { %v744_v56 = vadd.f32 %v732_v34, %v704_v45  ;;  %v713_v45 = vunpack.c.l.bf16 %v4923_v3 }
 0x7a1   : > { %753 = vst.msk [vmem:[#allocation3 + $0x28] sm:$0xff] %vm747_vm4, %v744_v56  ;;  %v714_v56 = vunpack.c.h.bf16 %v4923_v3 }
 0x82c   : > { %v5360_v20 = vpop.f32.mrb[16].mxu1 }
 0x82d   : > { %v5362_v40 = vpop.f32.mrb[17].mxu1 }
 0x82e   : > { %v5364_v53 = vpop.f32.mrb[18].mxu1 }
 0x82f   : > { %v5366_v27 = vpop.f32.mrb[19].mxu1 }
 0x83b   : > { %v5368_v32 = vpop.f32.mrb[20].mxu1 }
 0x83c   : > { %v5370_v36 = vpop.f32.mrb[21].mxu1 }
 0x83d   : > { %v5372_v42 = vpop.f32.mrb[22].mxu1 }
 0x83e   : > { %v5374_v50 = vpop.f32.mrb[23].mxu1 }
 0x851   : > { %v5376_v37 = vpop.f32.mrb[24].mxu1 }
 0x852   : > { %v5378_v43 = vpop.f32.mrb[25].mxu1  ;;  %v2227_v61 = vsel %vm570_vm3, %v5376_v37, -inf }
 0x853   : > { %2228 = vmax.xlane.f32.xlu0 %v2227_v61  ;;  %v5382_v6 = vpop.f32.mrb[26].mxu1  ;;  %v2221_v57 = vsel %vm570_vm3, %v5378_v43, -inf  ;;  %v733_v61 = vsel %vm570_vm3, %v713_v45, 0.0  ;;  %v1254_v45 = vunpack.c.l.bf16 %v5100_v38 }
 0x854   : > { %v5384_v49 = vpop.f32.mrb[27].mxu1  ;;  %v2230_v19 = vsel %vm570_vm3, %v5382_v6, -inf }
 0x855   : > { %v2224_v51 = vsel %vm570_vm3, %v5384_v49, -inf }
 0x856   : > { %2225 = vmax.xlane.f32.xlu1 %v2224_v51  ;;  %v736_v51 = vsel %vm570_vm3, %v714_v56, 0.0  ;;  %v1258_v56 = vunpack.c.l.bf16 %v5110_v54 }
 0x857   : > { %2222 = vmax.xlane.f32.xlu0 %v2221_v57  ;;  %v1252_v57 = vunpack.c.l.bf16 %v5096_v59 }
 0x859   : > { %v5390_v25 = vpop.f32.mrb[28].mxu1 }
 0x85a   : > { %2231 = vmax.xlane.f32.xlu1 %v2230_v19  ;;  %v5394_v13 = vpop.f32.mrb[29].mxu1  ;;  %v2239_v58 = vsel %vm570_vm3, %v5390_v25, -inf  ;;  %v1260_v19 = vsel %vm570_vm3, %v1252_v57, 0.0  ;;  %v6054_v57 = vsub.f32 %v4850_v55, %v4870_v63  ;;  %v6057_v55 = vsub.f32 %v4991_v0, %v5008_v10 }
 0x85b   : > { %2240 = vmax.xlane.f32.xlu0 %v2239_v58  ;;  %v5398_v11 = vpop.f32.mrb[30].mxu1  ;;  %v2233_v12 = vsel %vm570_vm3, %v5394_v13, -inf  ;;  %v6053_v58 = vsub.f32 %v4862_v60, %v4877_v2  ;;  %v1278_v60 = vsel %vm570_vm3, %v1258_v56, 0.0  ;;  %v1806_v2 = vunpack.c.h.bf16 %v5296_v26 }
 0x85c   : > { %v5400_v44 = vpop.f32.mrb[31].mxu1  ;;  %v2242_v34 = vsel %vm570_vm3, %v5398_v11, -inf  ;;  %v1161_v63 = vmul.f32 1.442695, %v6057_v55 }
 0x85d   : > { %v2236_v39 = vsel %vm570_vm3, %v5400_v44, -inf }
 0x85e   : > { %2237 = vmax.xlane.f32.xlu1 %v2236_v39  ;;  %v3755_v39 = vld [vmem:[%s4583_s28 + $0x8] sm:$0xff]  }
 0x85f   : > { %2234 = vmax.xlane.f32.xlu0 %v2233_v12  ;;  %v625_v12 = vmul.f32 1.442695, %v6053_v58  ;;  %v6055_v58 = vsub.f32 %v4984_v24, %v4989_v23  ;;  %v6058_v24 = vsub.f32 %v5019_v17, %v5031_v7  ;;  %v6061_v7 = vsub.f32 %v5189_v29, %v5203_v28 }
 0x860   : > { %v6063_v28 = vsub.f32 %v5207_v18, %v5219_v16  ;;  %v6064_v16 = vsub.f32 %v5224_v33, %v5240_v62 }
 0x861   : > { %3795 = vpow2.f32 %v625_v12  ;;  %v1155_v12 = vmul.f32 1.442695, %v6055_v58  ;;  %v1165_v23 = vmul.f32 1.442695, %v6058_v24 }
 0x862   : > { %2243 = vmax.xlane.f32.xlu1 %v2242_v34  ;;  %v1266_v34 = vsel %vm570_vm3, %v1254_v45, 0.0  ;;  %v1718_v29 = vmul.f32 1.442695, %v6063_v28  ;;  %v1722_v18 = vmul.f32 1.442695, %v6064_v16  ;;  %v5522_v28 = vld [vmem:[#allocation2 + $0xf8] sm:$0xff] }
 0x863   : > { %734 = vadd.xlane.f32.xlu0 %v733_v61  ;;  %v1811_v61 = vunpack.c.l.bf16 %v5310_v4 }
 0x866   : > { %737 = vadd.xlane.f32.xlu1 %v736_v51  ;;  %v1831_v51 = vsel %vm570_vm3, %v1811_v61, 0.0 }
 0x86a   : > { %1261 = vadd.xlane.f32.xlu1 %v1260_v19  ;;  %v623_v19 = vmul.f32 1.442695, %v6054_v57 }
 0x86b   : > { %v5420_v3 = vpop.eup %3795 }
 0x86c   : > { %3797 = vpow2.f32 %v623_v19  ;;  %v2216_v19 = vld [vmem:[#allocation2 + $0xd8] sm:$0xff] }
 0x86d   : > { %3799 = vpow2.f32 %v1155_v12  ;;  %v5500_v12 = vld [vmem:[#allocation2 + $0xf0] sm:$0xff] }
 0x879   : > { %766 = vperm.xlu0 %3709, %v5351_v21   ;;  %v1816_v21 = vsel %vm570_vm3, %v1806_v2, 0.0 }
 0x87b   : > { %2485 = vrot.lane.b32.xlu1 %v3755_v39, %s4227_s3  ;;  %v6056_v39 = vsub.f32 %v5001_v8, %v5015_v41  ;;  %v6059_v8 = vsub.f32 %v5036_v9, %v5052_v1  ;;  %v6060_v41 = vsub.f32 %v5172_v52, %v5177_v14  ;;  %v6062_v9 = vsub.f32 %v5179_v5, %v5196_v46  ;;  %v2215_v52 = vld [vmem:[#allocation2 + $0xd0] sm:$0xff] }
 0x87d   : > { %781 = vperm.xlu0 %3709, %v3792_v15   ;;  %v1809_v15 = vunpack.c.l.bf16 %v5308_v35  ;;  %v1159_v45 = vmul.f32 1.442695, %v6056_v39  ;;  %v1169_v0 = vmul.f32 1.442695, %v6059_v8  ;;  %v1714_v56 = vmul.f32 1.442695, %v6062_v9 }
 0x87e   : > { %v5510_v8 = vld [vmem:[#allocation2 + $0xe0] sm:$0xff]  ;;  %v697_v9 = vld [vmem:[#allocation3 + $0x30] sm:$0xff] }
 0x87f   : > { %3801 = vpow2.f32 %v1159_v45 }
 0x880   : > { %3803 = vpow2.f32 %v1161_v63 }
 0x881   : > { %791 = vperm.xlu0 %3709, %v3794_v48   ;;  %v1825_v48 = vsel %vm570_vm3, %v1809_v15, 0.0  ;;  %3805 = vpow2.f32 %v1165_v23  ;;  %v2213_v15 = vld [vmem:[#allocation2 + $0xc0] sm:$0xff]  ;;  %v2218_v23 = vld [vmem:[#allocation2 + $0xe8] sm:$0xff] }
 0x882   : > { %3807 = vpow2.f32 %v1169_v0 }
 0x885   : > { %801 = vperm.xlu0 %3709, %v5420_v3  }
 0x89f   : > { %1267 = vadd.xlane.f32.xlu1 %v1266_v34  ;;  %v1712_v34 = vmul.f32 1.442695, %v6061_v7 }
 0x8a3   : > { %1279 = vadd.xlane.f32.xlu1 %v1278_v60 }
 0x8a7   : > { %1817 = vadd.xlane.f32.xlu1 %v1816_v21  ;;  %v5484_v21 = vld [vmem:[#allocation2 + $0xc8] sm:$0xff] }
 0x8ab   : > { %1826 = vadd.xlane.f32.xlu1 %v1825_v48 }
 0x8af   : > { %1832 = vadd.xlane.f32.xlu1 %v1831_v51 }
 0x8c0   : > { %771 = vperm.xlu1 %3710, %v5336_v31   ;;  %v5448_v31 = vpop.eup %3797 }
 0x8c4   : > { %776 = vperm.xlu1 %3710, %v5342_v47   ;;  %v5454_v47 = vpop.eup %3799 }
 0x8c5   : > { %v5460_v10 = vpop.eup %3801 }
 0x8c6   : > { %v5466_v17 = vpop.eup %3803 }
 0x8c7   : > { %v5472_v1 = vpop.eup %3805 }
 0x8c8   : > { %786 = vperm.xlu1 %3710, %v5349_v22   ;;  %v1708_v22 = vmul.f32 1.442695, %v6060_v41  ;;  %v5478_v14 = vpop.eup %3807 }
 0x8ca   : > { %3809 = vpow2.f32 %v1708_v22 }
 0x8cb   : > { %3811 = vpow2.f32 %v1712_v34 }
 0x8cc   : > { %796 = vperm.xlu1 %3710, %v5448_v31   ;;  %3813 = vpow2.f32 %v1714_v56 }
 0x8cd   : > { %3815 = vpow2.f32 %v1718_v29 }
 0x8ce   : > { %3817 = vpow2.f32 %v1722_v18 }
 0x8d0   : > { %1311 = vperm.xlu1 %3710, %v5454_v47  }
 0x8d4   : > { %1321 = vperm.xlu1 %3710, %v5460_v10   ;;  %v5486_v48 = vpop.eup %3809 }
 0x8d5   : > { %v5502_v39 = vpop.eup %3811 }
 0x8d6   : > { %v5512_v0 = vpop.eup %3813 }
 0x8d7   : > { %v5525_v29 = vpop.eup %3815 }
 0x8d8   : > { %1326 = vperm.xlu1 %3710, %v5466_v17  }
 0x8dc   : > { %1336 = vperm.xlu1 %3710, %v5472_v1  }
 0x8e0   : > { %v2229_v60 = vpop.xlane.xlu0 %2228  ;;  %1346 = vperm.xlu1 %3710, %v5478_v14  }
 0x8e1   : > { %v2247_v2 = vmax.f32 %v2215_v52, %v2229_v60 }
 0x8e3   : > { %2590 = vst.msk [vmem:[#allocation2 + $0xd0] sm:$0xff] %vm747_vm4, %v2247_v2  ;;  %2289 = vperm.xlu0 %3709, %v2247_v2   ;;  %v2226_v5 = vpop.xlane.xlu1 %2225  ;;  %v2255_v51 = vsub.f32 %v2215_v52, %v2247_v2 }
 0x8e4   : > { %v5490_v46 = vmax.f32 %v5484_v21, %v2226_v5  ;;  %v2223_v61 = vpop.xlane.xlu0 %2222  ;;  %1864 = vperm.xlu1 %3710, %v5486_v48   ;;  %v705_v5 = vmul.f32 %v5448_v31, %v697_v9  ;;  %v5542_v31 = vpop.eup %3817 }
 0x8e5   : > { %v2245_v57 = vmax.f32 %v2213_v15, %v2223_v61  ;;  %v2265_v62 = vmul.f32 1.442695, %v2255_v51  ;;  %v698_v61 = vld [vmem:[#allocation3 + $0x38] sm:$0xff] }
 0x8e6   : > { %v2254_v58 = vsub.f32 %v5484_v21, %v5490_v46  ;;  %2589 = vst.msk [vmem:[#allocation2 + $0xc8] sm:$0xff] %vm747_vm4, %v5490_v46 }
 0x8e7   : > { %2588 = vst.msk [vmem:[#allocation2 + $0xc0] sm:$0xff] %vm747_vm4, %v2245_v57  ;;  %2279 = vperm.xlu0 %3709, %v2245_v57   ;;  %v2232_v45 = vpop.xlane.xlu1 %2231  ;;  %v2253_v63 = vsub.f32 %v2213_v15, %v2245_v57  ;;  %3819 = vpow2.f32 %v2265_v62  ;;  %v1236_v62 = vld [vmem:[#allocation3 + $0x40] sm:$0xff] }
 0x8e8   : > { %v2248_v55 = vmax.f32 %v2216_v19, %v2232_v45  ;;  %v2241_v33 = vpop.xlane.xlu0 %2240  ;;  %1874 = vperm.xlu1 %3710, %v5502_v39  }
 0x8e9   : > { %v5507_v24 = vmax.f32 %v5500_v12, %v2241_v33  ;;  %v2261_v56 = vmul.f32 1.442695, %v2253_v63 }
 0x8ea   : > { %2591 = vst.msk [vmem:[#allocation2 + $0xd8] sm:$0xff] %vm747_vm4, %v2248_v55  ;;  %v2256_v52 = vsub.f32 %v2216_v19, %v2248_v55 }
 0x8eb   : > { %2594 = vst.msk [vmem:[#allocation2 + $0xf0] sm:$0xff] %vm747_vm4, %v5507_v24  ;;  %2294 = vperm.xlu0 %3709, %v2248_v55   ;;  %v2238_v22 = vpop.xlane.xlu1 %2237  ;;  %3821 = vpow2.f32 %v2261_v56  ;;  %v706_v55 = vmul.f32 %v5420_v3, %v698_v61 }
 0x8ec   : > { %v2250_v7 = vmax.f32 %v2218_v23, %v2238_v22  ;;  %v2235_v34 = vpop.xlane.xlu0 %2234  ;;  %1879 = vperm.xlu1 %3710, %v5512_v0   ;;  %v2267_v51 = vmul.f32 1.442695, %v2256_v52  ;;  %v1244_v22 = vmul.f32 %v5454_v47, %v1236_v62 }
 0x8ed   : > { %v5520_v60 = vmax.f32 %v5510_v8, %v2235_v34  ;;  %v756_v34 = vld [vmem:[#allocation4] sm:$0xff] }
 0x8ee   : > { %2593 = vst.msk [vmem:[#allocation2 + $0xe8] sm:$0xff] %vm747_vm4, %v2250_v7  ;;  %v2258_v57 = vsub.f32 %v2218_v23, %v2250_v7  ;;  %3823 = vpow2.f32 %v2267_v51 }
 0x8ef   : > { %v2257_v2 = vsub.f32 %v5510_v8, %v5520_v60  ;;  %2592 = vst.msk [vmem:[#allocation2 + $0xe0] sm:$0xff] %vm747_vm4, %v5520_v60  ;;  %2284 = vperm.xlu0 %3709, %v5490_v46   ;;  %v2244_v15 = vpop.xlane.xlu1 %2243 }
 0x8f0   : > { %v5534_v16 = vmax.f32 %v5522_v28, %v2244_v15  ;;  %v735_v18 = vpop.xlane.xlu0 %734  ;;  %1889 = vperm.xlu1 %3710, %v5525_v29   ;;  %v2271_v23 = vmul.f32 1.442695, %v2258_v57 }
 0x8f1   : > { %v745_v19 = vadd.f32 %v735_v18, %v705_v5  ;;  %v5549_v9 = vpop.eup %3819  ;;  %v759_v5 = vld [vmem:[#allocation4 + $0x18] sm:$0xff]  ;;  %v6065_v18 = vld [vmem:[#allocation32_spill] sm:$0xff] }
 0x8f2   : > { %v2260_v45 = vsub.f32 %v5522_v28, %v5534_v16  ;;  %2595 = vst.msk [vmem:[#allocation2 + $0xf8] sm:$0xff] %vm747_vm4, %v5534_v16  ;;  %3825 = vpow2.f32 %v2271_v23 }
 0x8f3   : > { %754 = vst.msk [vmem:[#allocation3 + $0x30] sm:$0xff] %vm747_vm4, %v745_v19  ;;  %2309 = vperm.xlu0 %3709, %v5507_v24   ;;  %v738_v33 = vpop.xlane.xlu1 %737  ;;  %v761_v19 = vld [vmem:[#allocation4 + $0x28] sm:$0xff] }
 0x8f4   : > { %v746_v63 = vadd.f32 %v738_v33, %v706_v55  ;;  %1899 = vperm.xlu1 %3710, %v5542_v31   ;;  %v6066_v33 = vld [vmem:[#allocation33_spill] sm:$0xff] }
 0x8f5   : > { %v5554_v61 = vpop.eup %3821 }
 0x8f6   : > { %755 = vst.msk [vmem:[#allocation3 + $0x38] sm:$0xff] %vm747_vm4, %v746_v63  ;;  %v3756_v63 = vld [vmem:[%s4583_s28] sm:$0xff]  }
 0x8f7   : > { %2299 = vperm.xlu0 %3709, %v5520_v60   ;;  %v1262_v3 = vpop.xlane.xlu1 %1261 }
 0x8f8   : > { %v1284_v56 = vadd.f32 %v1262_v3, %v1244_v22  ;;  %v767_v52 = vpop.permute.xlu0 %766  ;;  %2427 = vperm.xlu1 %3710, %v5549_v9   ;;  %v5560_v55 = vpop.eup %3823 }
 0x8f9   : > { %v804_v15 = vmul.f32 %v767_v52, %v756_v34  ;;  %v763_v34 = vld [vmem:[#allocation4 + $0x38] sm:$0xff] }
 0x8fa   : > { %1292 = vst.msk [vmem:[#allocation3 + $0x40] sm:$0xff] %vm747_vm4, %v1284_v56  ;;  %v6067_v56 = vld [vmem:[#allocation38_spill] sm:$0xff] }
 0x8fb   : > { %v913_v47 = vadd.f32 %v6065_v18, %v804_v15  ;;  %2314 = vperm.xlu0 %3709, %v5534_v16   ;;  %v3757_v15 = vld [vmem:[%s4583_s28 + $0x10] sm:$0xff]  }
 0x8fc   : > { %v782_v51 = vpop.permute.xlu0 %781  ;;  %2417 = vperm.xlu1 %3710, %v5554_v61   ;;  %v5566_v3 = vpop.eup %3825  ;;  %v6068_v18 = vld [vmem:[#allocation37_spill] sm:$0xff] }
 0x8fd   : > { %921 = vst.msk [vmem:[#allocation4] sm:$0xff] %vm472_vm2, %v913_v47  ;;  %v807_v57 = vmul.f32 %v782_v51, %v759_v5  ;;  %v3758_v51 = vld [vmem:[%s4583_s28 + $0x18] sm:$0xff]  }
 0x8ff   : > { %v916_v62 = vadd.f32 %v6066_v33, %v807_v57  ;;  %2304 = vperm.xlu0 %3709, %v2250_v7   ;;  %v6069_v57 = vld [vmem:[#allocation43_spill] sm:$0xff] }
 0x900   : > { %v792_v23 = vpop.permute.xlu0 %791  ;;  %2432 = vperm.xlu1 %3710, %v5560_v55  }
 0x901   : > { %924 = vst.msk [vmem:[#allocation4 + $0x18] sm:$0xff] %vm472_vm2, %v916_v62  ;;  %v809_v22 = vmul.f32 %v792_v23, %v761_v19  ;;  %v6070_v19 = vld [vmem:[#allocation44_spill] sm:$0xff]  ;;  %v6073_v23 = vld [vmem:[#allocation55_spill] sm:$0xff] }
 0x902   : > { %v6071_v33 = vsub.f32 %v6069_v57, %v6070_v19  ;;  %v1255_v57 = vunpack.c.h.bf16 %v5100_v38  ;;  %v6078_v19 = vld [vmem:[#allocation58_spill] sm:$0xff] }
 0x903   : > { %v918_v52 = vadd.f32 %v6067_v56, %v809_v22  ;;  %2483 = vrot.lane.b32.xlu0 %v3756_v63, %s4227_s3  ;;  %v6072_v63 = vld [vmem:[#allocation54_spill] sm:$0xff] }
 0x904   : > { %v802_v5 = vpop.permute.xlu0 %801  ;;  %2442 = vperm.xlu1 %3710, %v5566_v3   ;;  %v1167_v62 = vmul.f32 1.442695, %v6071_v33  ;;  %v6074_v22 = vsub.f32 %v6072_v63, %v6073_v23  ;;  %v6079_v33 = vld [vmem:[#allocation59_spill] sm:$0xff] }
 0x905   : > { %926 = vst.msk [vmem:[#allocation4 + $0x28] sm:$0xff] %vm472_vm2, %v918_v52  ;;  %v811_v7 = vmul.f32 %v802_v5, %v763_v34  ;;  %v1253_v34 = vunpack.c.h.bf16 %v5096_v59  ;;  %v6075_v52 = vld [vmem:[#allocation56_spill] sm:$0xff]  ;;  %v6076_v5 = vld [vmem:[#allocation57_spill] sm:$0xff] }
 0x906   : > { %3827 = vpow2.f32 %v1167_v62  ;;  %v1710_v56 = vmul.f32 1.442695, %v6074_v22  ;;  %v6080_v62 = vsub.f32 %v6078_v19, %v6079_v33 }
 0x907   : > { %v920_v47 = vadd.f32 %v6068_v18, %v811_v7  ;;  %2487 = vrot.lane.b32.xlu0 %v3757_v15, %s4227_s3  ;;  %v6077_v15 = vsub.f32 %v6075_v52, %v6076_v5  ;;  %v5588_v18 = vpop.permute.xlu1 %2485  ;;  %v1269_v5 = vsel %vm570_vm3, %v1255_v57, 0.0 }
 0x908   : > { %3829 = vpow2.f32 %v1710_v56  ;;  %v1720_v63 = vmul.f32 1.442695, %v6080_v62  ;;  %v1242_v56 = vld [vmem:[#allocation3 + $0x70] sm:$0xff] }
 0x909   : > { %928 = vst.msk [vmem:[#allocation4 + $0x38] sm:$0xff] %vm472_vm2, %v920_v47  ;;  %v1716_v7 = vmul.f32 1.442695, %v6077_v15  ;;  %v1238_v47 = vld [vmem:[#allocation3 + $0x50] sm:$0xff] }
 0x90a   : > { %v1246_v59 = vmul.f32 %v5460_v10, %v1238_v47  ;;  %v6081_v15 = vld [vmem:[#allocation45_spill] sm:$0xff] }
 0x90b   : > { %2489 = vrot.lane.b32.xlu0 %v3758_v51, %s4227_s3  ;;  %v1263_v51 = vsel %vm570_vm3, %v1253_v34, 0.0  ;;  %3831 = vpow2.f32 %v1716_v7  ;;  %v1256_v41 = vunpack.c.l.bf16 %v6081_v15  ;;  %v1257_v19 = vunpack.c.h.bf16 %v6081_v15  ;;  %v1795_v15 = vld [vmem:[#allocation3 + $0xb0] sm:$0xff] }
 0x90c   : > { %3833 = vpow2.f32 %v1720_v63  ;;  %v1793_v63 = vld [vmem:[#allocation3 + $0xa0] sm:$0xff] }
 0x90d   : > { %v1272_v47 = vsel %vm570_vm3, %v1256_v41, 0.0 }
 0x910   : > { %v5596_v23 = vpop.eup %3827 }
 0x911   : > { %v1250_v38 = vmul.f32 %v5596_v23, %v1242_v56  ;;  %v1259_v56 = vunpack.c.h.bf16 %v5110_v54 }
 0x912   : > { %v5602_v34 = vpop.eup %3829 }
 0x915   : > { %v5608_v33 = vpop.eup %3831 }
 0x916   : > { %v1801_v41 = vmul.f32 %v5608_v33, %v1793_v63 }
 0x92a   : > { %1264 = vadd.xlane.f32.xlu0 %v1263_v51  ;;  %v1790_v51 = vld [vmem:[#allocation3 + $0x88] sm:$0xff] }
 0x92b   : > { %v1798_v57 = vmul.f32 %v5602_v34, %v1790_v51  ;;  %v1805_v51 = vunpack.c.l.bf16 %v5296_v26  ;;  %v1808_v26 = vunpack.c.h.bf16 %v5300_v30 }
 0x92c   : > { %v1268_v22 = vpop.xlane.xlu1 %1267 }
 0x92d   : > { %v1286_v52 = vadd.f32 %v1268_v22, %v1246_v59  ;;  %v1275_v22 = vsel %vm570_vm3, %v1257_v19, 0.0  ;;  %v1813_v19 = vsel %vm570_vm3, %v1805_v51, 0.0  ;;  %v1810_v51 = vunpack.c.h.bf16 %v5308_v35 }
 0x92e   : > { %1270 = vadd.xlane.f32.xlu0 %v1269_v5 }
 0x92f   : > { %1294 = vst.msk [vmem:[#allocation3 + $0x50] sm:$0xff] %vm747_vm4, %v1286_v52  ;;  %v5614_v52 = vpop.eup %3833 }
 0x930   : > { %v1280_v7 = vpop.xlane.xlu1 %1279 }
 0x931   : > { %v1290_v10 = vadd.f32 %v1280_v7, %v1250_v38  ;;  %v1281_v7 = vsel %vm570_vm3, %v1259_v56, 0.0  ;;  %v758_v56 = vld [vmem:[#allocation4 + $0x10] sm:$0xff] }
 0x932   : > { %1273 = vadd.xlane.f32.xlu0 %v1272_v47 }
 0x933   : > { %1298 = vst.msk [vmem:[#allocation3 + $0x70] sm:$0xff] %vm747_vm4, %v1290_v10  ;;  %v1803_v10 = vmul.f32 %v5614_v52, %v1795_v15 }
 0x934   : > { %v1818_v62 = vpop.xlane.xlu1 %1817 }
 0x935   : > { %v1838_v59 = vadd.f32 %v1818_v62, %v1798_v57  ;;  %v1807_v57 = vunpack.c.l.bf16 %v5300_v30  ;;  %v757_v62 = vld [vmem:[#allocation4 + $0x8] sm:$0xff] }
 0x936   : > { %1276 = vadd.xlane.f32.xlu0 %v1275_v22 }
 0x937   : > { %1846 = vst.msk [vmem:[#allocation3 + $0x88] sm:$0xff] %vm747_vm4, %v1838_v59  ;;  %v1819_v22 = vsel %vm570_vm3, %v1807_v57, 0.0  ;;  %v1828_v57 = vsel %vm570_vm3, %v1810_v51, 0.0  ;;  %v1303_v51 = vld [vmem:[#allocation4 + $0x50] sm:$0xff] }
 0x938   : > { %v1827_v5 = vpop.xlane.xlu1 %1826 }
 0x939   : > { %v1841_v38 = vadd.f32 %v1827_v5, %v1801_v41  ;;  %v6082_v41 = vld [vmem:[#allocation34_spill] sm:$0xff] }
 0x93a   : > { %1282 = vadd.xlane.f32.xlu0 %v1281_v7  ;;  %v1822_v7 = vsel %vm570_vm3, %v1808_v26, 0.0 }
 0x93b   : > { %1849 = vst.msk [vmem:[#allocation3 + $0xa0] sm:$0xff] %vm747_vm4, %v1841_v38 }
 0x93c   : > { %v1833_v54 = vpop.xlane.xlu1 %1832 }
 0x93d   : > { %v1843_v47 = vadd.f32 %v1833_v54, %v1803_v10  ;;  %v760_v10 = vld [vmem:[#allocation4 + $0x20] sm:$0xff] }
 0x93e   : > { %1814 = vadd.xlane.f32.xlu0 %v1813_v19  ;;  %v6083_v54 = vld [vmem:[#allocation31_spill] sm:$0xff] }
 0x93f   : > { %1851 = vst.msk [vmem:[#allocation3 + $0xb0] sm:$0xff] %vm747_vm4, %v1843_v47 }
 0x940   : > { %v772_v63 = vpop.permute.xlu1 %771 }
 0x941   : > { %v805_v59 = vmul.f32 %v772_v63, %v757_v62  ;;  %v1812_v62 = vunpack.c.h.bf16 %v5310_v4  ;;  %v762_v63 = vld [vmem:[#allocation4 + $0x30] sm:$0xff]  ;;  %v6086_v4 = vld [vmem:[#allocation47_spill] sm:$0xff] }
 0x942   : > { %1820 = vadd.xlane.f32.xlu0 %v1819_v22 }
 0x943   : > { %v914_v5 = vadd.f32 %v6082_v41, %v805_v59  ;;  %v6084_v59 = vld [vmem:[#allocation36_spill] sm:$0xff]  ;;  %v1834_v26 = vsel %vm570_vm3, %v1812_v62, 0.0  ;;  %v1301_v41 = vld [vmem:[#allocation4 + $0x40] sm:$0xff]  ;;  %v1304_v62 = vld [vmem:[#allocation4 + $0x58] sm:$0xff] }
 0x944   : > { %v777_v15 = vpop.permute.xlu1 %776 }
 0x945   : > { %922 = vst.msk [vmem:[#allocation4 + $0x8] sm:$0xff] %vm472_vm2, %v914_v5  ;;  %v806_v38 = vmul.f32 %v777_v15, %v758_v56  ;;  %v6085_v5 = vld [vmem:[#allocation35_spill] sm:$0xff] }
 0x946   : > { %1823 = vadd.xlane.f32.xlu0 %v1822_v7 }
 0x947   : > { %v915_v47 = vadd.f32 %v6083_v54, %v806_v38 }
 0x948   : > { %v787_v19 = vpop.permute.xlu1 %786 }
 0x949   : > { %923 = vst.msk [vmem:[#allocation4 + $0x10] sm:$0xff] %vm472_vm2, %v915_v47  ;;  %v808_v30 = vmul.f32 %v787_v19, %v760_v10  ;;  %v6087_v47 = vld [vmem:[#allocation39_spill] sm:$0xff]  ;;  %v6088_v19 = vld [vmem:[#allocation40_spill] sm:$0xff] }
 0x94a   : > { %1829 = vadd.xlane.f32.xlu0 %v1828_v57 }
 0x94b   : > { %v917_v22 = vadd.f32 %v6084_v59, %v808_v30  ;;  %v6089_v30 = vsub.f32 %v6087_v47, %v6088_v19  ;;  %v6090_v59 = vld [vmem:[#allocation46_spill] sm:$0xff] }
 0x94c   : > { %v797_v56 = vpop.permute.xlu1 %796 }
 0x94d   : > { %925 = vst.msk [vmem:[#allocation4 + $0x20] sm:$0xff] %vm472_vm2, %v917_v22  ;;  %v810_v35 = vmul.f32 %v797_v56, %v762_v63  ;;  %v1157_v57 = vmul.f32 1.442695, %v6089_v30 }
 0x94e   : > { %1835 = vadd.xlane.f32.xlu0 %v1834_v26  ;;  %v6092_v26 = vld [vmem:[#allocation42_spill] sm:$0xff] }
 0x94f   : > { %v919_v15 = vadd.f32 %v6085_v5, %v810_v35  ;;  %3835 = vpow2.f32 %v1157_v57  ;;  %v6091_v35 = vld [vmem:[#allocation41_spill] sm:$0xff] }
 0x950   : > { %v1312_v38 = vpop.permute.xlu1 %1311  ;;  %v6093_v5 = vsub.f32 %v6091_v35, %v6092_v26 }
 0x951   : > { %927 = vst.msk [vmem:[#allocation4 + $0x30] sm:$0xff] %vm472_vm2, %v919_v15  ;;  %v1349_v7 = vmul.f32 %v1312_v38, %v1301_v41  ;;  %v1306_v38 = vld [vmem:[#allocation4 + $0x68] sm:$0xff] }
 0x952   : > { %v1163_v41 = vmul.f32 1.442695, %v6093_v5 }
 0x953   : > { %v1466_v10 = vadd.f32 %v6086_v4, %v1349_v7  ;;  %v6094_v7 = vld [vmem:[#allocation48_spill] sm:$0xff] }
 0x954   : > { %v1322_v54 = vpop.permute.xlu1 %1321  ;;  %3837 = vpow2.f32 %v1163_v41  ;;  %v1856_v41 = vld [vmem:[#allocation4 + $0x90] sm:$0xff] }
 0x955   : > { %1474 = vst.msk [vmem:[#allocation4 + $0x40] sm:$0xff] %vm472_vm2, %v1466_v10  ;;  %v1351_v63 = vmul.f32 %v1322_v54, %v1303_v51  ;;  %v1308_v10 = vld [vmem:[#allocation4 + $0x78] sm:$0xff]  ;;  %v6095_v54 = vld [vmem:[#allocation53_spill] sm:$0xff] }
 0x957   : > { %v1468_v22 = vadd.f32 %v6090_v59, %v1351_v63  ;;  %v1854_v59 = vld [vmem:[#allocation4 + $0x80] sm:$0xff] }
 0x958   : > { %v1327_v56 = vpop.permute.xlu1 %1326 }
 0x959   : > { %1476 = vst.msk [vmem:[#allocation4 + $0x50] sm:$0xff] %vm472_vm2, %v1468_v22  ;;  %v1352_v15 = vmul.f32 %v1327_v56, %v1304_v62  ;;  %v5652_v35 = vpop.eup %3835  ;;  %v6096_v62 = vld [vmem:[#allocation52_spill] sm:$0xff] }
 0x95b   : > { %v1469_v4 = vadd.f32 %v6094_v7, %v1352_v15 }
 0x95c   : > { %v1337_v47 = vpop.permute.xlu1 %1336 }
 0x95d   : > { %1477 = vst.msk [vmem:[#allocation4 + $0x58] sm:$0xff] %vm472_vm2, %v1469_v4  ;;  %v1354_v51 = vmul.f32 %v1337_v47, %v1306_v38 }
 0x95e   : > { %v5657_v15 = vpop.eup %3837 }
 0x95f   : > { %v1471_v19 = vadd.f32 %v6095_v54, %v1354_v51  ;;  %v1857_v51 = vld [vmem:[#allocation4 + $0x98] sm:$0xff] }
 0x960   : > { %v1347_v30 = vpop.permute.xlu1 %1346 }
 0x961   : > { %1479 = vst.msk [vmem:[#allocation4 + $0x68] sm:$0xff] %vm472_vm2, %v1471_v19  ;;  %v1356_v57 = vmul.f32 %v1347_v30, %v1308_v10 }
 0x962   : > { %v2290_v63 = vpop.permute.xlu0 %2289 }
 0x963   : > { %v1473_v22 = vadd.f32 %v6096_v62, %v1356_v57  ;;  %v2319_v10 = vsub.f32 %v5376_v37, %v2290_v63  ;;  %v1861_v63 = vld [vmem:[#allocation4 + $0xb8] sm:$0xff] }
 0x964   : > { %1316 = vperm.xlu0 %3709, %v5652_v35   ;;  %v1865_v56 = vpop.permute.xlu1 %1864 }
 0x965   : > { %1481 = vst.msk [vmem:[#allocation4 + $0x78] sm:$0xff] %vm472_vm2, %v1473_v22  ;;  %v1902_v26 = vmul.f32 %v1865_v56, %v1854_v59  ;;  %v1859_v22 = vld [vmem:[#allocation4 + $0xa8] sm:$0xff] }
 0x966   : > { %v2280_v5 = vpop.permute.xlu0 %2279 }
 0x967   : > { %v2019_v38 = vadd.f32 %v5362_v40, %v1902_v26  ;;  %v2263_v40 = vmul.f32 1.442695, %v2254_v58  ;;  %v2317_v56 = vsub.f32 %v5378_v43, %v2280_v5 }
 0x968   : > { %1331 = vperm.xlu0 %3709, %v5657_v15   ;;  %v1875_v7 = vpop.permute.xlu1 %1874 }
 0x969   : > { %2027 = vst.msk [vmem:[#allocation4 + $0x80] sm:$0xff] %vm472_vm2, %v2019_v38  ;;  %v1904_v4 = vmul.f32 %v1875_v7, %v1856_v41  ;;  %3839 = vpow2.f32 %v2263_v40 }
 0x96a   : > { %v2295_v47 = vpop.permute.xlu0 %2294 }
 0x96b   : > { %v2021_v54 = vadd.f32 %v5360_v20, %v1904_v4  ;;  %v2320_v19 = vsub.f32 %v5382_v6, %v2295_v47  ;;  %v2269_v6 = vmul.f32 1.442695, %v2257_v2 }
 0x96c   : > { %1341 = vperm.xlu0 %3709, %v5596_v23   ;;  %v1880_v30 = vpop.permute.xlu1 %1879 }
 0x96d   : > { %2029 = vst.msk [vmem:[#allocation4 + $0x90] sm:$0xff] %vm472_vm2, %v2021_v54  ;;  %v2326_v57 = vpack.c.bf16 %v2320_v19, %v2319_v10  ;;  %v1905_v59 = vmul.f32 %v1880_v30, %v1857_v51  ;;  %3841 = vpow2.f32 %v2269_v6 }
 0x96e   : > { %v2285_v62 = vpop.permute.xlu0 %2284 }
 0x96f   : > { %v2022_v37 = vadd.f32 %v5364_v53, %v1905_v59  ;;  %v2318_v20 = vsub.f32 %v5384_v49, %v2285_v62  ;;  %v2333_v51 = vmul.bf16 1069105081, %v2326_v57 }
 0x970   : > { %1869 = vperm.xlu0 %3709, %v5602_v34   ;;  %v1890_v21 = vpop.permute.xlu1 %1889 }
 0x971   : > { %2030 = vst.msk [vmem:[#allocation4 + $0x98] sm:$0xff] %vm472_vm2, %v2022_v37  ;;  %v2325_v46 = vpack.c.bf16 %v2318_v20, %v2317_v56  ;;  %v1907_v58 = vmul.f32 %v1890_v21, %v1859_v22 }
 0x972   : > { %v2310_v23 = vpop.permute.xlu0 %2309 }
 0x973   : > { %v2330_v26 = vmul.bf16 1069105081, %v2325_v46  ;;  %v2024_v43 = vadd.f32 %v5374_v50, %v1907_v58  ;;  %v5684_v34 = vpop.eup %3839  ;;  %v2323_v50 = vsub.f32 %v5390_v25, %v2310_v23 }
 0x974   : > { %1884 = vperm.xlu0 %3709, %v5608_v33   ;;  %v1900_v53 = vpop.permute.xlu1 %1899 }
 0x975   : > { %3843 = vpow.bf16 %v2330_v26  ;;  %2032 = vst.msk [vmem:[#allocation4 + $0xa8] sm:$0xff] %vm472_vm2, %v2024_v43  ;;  %v1909_v49 = vmul.f32 %v1900_v53, %v1861_v63  ;;  %v1237_v63 = vld [vmem:[#allocation3 + $0x48] sm:$0xff]  ;;  %v6097_v26 = vsub.f32 %v5500_v12, %v5507_v24 }
 0x976   : > { %v2300_v8 = vpop.permute.xlu0 %2299  ;;  %v1245_v53 = vmul.f32 %v5652_v35, %v1237_v63  ;;  %v1241_v12 = vld [vmem:[#allocation3 + $0x68] sm:$0xff] }
 0x977   : > { %v2026_v60 = vadd.f32 %v5372_v42, %v1909_v49  ;;  %v5689_v41 = vpop.eup %3841  ;;  %v2321_v7 = vsub.f32 %v5394_v13, %v2300_v8  ;;  %v2273_v43 = vmul.f32 1.442695, %v6097_v26  ;;  %v1239_v8 = vld [vmem:[#allocation3 + $0x58] sm:$0xff]  ;;  %v1249_v35 = vmul.f32 %v5472_v1, %v1241_v12  ;;  %v1791_v1 = vld [vmem:[#allocation3 + $0x90] sm:$0xff] }
 0x978   : > { %1894 = vperm.xlu0 %3709, %v5614_v52  }
 0x979   : > { %2034 = vst.msk [vmem:[#allocation4 + $0xb8] sm:$0xff] %vm472_vm2, %v2026_v60 }
 0x97a   : > { %v2315_v2 = vpop.permute.xlu0 %2314 }
 0x97b   : > { %v2324_v5 = vsub.f32 %v5398_v11, %v2315_v2  ;;  %v1247_v2 = vmul.f32 %v5466_v17, %v1239_v8 }
 0x97c   : > { %2422 = vperm.xlu0 %3709, %v5684_v34  }
 0x97d   : > { %v2328_v33 = vpack.c.bf16 %v2324_v5, %v2323_v50  ;;  %v1240_v5 = vld [vmem:[#allocation3 + $0x60] sm:$0xff] }
 0x97e   : > { %v2305_v38 = vpop.permute.xlu0 %2304 }
 0x97f   : > { %v2339_v42 = vmul.bf16 1069105081, %v2328_v33  ;;  %v2322_v52 = vsub.f32 %v5400_v44, %v2305_v38  ;;  %v1248_v38 = vmul.f32 %v5657_v15, %v1240_v5  ;;  %v1789_v15 = vld [vmem:[#allocation3 + $0x80] sm:$0xff] }
 0x980   : > { %v3844_v4 = vpop.eup %3843  ;;  %2437 = vperm.xlu0 %3709, %v5689_v41  }
 0x981   : > { %3845 = vpow.bf16 %v2339_v42  ;;  %v2327_v47 = vpack.c.bf16 %v2322_v52, %v2321_v7  ;;  %3544 = vmatprep.mubr.msk.bf16.mxu0 %vm570_vm3, %v3844_v4  ;;  %v2359_v25 = vunpack.c.h.bf16 %v3844_v4  ;;  %v2358_v21 = vunpack.c.l.bf16 %v3844_v4  ;;  %v1243_v52 = vld [vmem:[#allocation3 + $0x78] sm:$0xff] }
 0x982   : > { %v2484_v11 = vpop.permute.xlu0 %2483  ;;  %v1251_v17 = vmul.f32 %v5478_v14, %v1243_v52 }
 0x983   : > { %v2336_v10 = vmul.bf16 1069105081, %v2327_v47  ;;  %3536 = vmatprep.subr.bf16.mxu0 %v2484_v11  ;;  %v2369_v54 = vsel %vm570_vm3, %v2359_v25, 0.0  ;;  %v2366_v58 = vsel %vm570_vm3, %v2358_v21, 0.0  ;;  %v1305_v21 = vld [vmem:[#allocation4 + $0x60] sm:$0xff] }
 0x984   : > { %2370 = vadd.xlane.f32.xlu1 %v2369_v54  ;;  %3537 = vmatpush3.bf16.msra.mxu0 %v2484_v11 }
 0x985   : > { %3847 = vpow.bf16 %v2336_v10  ;;  %3538 = vmatprep.subr.bf16.mxu0 %v5588_v18 }
 0x986   : > { %v2488_v13 = vpop.permute.xlu0 %2487  ;;  %3849 = vpow.bf16 %v2333_v51  ;;  %v1797_v51 = vmul.f32 %v5486_v48, %v1789_v15 }
 0x988   : > { %3539 = vmatpush3.bf16.msra.mxu0 %v5588_v18  ;;  %v2275_v18 = vmul.f32 1.442695, %v2260_v45 }
 0x989   : > { %3540 = vmatprep.subr.bf16.mxu0 %v2488_v13 }
 0x98a   : > { %v2490_v44 = vpop.permute.xlu0 %2489  ;;  %3851 = vpow2.f32 %v2275_v18 }
 0x98b   : > { %3853 = vpow2.f32 %v2273_v43  ;;  %v1855_v43 = vld [vmem:[#allocation4 + $0x88] sm:$0xff] }
 0x98c   : > { %v3846_v19 = vpop.eup %3845  ;;  %3541 = vmatpush3.bf16.msra.mxu0 %v2488_v13  ;;  %v1799_v13 = vmul.f32 %v5502_v39, %v1791_v1  ;;  %v2346_v1 = vld [vmem:[#allocation3 + $0xe0] sm:$0xff] }
 0x98d   : > { %3542 = vmatprep.subr.bf16.mxu0 %v2490_v44  ;;  %v2364_v30 = vunpack.c.l.bf16 %v3846_v19  ;;  %v2365_v28 = vunpack.c.h.bf16 %v3846_v19 }
 0x98f   : > { %v2384_v40 = vsel %vm570_vm3, %v2364_v30, 0.0  ;;  %v2387_v16 = vsel %vm570_vm3, %v2365_v28, 0.0 }
 0x990   : > { %v3848_v57 = vpop.eup %3847  ;;  %2385 = vadd.xlane.f32.xlu1 %v2384_v40  ;;  %3543 = vmatpush3.bf16.msra.mxu0 %v2490_v44 }
 0x991   : > { %v2362_v59 = vunpack.c.l.bf16 %v3848_v57  ;;  %v3850_v62 = vpop.eup %3849  ;;  %v2363_v45 = vunpack.c.h.bf16 %v3848_v57 }
 0x992   : > { %v2360_v56 = vunpack.c.l.bf16 %v3850_v62  ;;  %v2361_v20 = vunpack.c.h.bf16 %v3850_v62 }
 0x993   : > { %3545 = vmatmul.mubr.msk.bf16.vlgmr.msra.gmra.mrb[24].mxu0 %vm570_vm3, %v3850_v62  ;;  %v2378_v22 = vsel %vm570_vm3, %v2362_v59, 0.0  ;;  %v2381_v23 = vsel %vm570_vm3, %v2363_v45, 0.0  ;;  %v1307_v45 = vld [vmem:[#allocation4 + $0x70] sm:$0xff] }
 0x994   : > { %2379 = vadd.xlane.f32.xlu1 %v2378_v22  ;;  %3548 = vmatprep.mubr.msk.bf16.mxu0 %vm570_vm3, %v3848_v57  ;;  %v2372_v37 = vsel %vm570_vm3, %v2360_v56, 0.0  ;;  %v2375_v6 = vsel %vm570_vm3, %v2361_v20, 0.0  ;;  %v5708_v46 = vpop.eup %3851  ;;  %v1794_v57 = vld [vmem:[#allocation3 + $0xa8] sm:$0xff]  ;;  %v1796_v22 = vld [vmem:[#allocation3 + $0xb8] sm:$0xff] }
 0x995   : > { %v5724_v4 = vpop.eup %3853  ;;  %v1802_v48 = vmul.f32 %v5525_v29, %v1794_v57  ;;  %v1804_v39 = vmul.f32 %v5542_v31, %v1796_v22  ;;  %v1302_v20 = vld [vmem:[#allocation4 + $0x48] sm:$0xff]  ;;  %v2345_v57 = vld [vmem:[#allocation3 + $0xd8] sm:$0xff] }
 0x99b   : > { %3549 = vmatmul.mubr.msk.bf16.gmra.mrb[28].mxu0 %vm570_vm3, %v3846_v19  ;;  %v1792_v19 = vld [vmem:[#allocation3 + $0x98] sm:$0xff] }
 0x99c   : > { %v1800_v14 = vmul.f32 %v5512_v0, %v1792_v19 }
 0x99f   : > { %2373 = vadd.xlane.f32.xlu0 %v2372_v37 }
 0x9a3   : > { %2376 = vadd.xlane.f32.xlu0 %v2375_v6 }
 0x9a5   : > { %2452 = vperm.xlu1 %3710, %v5708_v46  }
 0x9a7   : > { %2367 = vadd.xlane.f32.xlu0 %v2366_v58  ;;  %v6098_v58 = vld [vmem:[#allocation49_spill] sm:$0xff] }
 0x9ab   : > { %2388 = vadd.xlane.f32.xlu0 %v2387_v16 }
 0x9af   : > { %2382 = vadd.xlane.f32.xlu0 %v2381_v23  ;;  %v6099_v23 = vld [vmem:[#allocation51_spill] sm:$0xff] }
 0x9b7   : > { %v1265_v49 = vpop.xlane.xlu0 %1264 }
 0x9b8   : > { %v1285_v60 = vadd.f32 %v1265_v49, %v1245_v53  ;;  %v6100_v53 = vld [vmem:[#allocation50_spill] sm:$0xff] }
 0x9ba   : > { %1293 = vst.msk [vmem:[#allocation3 + $0x48] sm:$0xff] %vm747_vm4, %v1285_v60 }
 0x9bb   : > { %v1271_v50 = vpop.xlane.xlu0 %1270 }
 0x9bc   : > { %v1287_v33 = vadd.f32 %v1271_v50, %v1247_v2  ;;  %v1858_v2 = vld [vmem:[#allocation4 + $0xa0] sm:$0xff] }
 0x9be   : > { %1295 = vst.msk [vmem:[#allocation3 + $0x58] sm:$0xff] %vm747_vm4, %v1287_v33 }
 0x9bf   : > { %v1274_v7 = vpop.xlane.xlu0 %1273 }
 0x9c0   : > { %v1288_v24 = vadd.f32 %v1274_v7, %v1248_v38  ;;  %v1860_v38 = vld [vmem:[#allocation4 + $0xb0] sm:$0xff] }
 0x9c2   : > { %1296 = vst.msk [vmem:[#allocation3 + $0x60] sm:$0xff] %vm747_vm4, %v1288_v24 }
 0x9c3   : > { %v1277_v42 = vpop.xlane.xlu0 %1276 }
 0x9c4   : > { %v1289_v47 = vadd.f32 %v1277_v42, %v1249_v35  ;;  %v2428_v42 = vpop.permute.xlu1 %2427 }
 0x9c5   : > { %2447 = vperm.xlu0 %3709, %v5724_v4  }
 0x9c6   : > { %1297 = vst.msk [vmem:[#allocation3 + $0x68] sm:$0xff] %vm747_vm4, %v1289_v47 }
 0x9c7   : > { %v1283_v25 = vpop.xlane.xlu0 %1282 }
 0x9c8   : > { %v1291_v11 = vadd.f32 %v1283_v25, %v1251_v17  ;;  %v2418_v52 = vpop.permute.xlu1 %2417 }
 0x9ca   : > { %1299 = vst.msk [vmem:[#allocation3 + $0x78] sm:$0xff] %vm747_vm4, %v1291_v11 }
 0x9cb   : > { %v1815_v10 = vpop.xlane.xlu0 %1814 }
 0x9cc   : > { %v1837_v54 = vadd.f32 %v1815_v10, %v1797_v51  ;;  %v2433_v47 = vpop.permute.xlu1 %2432 }
 0x9ce   : > { %1845 = vst.msk [vmem:[#allocation3 + $0x80] sm:$0xff] %vm747_vm4, %v1837_v54  ;;  %v2354_v54 = vmul.f32 %v5689_v41, %v2346_v1  ;;  %v2603_v1 = vld [vmem:[#allocation3 + $0x18] sm:$0xff] (!%p3314_p12) }
 0x9cf   : > { %v1821_v44 = vpop.xlane.xlu0 %1820 }
 0x9d0   : > { %v1839_v30 = vadd.f32 %v1821_v44, %v1799_v13  ;;  %v5752_v17 = vpop.permute.xlu1 %2442 }
 0x9d2   : > { %1847 = vst.msk [vmem:[#allocation3 + $0x90] sm:$0xff] %vm747_vm4, %v1839_v30  ;;  %v2344_v30 = vld [vmem:[#allocation3 + $0xd0] sm:$0xff] }
 0x9d3   : > { %v1824_v40 = vpop.xlane.xlu0 %1823 }
 0x9d4   : > { %v1840_v59 = vadd.f32 %v1824_v40, %v1800_v14  ;;  %v2352_v14 = vmul.f32 %v5549_v9, %v2344_v30 }
 0x9d6   : > { %1848 = vst.msk [vmem:[#allocation3 + $0x98] sm:$0xff] %vm747_vm4, %v1840_v59 }
 0x9d7   : > { %v1830_v62 = vpop.xlane.xlu0 %1829 }
 0x9d8   : > { %v1842_v18 = vadd.f32 %v1830_v62, %v1802_v48  ;;  %v2342_v62 = vld [vmem:[#allocation3 + $0xc0] sm:$0xff] }
 0x9d9   : > { %v2350_v41 = vmul.f32 %v5554_v61, %v2342_v62  ;;  %v2407_v61 = vld [vmem:[#allocation4 + $0xc0] sm:$0xff]  ;;  %v2674_v62 = vld [vmem:[#allocation3 + $0x50] sm:$0xff] (!%p3314_p12) }
 0x9da   : > { %1850 = vst.msk [vmem:[#allocation3 + $0xa8] sm:$0xff] %vm747_vm4, %v1842_v18 }
 0x9db   : > { %v1836_v56 = vpop.xlane.xlu0 %1835 }
 0x9dc   : > { %v1844_v37 = vadd.f32 %v1836_v56, %v1804_v39  ;;  %v2349_v39 = vld [vmem:[#allocation3 + $0xf8] sm:$0xff] }
 0x9dd   : > { %v2357_v9 = vmul.f32 %v5708_v46, %v2349_v39  ;;  %v2676_v39 = vld [vmem:[#allocation3 + $0x60] sm:$0xff] (!%p3314_p12) }
 0x9de   : > { %1852 = vst.msk [vmem:[#allocation3 + $0xb8] sm:$0xff] %vm747_vm4, %v1844_v37 }
 0x9e3   : > { %v1317_v0 = vpop.permute.xlu0 %1316 }
 0x9e4   : > { %v1350_v6 = vmul.f32 %v1317_v0, %v1302_v20  ;;  %v2347_v20 = vld [vmem:[#allocation3 + $0xe8] sm:$0xff] }
 0x9e6   : > { %v1467_v28 = vadd.f32 %v6098_v58, %v1350_v6  ;;  %v2409_v58 = vld [vmem:[#allocation4 + $0xd0] sm:$0xff] }
 0x9e7   : > { %v1332_v16 = vpop.permute.xlu0 %1331 }
 0x9e8   : > { %1475 = vst.msk [vmem:[#allocation4 + $0x48] sm:$0xff] %vm472_vm2, %v1467_v28  ;;  %v1353_v29 = vmul.f32 %v1332_v16, %v1305_v21  ;;  %v2410_v28 = vld [vmem:[#allocation4 + $0xd8] sm:$0xff]  ;;  %v2457_v16 = vmul.f32 %v2428_v42, %v2409_v58 }
 0x9ea   : > { %v1470_v63 = vadd.f32 %v6099_v23, %v1353_v29  ;;  %v2408_v29 = vld [vmem:[#allocation4 + $0xc8] sm:$0xff] }
 0x9eb   : > { %v1342_v26 = vpop.permute.xlu0 %1341 }
 0x9ec   : > { %1478 = vst.msk [vmem:[#allocation4 + $0x60] sm:$0xff] %vm472_vm2, %v1470_v63  ;;  %v1355_v31 = vmul.f32 %v1342_v26, %v1307_v45  ;;  %v2455_v45 = vmul.f32 %v2418_v52, %v2407_v61  ;;  %v2458_v63 = vmul.f32 %v2433_v47, %v2410_v28  ;;  %v2747_v61 = vld [vmem:[#allocation3 + $0x98] sm:$0xff] (!%p3314_p12) }
 0x9ee   : > { %v1472_v49 = vadd.f32 %v6100_v53, %v1355_v31 }
 0x9ef   : > { %v1870_v8 = vpop.permute.xlu0 %1869 }
 0x9f0   : > { %1480 = vst.msk [vmem:[#allocation4 + $0x70] sm:$0xff] %vm472_vm2, %v1472_v49  ;;  %v1903_v60 = vmul.f32 %v1870_v8, %v1855_v43  ;;  %v2413_v8 = vld [vmem:[#allocation4 + $0xf0] sm:$0xff] }
 0x9f2   : > { %v2020_v50 = vadd.f32 %v5366_v27, %v1903_v60  ;;  %v2343_v27 = vld [vmem:[#allocation3 + $0xc8] sm:$0xff] }
 0x9f3   : > { %v1885_v5 = vpop.permute.xlu0 %1884  ;;  %v2351_v25 = vmul.f32 %v5684_v34, %v2343_v27 }
 0x9f4   : > { %2028 = vst.msk [vmem:[#allocation4 + $0x88] sm:$0xff] %vm472_vm2, %v2020_v50  ;;  %v1906_v33 = vmul.f32 %v1885_v5, %v1858_v2  ;;  %v2411_v50 = vld [vmem:[#allocation4 + $0xe0] sm:$0xff]  ;;  %v2414_v5 = vld [vmem:[#allocation4 + $0xf8] sm:$0xff] }
 0x9f6   : > { %v2023_v7 = vadd.f32 %v5370_v36, %v1906_v33  ;;  %v2348_v36 = vld [vmem:[#allocation3 + $0xf0] sm:$0xff] }
 0x9f7   : > { %v1895_v12 = vpop.permute.xlu0 %1894  ;;  %v2356_v51 = vmul.f32 %v5724_v4, %v2348_v36  ;;  %v2353_v4 = vmul.f32 %v5560_v55, %v2345_v57  ;;  %v2355_v55 = vmul.f32 %v5566_v3, %v2347_v20  ;;  %v2672_v57 = vld [vmem:[#allocation3 + $0x40] sm:$0xff] (!%p3314_p12)  ;;  %v2678_v20 = vld [vmem:[#allocation3 + $0x70] sm:$0xff] (!%p3314_p12) }
 0x9f8   : > { %2031 = vst.msk [vmem:[#allocation4 + $0xa0] sm:$0xff] %vm472_vm2, %v2023_v7  ;;  %v1908_v24 = vmul.f32 %v1895_v12, %v1860_v38  ;;  %v2412_v38 = vld [vmem:[#allocation4 + $0xe8] sm:$0xff] }
 0x9f9   : > { %v2460_v47 = vmul.f32 %v5752_v17, %v2412_v38  ;;  %v4228_v17 = vmov (!%p3314_p12), 0  }
 0x9fa   : > { %v2025_v35 = vadd.f32 %v5368_v32, %v1908_v24  ;;  %3856 = vset.pattern.permute.xlu1 (!%p3314_p12), %v4228_v17  ;;  %3855 = vset.pattern.permute.xlu0 (!%p3314_p12), %v4228_v17 }
 0x9fb   : > { %v2423_v44 = vpop.permute.xlu0 %2422 }
 0x9fc   : > { %2033 = vst.msk [vmem:[#allocation4 + $0xb0] sm:$0xff] %vm472_vm2, %v2025_v35  ;;  %v2456_v31 = vmul.f32 %v2423_v44, %v2408_v29  ;;  %v2607_v44 = vld [vmem:[#allocation3 + $0x38] sm:$0xff] (!%p3314_p12) }
 0x9ff   : > { %v2438_v34 = vpop.permute.xlu0 %2437 }
 0xa00   : > { %v2459_v12 = vmul.f32 %v2438_v34, %v2411_v50 }
 0xa11   : > { %v2371_v15 = vpop.xlane.xlu1 %2370 }
 0xa12   : > { %v2391_v11 = vadd.f32 %v2371_v15, %v2351_v25 }
 0xa14   : > { %2399 = vst.msk [vmem:[#allocation3 + $0xc8] sm:$0xff] %vm747_vm4, %v2391_v11 }
 0xa1d   : > { %v2386_v10 = vpop.xlane.xlu1 %2385 }
 0xa1e   : > { %v2396_v32 = vadd.f32 %v2386_v10, %v2356_v51  ;;  %v2602_v51 = vld [vmem:[#allocation3 + $0x10] sm:$0xff] (!%p3314_p12)  ;;  %v2600_v10 = vld [vmem:[#allocation3] sm:$0xff] (!%p3314_p12) }
 0xa1f   : > { %3917 = vrcp.f32 (!%p3314_p12), %v2602_v51 }
 0xa20   : > { %2404 = vst.msk [vmem:[#allocation3 + $0xf0] sm:$0xff] %vm747_vm4, %v2396_v32  ;;  %v2601_v32 = vld [vmem:[#allocation3 + $0x8] sm:$0xff] (!%p3314_p12)  ;;  %3919 = vrcp.f32 (!%p3314_p12), %v2600_v10 }
 0xa21   : > { %v2380_v13 = vpop.xlane.xlu1 %2379  ;;  %3921 = vrcp.f32 (!%p3314_p12), %v2603_v1 }
 0xa22   : > { %v2394_v19 = vadd.f32 %v2380_v13, %v2354_v54  ;;  %3923 = vrcp.f32 (!%p3314_p12), %v2601_v32  ;;  %v2605_v54 = vld [vmem:[#allocation3 + $0x28] sm:$0xff] (!%p3314_p12)  ;;  %v2604_v13 = vld [vmem:[#allocation3 + $0x20] sm:$0xff] (!%p3314_p12) }
 0xa23   : > { %3925 = vrcp.f32 (!%p3314_p12), %v2605_v54 }
 0xa24   : > { %2402 = vst.msk [vmem:[#allocation3 + $0xe0] sm:$0xff] %vm747_vm4, %v2394_v19  ;;  %3927 = vrcp.f32 (!%p3314_p12), %v2604_v13  ;;  %v2606_v19 = vld [vmem:[#allocation3 + $0x30] sm:$0xff] (!%p3314_p12) }
 0xa25   : > { %v2453_v33 = vpop.permute.xlu1 %2452  ;;  %3929 = vrcp.f32 (!%p3314_p12), %v2607_v44 }
 0xa26   : > { %v2462_v35 = vmul.f32 %v2453_v33, %v2414_v5  ;;  %3931 = vrcp.f32 (!%p3314_p12), %v2606_v19 }
 0xa29   : > { %v3918_v34 = vpop.eup (!%p3314_p12), %3917 }
 0xa2a   : > { %v3920_v30 = vpop.eup (!%p3314_p12), %3919  ;;  %2636 = vperm.xlu1 (!%p3314_p12), %3856, %v3918_v34   ;;  %v2689_v34 = vld [vmem:[#allocation4 + $0x48] sm:$0xff] (!%p3314_p12) }
 0xa2b   : > { %2626 = vperm.xlu0 (!%p3314_p12), %3855, %v3920_v30   ;;  %v2688_v30 = vld [vmem:[#allocation4 + $0x40] sm:$0xff] (!%p3314_p12) }
 0xa2c   : > { %v2374_v40 = vpop.xlane.xlu0 %2373 }
 0xa2d   : > { %v2392_v59 = vadd.f32 %v2374_v40, %v2352_v14  ;;  %v2673_v14 = vld [vmem:[#allocation3 + $0x48] sm:$0xff] (!%p3314_p12)  ;;  %v3922_v40 = vpop.eup (!%p3314_p12), %3921 }
 0xa2e   : > { %3933 = vrcp.f32 (!%p3314_p12), %v2673_v14  ;;  %2641 = vperm.xlu1 (!%p3314_p12), %3856, %v3922_v40  }
 0xa2f   : > { %2400 = vst.msk [vmem:[#allocation3 + $0xd0] sm:$0xff] %vm747_vm4, %v2392_v59  ;;  %v3924_v59 = vpop.eup (!%p3314_p12), %3923  ;;  %3935 = vrcp.f32 (!%p3314_p12), %v2672_v57 }
 0xa30   : > { %v2377_v48 = vpop.xlane.xlu0 %2376  ;;  %2631 = vperm.xlu0 (!%p3314_p12), %3855, %v3924_v59  }
 0xa31   : > { %v2393_v22 = vadd.f32 %v2377_v48, %v2353_v4  ;;  %v2675_v4 = vld [vmem:[#allocation3 + $0x58] sm:$0xff] (!%p3314_p12)  ;;  %v3926_v48 = vpop.eup (!%p3314_p12), %3925 }
 0xa32   : > { %3937 = vrcp.f32 (!%p3314_p12), %v2675_v4  ;;  %2651 = vperm.xlu1 (!%p3314_p12), %3856, %v3926_v48   ;;  %v2691_v4 = vld [vmem:[#allocation4 + $0x58] sm:$0xff] (!%p3314_p12)  ;;  %v2690_v48 = vld [vmem:[#allocation4 + $0x50] sm:$0xff] (!%p3314_p12) }
 0xa33   : > { %2401 = vst.msk [vmem:[#allocation3 + $0xd8] sm:$0xff] %vm747_vm4, %v2393_v22  ;;  %v3928_v22 = vpop.eup (!%p3314_p12), %3927  ;;  %3939 = vrcp.f32 (!%p3314_p12), %v2674_v62 }
 0xa34   : > { %v2368_v18 = vpop.xlane.xlu0 %2367  ;;  %2646 = vperm.xlu0 (!%p3314_p12), %3855, %v3928_v22  }
 0xa35   : > { %v2390_v56 = vadd.f32 %v2368_v18, %v2350_v41  ;;  %v2677_v41 = vld [vmem:[#allocation3 + $0x68] sm:$0xff] (!%p3314_p12)  ;;  %v3930_v18 = vpop.eup (!%p3314_p12), %3929 }
 0xa36   : > { %3941 = vrcp.f32 (!%p3314_p12), %v2677_v41  ;;  %2661 = vperm.xlu1 (!%p3314_p12), %3856, %v3930_v18   ;;  %v2818_v5 = vld [vmem:[#allocation3 + $0xd0] sm:$0xff] (!%p3314_p12) }
 0xa37   : > { %2398 = vst.msk [vmem:[#allocation3 + $0xc0] sm:$0xff] %vm747_vm4, %v2390_v56  ;;  %v3932_v56 = vpop.eup (!%p3314_p12), %3931  ;;  %3943 = vrcp.f32 (!%p3314_p12), %v2676_v39 }
 0xa38   : > { %v2389_v37 = vpop.xlane.xlu0 %2388  ;;  %2656 = vperm.xlu0 (!%p3314_p12), %3855, %v3932_v56   ;;  %v2693_v56 = vld [vmem:[#allocation4 + $0x68] sm:$0xff] (!%p3314_p12) }
 0xa39   : > { %v2397_v0 = vadd.f32 %v2389_v37, %v2357_v9  ;;  %v2679_v9 = vld [vmem:[#allocation3 + $0x78] sm:$0xff] (!%p3314_p12)  ;;  %v3934_v37 = vpop.eup (!%p3314_p12), %3933 }
 0xa3a   : > { %3945 = vrcp.f32 (!%p3314_p12), %v2679_v9  ;;  %2703 = vperm.xlu1 (!%p3314_p12), %3856, %v3934_v37   ;;  %v2692_v9 = vld [vmem:[#allocation4 + $0x60] sm:$0xff] (!%p3314_p12) }
 0xa3b   : > { %2405 = vst.msk [vmem:[#allocation3 + $0xf8] sm:$0xff] %vm747_vm4, %v2397_v0  ;;  %v3936_v0 = vpop.eup (!%p3314_p12), %3935  ;;  %3947 = vrcp.f32 (!%p3314_p12), %v2678_v20 }
 0xa3c   : > { %v2383_v6 = vpop.xlane.xlu0 %2382  ;;  %2698 = vperm.xlu0 (!%p3314_p12), %3855, %v3936_v0  }
 0xa3d   : > { %v2395_v21 = vadd.f32 %v2383_v6, %v2355_v55  ;;  %v2745_v55 = vld [vmem:[#allocation3 + $0x88] sm:$0xff] (!%p3314_p12)  ;;  %v3938_v6 = vpop.eup (!%p3314_p12), %3937 }
 0xa3e   : > { %v3940_v58 = vpop.eup (!%p3314_p12), %3939  ;;  %3949 = vrcp.f32 (!%p3314_p12), %v2745_v55  ;;  %2713 = vperm.xlu1 (!%p3314_p12), %3856, %v3938_v6  }
 0xa3f   : > { %2403 = vst.msk [vmem:[#allocation3 + $0xe8] sm:$0xff] %vm747_vm4, %v2395_v21  ;;  %v2744_v21 = vld [vmem:[#allocation3 + $0x80] sm:$0xff] (!%p3314_p12) }
 0xa40   : > { %3951 = vrcp.f32 (!%p3314_p12), %v2744_v21  ;;  %v3942_v28 = vpop.eup (!%p3314_p12), %3941  ;;  %2708 = vperm.xlu0 (!%p3314_p12), %3855, %v3940_v58   ;;  %v2695_v21 = vld [vmem:[#allocation4 + $0x78] sm:$0xff] (!%p3314_p12)  ;;  %v2694_v58 = vld [vmem:[#allocation4 + $0x70] sm:$0xff] (!%p3314_p12) }
 0xa41   : > { %v3944_v29 = vpop.eup (!%p3314_p12), %3943  ;;  %3953 = vrcp.f32 (!%p3314_p12), %v2747_v61 }
 0xa42   : > { %2723 = vperm.xlu1 (!%p3314_p12), %3856, %v3942_v28  }
 0xa44   : > { %v2448_v60 = vpop.permute.xlu0 %2447  ;;  %2718 = vperm.xlu0 (!%p3314_p12), %3855, %v3944_v29  }
 0xa45   : > { %v2461_v7 = vmul.f32 %v2448_v60, %v2413_v8  ;;  %v2816_v8 = vld [vmem:[#allocation3 + $0xc0] sm:$0xff] (!%p3314_p12) }
 0xa46   : > { %v2821_v38 = vld [vmem:[#allocation3 + $0xe8] sm:$0xff] (!%p3314_p12) }
 0xa66   : > { %v3546_v23 = vpop.f32.mrb[24].mxu0 }
 0xa67   : > { %v2574_v46 = vadd.f32 %v3546_v23, %v2457_v16  ;;  %v2541_v26 = vpop.f32.mrb[25].mxu0  ;;  %v2746_v16 = vld [vmem:[#allocation3 + $0x90] sm:$0xff] (!%p3314_p12)  ;;  %v3946_v23 = vpop.eup (!%p3314_p12), %3945 }
 0xa68   : > { %v2572_v43 = vadd.f32 %v2541_v26, %v2455_v45  ;;  %v3547_v53 = vpop.f32.mrb[26].mxu0  ;;  %3955 = vrcp.f32 (!%p3314_p12), %v2746_v16  ;;  %v2749_v45 = vld [vmem:[#allocation3 + $0xa8] sm:$0xff] (!%p3314_p12)  ;;  %2733 = vperm.xlu1 (!%p3314_p12), %3856, %v3946_v23   ;;  %v2751_v26 = vld [vmem:[#allocation3 + $0xb8] sm:$0xff] (!%p3314_p12) }
 0xa69   : > { %2582 = vst.msk [vmem:[#allocation4 + $0xd0] sm:$0xff] %vm472_vm2, %v2574_v46  ;;  %v2575_v3 = vadd.f32 %v3547_v53, %v2458_v63  ;;  %v2544_v49 = vpop.f32.mrb[27].mxu0  ;;  %v2748_v63 = vld [vmem:[#allocation3 + $0xa0] sm:$0xff] (!%p3314_p12)  ;;  %v3948_v46 = vpop.eup (!%p3314_p12), %3947  ;;  %3957 = vrcp.f32 (!%p3314_p12), %v2749_v45  ;;  %v2761_v23 = vld [vmem:[#allocation4 + $0x88] sm:$0xff] (!%p3314_p12) }
 0xa6a   : > { %2580 = vst.msk [vmem:[#allocation4 + $0xc0] sm:$0xff] %vm472_vm2, %v2572_v43  ;;  %v2573_v2 = vadd.f32 %v2544_v49, %v2456_v31  ;;  %3959 = vrcp.f32 (!%p3314_p12), %v2748_v63  ;;  %v3950_v31 = vpop.eup (!%p3314_p12), %3949  ;;  %2728 = vperm.xlu0 (!%p3314_p12), %3855, %v3948_v46   ;;  %v2750_v43 = vld [vmem:[#allocation3 + $0xb0] sm:$0xff] (!%p3314_p12)  ;;  %v2760_v63 = vld [vmem:[#allocation4 + $0x80] sm:$0xff] (!%p3314_p12) }
 0xa6b   : > { %2583 = vst.msk [vmem:[#allocation4 + $0xd8] sm:$0xff] %vm472_vm2, %v2575_v3  ;;  %v3952_v53 = vpop.eup (!%p3314_p12), %3951  ;;  %3961 = vrcp.f32 (!%p3314_p12), %v2751_v26  ;;  %v2817_v3 = vld [vmem:[#allocation3 + $0xc8] sm:$0xff] (!%p3314_p12) }
 0xa6c   : > { %2581 = vst.msk [vmem:[#allocation4 + $0xc8] sm:$0xff] %vm472_vm2, %v2573_v2  ;;  %2775 = vperm.xlu1 (!%p3314_p12), %3856, %v3950_v31   ;;  %3963 = vrcp.f32 (!%p3314_p12), %v2750_v43  ;;  %v3954_v49 = vpop.eup (!%p3314_p12), %3953  ;;  %v2819_v2 = vld [vmem:[#allocation3 + $0xd8] sm:$0xff] (!%p3314_p12) }
 0xa6d   : > { %3965 = vrcp.f32 (!%p3314_p12), %v2817_v3  ;;  %v2763_v3 = vld [vmem:[#allocation4 + $0x98] sm:$0xff] (!%p3314_p12) }
 0xa6e   : > { %v3550_v24 = vpop.f32.mrb[28].mxu0  ;;  %2599 = sbr.rel (%p3314_p12) target bundleno = 2952 (0xb88), region = 52  ;;  %2770 = vperm.xlu0 (!%p3314_p12), %3855, %v3952_v53   ;;  %3967 = vrcp.f32 (!%p3314_p12), %v2816_v8 }
 0xa6f   : > { %v2578_v42 = vadd.f32 %v3550_v24, %v2461_v7  ;;  %v2557_v52 = vpop.f32.mrb[29].mxu0  ;;  %3969 = vrcp.f32 (!%p3314_p12), %v2819_v2 }
 0xa70   : > { %v2576_v27 = vadd.f32 %v2557_v52, %v2459_v12  ;;  %v3551_v25 = vpop.f32.mrb[30].mxu0  ;;  %2785 = vperm.xlu1 (!%p3314_p12), %3856, %v3954_v49   ;;  %3971 = vrcp.f32 (!%p3314_p12), %v2818_v5  ;;  %v2820_v12 = vld [vmem:[#allocation3 + $0xe0] sm:$0xff] (!%p3314_p12)  ;;  %v2822_v52 = vld [vmem:[#allocation3 + $0xf0] sm:$0xff] (!%p3314_p12) }
 0xa71   : > { %2586 = vst.msk [vmem:[#allocation4 + $0xf0] sm:$0xff] %vm472_vm2, %v2578_v42  ;;  %v2579_v15 = vadd.f32 %v3551_v25, %v2462_v35  ;;  %v2560_v11 = vpop.f32.mrb[31].mxu0  ;;  %3973 = vrcp.f32 (!%p3314_p12), %v2821_v38  ;;  %v2823_v35 = vld [vmem:[#allocation3 + $0xf8] sm:$0xff] (!%p3314_p12)  ;;  %v2762_v49 = vld [vmem:[#allocation4 + $0x90] sm:$0xff] (!%p3314_p12)  ;;  %v2764_v38 = vld [vmem:[#allocation4 + $0xa0] sm:$0xff] (!%p3314_p12) }
 0xa72   : > { %2584 = vst.msk [vmem:[#allocation4 + $0xe0] sm:$0xff] %vm472_vm2, %v2576_v27  ;;  %v2577_v36 = vadd.f32 %v2560_v11, %v2460_v47  ;;  %v3956_v60 = vpop.eup (!%p3314_p12), %3955  ;;  %3975 = vrcp.f32 (!%p3314_p12), %v2820_v12 }
 0xa73   : > { %2587 = vst.msk [vmem:[#allocation4 + $0xf8] sm:$0xff] %vm472_vm2, %v2579_v15  ;;  %v3958_v50 = vpop.eup (!%p3314_p12), %3957  ;;  %2780 = vperm.xlu0 (!%p3314_p12), %3855, %v3956_v60   ;;  %3977 = vrcp.f32 (!%p3314_p12), %v2823_v35 }
 0xa74   : > { %2585 = vst.msk [vmem:[#allocation4 + $0xe8] sm:$0xff] %vm472_vm2, %v2577_v36  ;;  %v3960_v33 = vpop.eup (!%p3314_p12), %3959  ;;  %2795 = vperm.xlu1 (!%p3314_p12), %3856, %v3958_v50   ;;  %3979 = vrcp.f32 (!%p3314_p12), %v2822_v52  ;;  %v2767_v52 = vld [vmem:[#allocation4 + $0xb8] sm:$0xff] (!%p3314_p12) }
 0xa75   : > { %v3962_v7 = vpop.eup %3961 }
 0xa76   : > { %v3964_v24 = vpop.eup %3963 }
 0xa77   : > { %2790 = vperm.xlu0 %3855, %v3960_v33   ;;  %v3966_v42 = vpop.eup %3965  ;;  %v2765_v33 = vld [vmem:[#allocation4 + $0xa8] sm:$0xff] }
 0xa78   : > { %2805 = vperm.xlu1 %3856, %v3962_v7   ;;  %v3968_v47 = vpop.eup %3967 }
 0xa79   : > { %v3970_v27 = vpop.eup %3969 }
 0xa7a   : > { %v3972_v25 = vpop.eup %3971 }
 0xa7b   : > { %2800 = vperm.xlu0 %3855, %v3964_v24   ;;  %v3974_v15 = vpop.eup %3973 }
 0xa7c   : > { %2847 = vperm.xlu1 %3856, %v3966_v42   ;;  %v3976_v11 = vpop.eup %3975 }
 0xa7d   : > { %v3978_v36 = vpop.eup %3977 }
 0xa7e   : > { %v3980_v51 = vpop.eup %3979 }
 0xa7f   : > { %2842 = vperm.xlu0 %3855, %v3968_v47   ;;  %v2766_v47 = vld [vmem:[#allocation4 + $0xb0] sm:$0xff] }
 0xa80   : > { %2857 = vperm.xlu1 %3856, %v3970_v27  }
 0xa83   : > { %2852 = vperm.xlu0 %3855, %v3972_v25  }
 0xa84   : > { %2867 = vperm.xlu1 %3856, %v3974_v15  }
 0xa87   : > { %2862 = vperm.xlu0 %3855, %v3976_v11  }
 0xa88   : > { %2877 = vperm.xlu1 %3856, %v3978_v36  }
 0xa8b   : > { %2872 = vperm.xlu0 %3855, %v3980_v51   ;;  %v2833_v51 = vld [vmem:[#allocation4 + $0xc8] sm:$0xff] }
 0xaa9   : > { %v5780_v10 = vpop.permute.xlu1 %2636 }
 0xaaa   : > { %v5782_v1 = vpop.permute.xlu0 %2626 }
 0xaad   : > { %v5784_v17 = vpop.permute.xlu1 %2641 }
 0xaaf   : > { %v5786_v32 = vpop.permute.xlu0 %2631 }
 0xab1   : > { %v5788_v54 = vpop.permute.xlu1 %2651 }
 0xab3   : > { %v5790_v13 = vpop.permute.xlu0 %2646 }
 0xab5   : > { %v5792_v44 = vpop.permute.xlu1 %2661 }
 0xab7   : > { %v5794_v19 = vpop.permute.xlu0 %2656 }
 0xab9   : > { %v2704_v14 = vpop.permute.xlu1 %2703 }
 0xaba   : > { %v2737_v40 = vmul.f32 %v2704_v14, %v2689_v34  ;;  %v2832_v34 = vld [vmem:[#allocation4 + $0xc0] sm:$0xff] }
 0xabb   : > { %v2699_v57 = vpop.permute.xlu0 %2698 }
 0xabc   : > { %v2736_v59 = vmul.f32 %v2699_v57, %v2688_v30 }
 0xabd   : > { %v2714_v22 = vpop.permute.xlu1 %2713 }
 0xabe   : > { %v3857_v62 = vpack.i.bf16 %v2737_v40, %v2736_v59  ;;  %v2739_v41 = vmul.f32 %v2714_v22, %v2691_v4  ;;  %v2835_v4 = vld [vmem:[#allocation4 + $0xd8] sm:$0xff] }
 0xabf   : > { %v2709_v18 = vpop.permute.xlu0 %2708 }
 0xac0   : > { %v2738_v39 = vmul.f32 %v2709_v18, %v2690_v48  ;;  %3858 = vrot.lane.b32.xlu0 %v3857_v62, %s4229_s8  ;;  %v2834_v48 = vld [vmem:[#allocation4 + $0xd0] sm:$0xff] }
 0xac1   : > { %v2724_v20 = vpop.permute.xlu1 %2723 }
 0xac2   : > { %v3862_v37 = vpack.i.bf16 %v2739_v41, %v2738_v39  ;;  %v2741_v0 = vmul.f32 %v2724_v20, %v2693_v56  ;;  %v2837_v56 = vld [vmem:[#allocation4 + $0xe8] sm:$0xff] }
 0xac3   : > { %v2719_v55 = vpop.permute.xlu0 %2718 }
 0xac4   : > { %v2740_v6 = vmul.f32 %v2719_v55, %v2692_v9  ;;  %3863 = vrot.lane.b32.xlu1 %v3862_v37, %s4229_s8  ;;  %v2836_v9 = vld [vmem:[#allocation4 + $0xe0] sm:$0xff] }
 0xac6   : > { %v3867_v61 = vpack.i.bf16 %v2741_v0, %v2740_v6 }
 0xac8   : > { %3868 = vrot.lane.b32.xlu0 %v3867_v61, %s4229_s8 }
 0xae7   : > { %v2734_v28 = vpop.permute.xlu1 %2733 }
 0xae8   : > { %v2743_v16 = vmul.f32 %v2734_v28, %v2695_v21  ;;  %v2839_v21 = vld [vmem:[#allocation4 + $0xf8] sm:$0xff] }
 0xae9   : > { %v2729_v29 = vpop.permute.xlu0 %2728 }
 0xaea   : > { %v2742_v45 = vmul.f32 %v2729_v29, %v2694_v58  ;;  %v2838_v58 = vld [vmem:[#allocation4 + $0xf0] sm:$0xff] }
 0xaeb   : > { %v2776_v26 = vpop.permute.xlu1 %2775 }
 0xaec   : > { %v3872_v46 = vpack.i.bf16 %v2743_v16, %v2742_v45  ;;  %v2809_v31 = vmul.f32 %v2776_v26, %v2761_v23 }
 0xaed   : > { %v2771_v43 = vpop.permute.xlu0 %2770 }
 0xaee   : > { %v2808_v53 = vmul.f32 %v2771_v43, %v2760_v63  ;;  %3873 = vrot.lane.b32.xlu1 %v3872_v46, %s4229_s8 }
 0xaef   : > { %v2786_v60 = vpop.permute.xlu1 %2785 }
 0xaf0   : > { %v3877_v8 = vpack.i.bf16 %v2809_v31, %v2808_v53  ;;  %v2811_v2 = vmul.f32 %v2786_v60, %v2763_v3  ;;  %v2616_v53 = vld [vmem:[#allocation4] sm:$0xff]  ;;  %v2617_v3 = vld [vmem:[#allocation4 + $0x8] sm:$0xff] }
 0xaf2   : > { %v2781_v50 = vpop.permute.xlu0 %2780  ;;  %3878 = vrot.lane.b32.xlu0 %v3877_v8, %s4230_s27 }
 0xaf3   : > { %v2810_v5 = vmul.f32 %v2781_v50, %v2762_v49  ;;  %v2796_v12 = vpop.permute.xlu1 %2795  ;;  %v2618_v50 = vld [vmem:[#allocation4 + $0x10] sm:$0xff] }
 0xaf4   : > { %v2813_v24 = vmul.f32 %v2796_v12, %v2765_v33  ;;  %v2665_v33 = vmul.f32 %v5786_v32, %v2617_v3  ;;  %v2666_v12 = vmul.f32 %v5780_v10, %v2618_v50 }
 0xaf5   : > { %v3882_v7 = vpack.i.bf16 %v2811_v2, %v2810_v5  ;;  %v2664_v5 = vmul.f32 %v5782_v1, %v2616_v53 }
 0xaf6   : > { %v2791_v35 = vpop.permute.xlu0 %2790 }
 0xaf7   : > { %v2812_v42 = vmul.f32 %v2791_v35, %v2764_v38  ;;  %3883 = vrot.lane.b32.xlu1 %v3882_v7, %s4230_s27  ;;  %v2806_v25 = vpop.permute.xlu1 %2805  ;;  %v2621_v35 = vld [vmem:[#allocation4 + $0x28] sm:$0xff] }
 0xaf8   : > { %v2815_v15 = vmul.f32 %v2806_v25, %v2767_v52  ;;  %v2620_v25 = vld [vmem:[#allocation4 + $0x20] sm:$0xff] }
 0xaf9   : > { %v3887_v27 = vpack.i.bf16 %v2813_v24, %v2812_v42  ;;  %v2619_v24 = vld [vmem:[#allocation4 + $0x18] sm:$0xff] }
 0xafa   : > { %v2801_v11 = vpop.permute.xlu0 %2800 }
 0xafb   : > { %v2814_v36 = vmul.f32 %v2801_v11, %v2766_v47  ;;  %3888 = vrot.lane.b32.xlu0 %v3887_v27, %s4230_s27  ;;  %v2848_v14 = vpop.permute.xlu1 %2847 }
 0xafc   : > { %v2881_v40 = vmul.f32 %v2848_v14, %v2833_v51  ;;  %v2669_v14 = vmul.f32 %v5788_v54, %v2621_v35 }
 0xafd   : > { %v3892_v30 = vpack.i.bf16 %v2815_v15, %v2814_v36 }
 0xafe   : > { %v2843_v57 = vpop.permute.xlu0 %2842 }
 0xaff   : > { %v2880_v59 = vmul.f32 %v2843_v57, %v2832_v34  ;;  %3893 = vrot.lane.b32.xlu1 %v3892_v30, %s4230_s27  ;;  %v2858_v22 = vpop.permute.xlu1 %2857  ;;  %v2667_v30 = vmul.f32 %v5784_v17, %v2619_v24 }
 0xb00   : > { %v2883_v41 = vmul.f32 %v2858_v22, %v2835_v4 }
 0xb01   : > { %v3897_v62 = vpack.i.bf16 %v2881_v40, %v2880_v59  ;;  %v2668_v59 = vmul.f32 %v5790_v13, %v2620_v25 }
 0xb02   : > { %v2853_v18 = vpop.permute.xlu0 %2852 }
 0xb03   : > { %v2882_v39 = vmul.f32 %v2853_v18, %v2834_v48  ;;  %3898 = vrot.lane.b32.xlu0 %v3897_v62, %s4231_s9  ;;  %v2868_v20 = vpop.permute.xlu1 %2867 }
 0xb04   : > { %v2885_v0 = vmul.f32 %v2868_v20, %v2837_v56 }
 0xb05   : > { %v3902_v37 = vpack.i.bf16 %v2883_v41, %v2882_v39 }
 0xb06   : > { %v2863_v55 = vpop.permute.xlu0 %2862 }
 0xb07   : > { %v2884_v6 = vmul.f32 %v2863_v55, %v2836_v9  ;;  %3903 = vrot.lane.b32.xlu1 %v3902_v37, %s4231_s9  ;;  %v2878_v28 = vpop.permute.xlu1 %2877  ;;  %v2622_v55 = vld [vmem:[#allocation4 + $0x30] sm:$0xff] }
 0xb08   : > { %v2887_v16 = vmul.f32 %v2878_v28, %v2839_v21  ;;  %v2670_v53 = vmul.f32 %v5794_v19, %v2622_v55 }
 0xb09   : > { %v3907_v61 = vpack.i.bf16 %v2885_v0, %v2884_v6  ;;  %v2623_v0 = vld [vmem:[#allocation4 + $0x38] sm:$0xff] }
 0xb0a   : > { %v2873_v29 = vpop.permute.xlu0 %2872 }
 0xb0b   : > { %v2886_v45 = vmul.f32 %v2873_v29, %v2838_v58  ;;  %3908 = vrot.lane.b32.xlu0 %v3907_v61, %s4231_s9 }
 0xb0d   : > { %v3912_v23 = vpack.i.bf16 %v2887_v16, %v2886_v45 }
 0xb0f   : > { %3913 = vrot.lane.b32.xlu1 %v3912_v23, %s4231_s9 }
 0xb32   : > { %v3859_v63 = vpop.permute.xlu0 %3858 }
 0xb33   : > { %v3861_v49 = vunpack.i.h.bf16 %v3859_v63  ;;  %v3860_v8 = vunpack.i.l.bf16 %v3859_v63 }
 0xb35   : > { %v2985_v42 = vsel %vm472_vm2, %v2665_v33, %v3861_v49  ;;  %v2984_v52 = vsel %vm472_vm2, %v2664_v5, %v3860_v8 }
 0xb36   : > { %v3864_v46 = vpop.permute.xlu1 %3863 }
 0xb37   : > { %v3866_v15 = vunpack.i.h.bf16 %v3864_v46  ;;  %v3865_v11 = vunpack.i.l.bf16 %v3864_v46 }
 0xb39   : > { %v2987_v41 = vsel %vm472_vm2, %v2667_v30, %v3866_v15  ;;  %v2986_v18 = vsel %vm472_vm2, %v2666_v12, %v3865_v11 }
 0xb3a   : > { %v3869_v26 = vpop.permute.xlu0 %3868 }
 0xb3b   : > { %v3871_v4 = vunpack.i.h.bf16 %v3869_v26  ;;  %v3870_v48 = vunpack.i.l.bf16 %v3869_v26 }
 0xb3d   : > { %v2989_v6 = vsel %vm472_vm2, %v2669_v14, %v3871_v4  ;;  %v2988_v21 = vsel %vm472_vm2, %v2668_v59, %v3870_v48 }
 0xb60   : > { %v5796_v31 = vpop.permute.xlu1 %3873 }
 0xb61   : > { %v3876_v28 = vunpack.i.h.bf16 %v5796_v31  ;;  %v3875_v16 = vunpack.i.l.bf16 %v5796_v31 }
 0xb64   : > { %v3879_v43 = vpop.permute.xlu0 %3878 }
 0xb65   : > { %v3881_v38 = vunpack.i.h.bf16 %v3879_v43  ;;  %v3880_v7 = vunpack.i.l.bf16 %v3879_v43  ;;  %v2671_v43 = vmul.f32 %v5792_v44, %v2623_v0 }
 0xb67   : > { %v2992_v32 = vsel %vm570_vm3, %v2984_v52, %v3880_v7  ;;  %v2993_v51 = vsel %vm570_vm3, %v2985_v42, %v3881_v38 }
 0xb69   : > { %v3884_v60 = vpop.permute.xlu1 %3883 }
 0xb6a   : > { %v3886_v34 = vunpack.i.h.bf16 %v3884_v60  ;;  %v3885_v10 = vunpack.i.l.bf16 %v3884_v60  ;;  %v2991_v60 = vsel %vm472_vm2, %v2671_v43, %v3876_v28 }
 0xb6c   : > { %v2995_v17 = vsel %vm570_vm3, %v2987_v41, %v3886_v34  ;;  %v2994_v54 = vsel %vm570_vm3, %v2986_v18, %v3885_v10 }
 0xb6d   : > { %v3889_v2 = vpop.permute.xlu0 %3888 }
 0xb6e   : > { %v3891_v9 = vunpack.i.h.bf16 %v3889_v2  ;;  %v3890_v37 = vunpack.i.l.bf16 %v3889_v2  ;;  %v2990_v2 = vsel %vm472_vm2, %v2670_v53, %v3875_v16 }
 0xb70   : > { %v2996_v23 = vsel %vm570_vm3, %v2988_v21, %v3890_v37  ;;  %v2997_v63 = vsel %vm570_vm3, %v2989_v6, %v3891_v9 }
 0xb71   : > { %v3894_v47 = vpop.permute.xlu1 %3893 }
 0xb72   : > { %v3896_v46 = vunpack.i.h.bf16 %v3894_v47  ;;  %v3895_v26 = vunpack.i.l.bf16 %v3894_v47 }
 0xb74   : > { %v2999_v33 = vsel %vm570_vm3, %v2991_v60, %v3896_v46  ;;  %v2998_v38 = vsel %vm570_vm3, %v2990_v2, %v3895_v26 }
 0xb75   : > { %v3899_v27 = vpop.permute.xlu0 %3898 }
 0xb76   : > { %v3901_v36 = vunpack.i.h.bf16 %v3899_v27  ;;  %v3900_v1 = vunpack.i.l.bf16 %v3899_v27 }
 0xb78   : > { %v3001_v40 = vsel %vm3000_vm5, %v2992_v32, %v3900_v1  ;;  %v3002_v57 = vsel %vm3000_vm5, %v2993_v51, %v3901_v36 }
 0xb79   : > { %v3340_v62 = vpack.c.bf16 %v3002_v57, %v3001_v40  ;;  %v3904_v22 = vpop.permute.xlu1 %3903 }
 0xb7a   : > { %v3906_v39 = vunpack.i.h.bf16 %v3904_v22  ;;  %v3905_v56 = vunpack.i.l.bf16 %v3904_v22 }
 0xb7b   : > { %3341 = vst [vmem:[%s4585_s22] sm:$0xff] %v3340_v62  }
 0xb7c   : > { %v3004_v20 = vsel %vm3000_vm5, %v2995_v17, %v3906_v39  ;;  %v3003_v13 = vsel %vm3000_vm5, %v2994_v54, %v3905_v56 }
 0xb7d   : > { %v3345_v58 = vpack.c.bf16 %v3004_v20, %v3003_v13  ;;  %v3909_v61 = vpop.permute.xlu0 %3908 }
 0xb7e   : > { %v3911_v29 = vunpack.i.h.bf16 %v3909_v61  ;;  %v3910_v45 = vunpack.i.l.bf16 %v3909_v61 }
 0xb7f   : > { %3357 = vst [vmem:[%s4585_s22 + $0x8] sm:$0xff] %v3345_v58  }
 0xb80   : > { %v3005_v3 = vsel %vm3000_vm5, %v2996_v23, %v3910_v45  ;;  %v3006_v49 = vsel %vm3000_vm5, %v2997_v63, %v3911_v29 }
 0xb81   : > { %v3350_v31 = vpack.c.bf16 %v3006_v49, %v3005_v3  ;;  %v3914_v8 = vpop.permute.xlu1 %3913 }
 0xb82   : > { %v3916_v50 = vunpack.i.h.bf16 %v3914_v8  ;;  %v3915_v5 = vunpack.i.l.bf16 %v3914_v8 }
 0xb83   : > { %3358 = vst [vmem:[%s4585_s22 + $0x10] sm:$0xff] %v3350_v31  }
 0xb84   : > { %v3008_v44 = vsel %vm3000_vm5, %v2999_v33, %v3916_v50  ;;  %v3007_v19 = vsel %vm3000_vm5, %v2998_v38, %v3915_v5 }
 0xb85   : > { %v3355_v7 = vpack.c.bf16 %v3008_v44, %v3007_v19 }
 0xb87   : > { %3359 = vst [vmem:[%s4585_s22 + $0x18] sm:$0xff] %v3355_v7  }
 0xb88 PF: > { %s6102_s4 = sld [smem:[#allocation19_spill]]  ;;  %s6103_s7 = sld [smem:[#allocation20_spill]] }
 0xb89   : > { %s6104_s15 = sld [smem:[#allocation28_spill]]  ;;  %s3065_s20 = sshll.u32 %s4585_s22, 4  ;;  %s5839_s20 = int_to_ptr.vmem [resolvable:$true] %s3065_s20 }
 0xb8a   : > { %s6105_s28 = sld [smem:[#allocation61_spill]]  ;;  %s3050_s10 = scalar_lea.sflag [#allocation7], %s4565_s13 }
 0xb8b   : > { %s4073_s3 = scalar_lea.vmem %s5839_s20, 512  ;;  %s4232_s29 = smov [#allocation11]  }
 0xb8c   : > { %p4074_p0 = scmp.ne.s32.totalorder %s5839_s20, %s4073_s3  ;;  %s4077_s22 = sshll.u32 %s4232_s29, 4  ;;  %s4078_s22 = int_to_ptr.vmem [resolvable:$false] %s4077_s22 }
 0xb8d   : > { %s4079_s8 = scalar_lea.vmem %s4078_s22, 1024  ;;  %p4080_p5 = scmp.lt.s32.totalorder %s5839_s20, %s4078_s22 }
 0xb8e   : > { %s3324_s12 = sshll.u32 %s6102_s4, 3  ;;  %s3325_s6 = sshll.u32 %s6103_s7, 4 }
 0xb8f   : > { %s3062_s18 = sadd.s32 %s3325_s6, %s3324_s12  ;;  %p6106_p1 = scmp.ne.s32.totalorder %s6104_s15, 0 }
 0xb90   : > { %s3326_s19 = sshll.u32 %s3062_s18, 6  ;;  %p4081_p10 = scmp.lt.s32.totalorder %s4079_s8, %s4073_s3 }
 0xb91   : > { %s5844_s11 = scalar_lea.hbm %s6105_s28, %s3326_s19  ;;  %p4075_p7 = pnand %p4074_p0, %p6106_p1 }
 0xb92   : > { %p4082_p13 = por %p4081_p10, %p4080_p5 }
 0xb93   : > { %p4076_p9 = pneg %p4075_p7 }
 0xb95   : > { %p4083_p2 = pnand %p4082_p13, %p4076_p9 }
 0xb97   : > { %4086 = shalt.err (!%p4083_p2)
}
 0xb98   : > { %s4087_s27 = scalar_lea.hbm %s5844_s11, 512  ;;  %s4091_s7 = scalar_lea.hbm %s6105_s28, 2048 }
 0xb99   : > { %p4088_p8 = scmp.ne.s32.totalorder %s5844_s11, %s4087_s27  ;;  %p4092_p11 = scmp.lt.u32.totalorder %s5844_s11, %s6105_s28 }
 0xb9a   : > { %p4093_p3 = scmp.lt.u32.totalorder %s4091_s7, %s4087_s27  ;;  %p4095_p0 = scmp.lt.u32.totalorder %s4087_s27, %s5844_s11 }
 0xb9b   : > { %p4089_p6 = pnand %p4088_p8, %p6106_p1 }
 0xb9c   : > { %p4094_p12 = por %p4093_p3, %p4092_p11 }
 0xb9d   : > { %p4090_p4 = pneg %p4089_p6 }
 0xb9e   : > { %p4096_p7 = por %p4095_p0, %p4094_p12 }
 0xba0   : > { %p4097_p9 = pnand %p4096_p7, %p4090_p4 }
 0xba2   : > { %4100 = shalt.err (!%p4097_p9)
}
 0xba3   : > { %s4233_s18 = smov 4  }
 0xba4   : > { %3574 = dma.vmem_to_hbm [thread:$0]  (%p6106_p1), %s5839_s20, 512, %s5844_s11, %s3050_s10, %s4226_s5, %s4226_s5, %s4233_s18  }
 0xba5 PF: > { %s6107_s19 = sld [smem:[#allocation16_spill]]  ;;  %s6108_s1 = sld [smem:[#allocation30_spill]] }
 0xba6   : > { %p3591_p5 = scmp.ge.s32.totalorder %s4215_s24, 2 }
 0xbab   : > { %s3080_s25 = sand.u32 1, %s6107_s19   ;;  %p6109_p10 = scmp.ne.s32.totalorder %s6108_s1, 0 }
 0xbac   : > { %s3081_s3 = scalar_lea.sflag [#allocation7], %s3080_s25 }
 0xbad   : > { %p3587_p13 = pnand %p3591_p5, %p6109_p10 }
 0xbaf   : > { %4162 = dma.done.wait (!%p3587_p13), %s3081_s3, 512  }
 0xbb0   : > { %4164 = vsyncadd (!%p3587_p13), %s3081_s3, 4294966784  ;;  %s22_s24 = sadd.s32 1, %s4215_s24   ;;  %s6111_s12 = sld [smem:[#allocation15_spill]] }
 0xbb1   : > { %p5877_p2 = scmp.ge.s32.totalorder %s22_s24, 10   ;;  %s6112_s5 = sld [smem:[#allocation17_spill]] }
 0xbb2   : > { %s6113_s19 = sld [smem:[#allocation21_spill]]  ;;  %s6114_s22 = sld [smem:[#allocation27_spill]] }
 0xbb3   : > { %s6115_s11 = sld [smem:[#allocation29_spill]]  ;;  %s6117_s13 = smov %s4175_s14 }
 0xbb4   : > { %s6118_s14 = smov %s4485_s16  ;;  %s6120_s16 = smov %s4187_s17 }
 0xbb5   : > { %s6121_s17 = smov %s4480_s30  ;;  %s6122_s18 = smov %s4203_s21 }
 0xbb6   : > { %s6123_s20 = smov %s4211_s23  ;;  %s6124_s21 = smov %s6127_s26 }
 0xbb7   : > { %s6119_s15 = smov %s6112_s5  ;;  %21 = sbr.rel (!%p5877_p2) target bundleno = 15 (0xf), region = 118 }
 0xbb9   : > { %s6125_s23 = smov %s6115_s11 }
 0xbbe   :  { %3086 = vsyncpa [#allocation6], 1 }
 0xbbf   :  { %3088 = vsyncpa [#allocation6 + $0x1], 1 }
 0xbc0   :  { %3089 = vsyncpa [#allocation9], 1 }
 0xbc1   :  { %3091 = vsyncpa [#allocation9 + $0x1], 1 }
 0xbc2   :  { %3092 = vsyncpa [#allocation7], 1 }
 0xbc3   :  { %3094 = vsyncpa [#allocation7 + $0x1], 1 }

</bundles_post_ra>
